<compile_context>
chip_gen: v7x
topology: tpu7x:2x2x1
jax: 0.10.0
libtpu: 0.0.40
codegen_flags: <defaults>
</compile_context>

<pallas_src>
import math
import functools

import jax
import jax.numpy as jnp
from jax import lax
from jax.experimental import pallas as pl
from jax.experimental.pallas import tpu as pltpu

BN_EPS = 1e-5
MATMUL_DTYPE = jnp.bfloat16     # MXU operand dtype (accumulation is always f32)


# --------------------------------------------------------------------------------------
# ConvBlock kernel: conv3x3(pad=1) + BatchNorm2d(batch stats) + ReLU + MaxPool2d(2)
# --------------------------------------------------------------------------------------
def _conv_bn_relu_pool_kernel(x00_ref, x01_ref, x10_ref, x11_ref,
                              w_ref, b_ref, g_ref, beta_ref,
                              out_ref, stat_ref, *, hp, wp, n_total):
    """grid = (phase, batch).
    phase 0: accumulate per-channel BN sum / sum-of-squares over the whole batch.
    phase 1: recompute the conv, apply BN (batch stats) + ReLU + 2x2 max-pool, store."""
    phase = pl.program_id(0)
    b = pl.program_id(1)
    np_ = hp * wp
    cin = x00_ref.shape[-1]

    # Parity images of the zero-padded input, each (Hp+1, Wp+1, Cin) bf16:
    # element (r, c) of parity (a, d) is xpad[2r + a, 2c + d].  They let us build every
    # 3x3 patch of every pool position with unit-stride static slices only.
    parity = {(0, 0): x00_ref[0], (0, 1): x01_ref[0],
              (1, 0): x10_ref[0], (1, 1): x11_ref[0]}

    # Fused im2col LHS: rows = [pool pos (0,0); (0,1); (1,0); (1,1)] x Npool,
    # cols ordered (ky, kx, cin) to match the (9*Cin, Cout) weight layout.
    pos_blocks = []
    for pi in range(2):
        for pj in range(2):
            taps = []
            for dy in range(3):
                for dx in range(3):
                    sy, sx = pi + dy, pj + dx
                    img = parity[(sy % 2, sx % 2)]
                    oy, ox = sy // 2, sx // 2
                    taps.append(img[oy:oy + hp, ox:ox + wp, :])      # (Hp, Wp, Cin)
            blk = jnp.concatenate(taps, axis=-1)                     # (Hp, Wp, 9*Cin)
            pos_blocks.append(blk.reshape(np_, 9 * cin))
    patches = jnp.concatenate(pos_blocks, axis=0)                    # (4*Npool, 9*Cin)

    # One MXU matmul for all pixels of this image (all 4 pool positions fused in M).
    y = jnp.dot(patches, w_ref[...],
                preferred_element_type=jnp.float32) + b_ref[...]     # (4*Npool, Cout)

    @pl.when(jnp.logical_and(phase == 0, b == 0))
    def _init_stats():
        stat_ref[...] = jnp.zeros_like(stat_ref)

    @pl.when(phase == 0)
    def _accumulate_stats():
        stat_ref[0:1, :] = stat_ref[0:1, :] + jnp.sum(y, axis=0, keepdims=True)
        stat_ref[1:2, :] = stat_ref[1:2, :] + jnp.sum(y * y, axis=0, keepdims=True)

    @pl.when(phase == 1)
    def _apply():
        mean = stat_ref[0:1, :] * (1.0 / n_total)
        var = jnp.maximum(stat_ref[1:2, :] * (1.0 / n_total) - mean * mean, 0.0)
        inv = g_ref[...] * lax.rsqrt(var + BN_EPS)
        shift = beta_ref[...] - mean * inv
        z = jnp.maximum(y * inv + shift, 0.0)                        # BN affine + ReLU
        pooled = jnp.maximum(jnp.maximum(z[0:np_, :], z[np_:2 * np_, :]),
                             jnp.maximum(z[2 * np_:3 * np_, :], z[3 * np_:, :]))
        out_ref[0] = pooled                                          # (Npool, Cout)


def conv_block(x_nhwc, conv_wm, conv_b, bn_gamma, bn_beta):
    """x_nhwc: (B, H, W, Cin) f32 -> (B, H//2, W//2, Cout) f32."""
    B, H, W, Cin = x_nhwc.shape
    Cout = conv_wm.shape[1]
    Hp, Wp = H // 2, W // 2
    Np = Hp * Wp

    # Zero-pad and split into the 4 stride-2 parity images (bf16): ~1x the input bytes
    # of wrapper-side traffic instead of the 9x im2col blow-up of the naive version.
    xpad = jnp.pad(x_nhwc.astype(MATMUL_DTYPE), ((0, 0), (1, 1), (1, 1), (0, 0)))
    parts = [xpad[:, pi::2, pj::2, :] for pi in range(2) for pj in range(2)]

    kernel = functools.partial(_conv_bn_relu_pool_kernel,
                               hp=Hp, wp=Wp, n_total=float(4 * Np * B))
    par_spec = pl.BlockSpec((1, Hp + 1, Wp + 1, Cin), lambda p, b: (b, 0, 0, 0))

    def full2d(shape):
        return pl.BlockSpec(shape, lambda p, b: (0, 0))

    out = pl.pallas_call(
        kernel,
        out_shape=jax.ShapeDtypeStruct((B, Np, Cout), jnp.float32),
        grid=(2, B),
        in_specs=[par_spec] * 4 + [full2d((9 * Cin, Cout)),
                                   full2d((1, Cout)),
                                   full2d((1, Cout)),
                                   full2d((1, Cout))],
        # Phase 0 keeps the output block resident (index 0, never flushed with junk);
        # phase 1 writes image b's pooled block.
        out_specs=pl.BlockSpec((1, Np, Cout), lambda p, b: (b * p, 0, 0)),
        scratch_shapes=[pltpu.VMEM((2, Cout), jnp.float32)],
        compiler_params=pltpu.CompilerParams(
            # BN batch statistics force a sequential (phase, batch) reduction.
            # TODO(synk): a two-kernel stats/apply split would allow "parallel" here
            # (megacore on v7x) at the cost of an extra HBM pass over the conv output.
            dimension_semantics=("arbitrary", "arbitrary")),
    )(*parts, conv_wm, conv_b, bn_gamma, bn_beta)
    return out.reshape(B, Hp, Wp, Cout)


# --------------------------------------------------------------------------------------
# AttentionModuleV2 kernel (support-prototype cross attention + FiLM modulation)
# --------------------------------------------------------------------------------------
def _attention_kernel(x_ref, pspt_ref,
                      wq_ref, wk_ref, wv_ref, wsq_ref, wsk_ref, wsv_ref,
                      wxu_ref, bxu_ref, wup_ref, bup_ref,
                      out_ref, *, hidden):
    x = x_ref[...]                                   # (B, HW, C) f32
    B, HW, C = x.shape
    proto_spt = pspt_ref[...]                        # (N, C) pre-aggregated prototypes
    N = proto_spt.shape[0]
    scale = 1.0 / math.sqrt(hidden)

    wq, wk, wv = wq_ref[...], wk_ref[...], wv_ref[...]
    wsq, wsk, wsv = wsq_ref[...], wsk_ref[...], wsv_ref[...]
    wxu, bxu, wup, bup = wxu_ref[...], bxu_ref[...], wup_ref[...], bup_ref[...]

    def mm(a, b):
        return jnp.dot(a, b, preferred_element_type=jnp.float32)

    def mm_t(a, b):      # a @ b.T  (contract last dims)
        return lax.dot_general(a, b, (((1,), (1,)), ((), ())),
                               preferred_element_type=jnp.float32)

    def softmax(s):
        s = s - jnp.max(s, axis=-1, keepdims=True)
        e = jnp.exp(s)
        return e * pl.reciprocal(jnp.sum(e, axis=-1, keepdims=True), approx=True)

    proto_x = jnp.mean(x, axis=1)                                    # (B, C)

    # --- stage 1: query <- support prototypes, shared key/value across batch -------
    query = mm(proto_x, wq)                                          # (B, C)
    key = mm(proto_spt, wk)                                          # (N, C)
    value = mm(proto_spt, wv)                                        # (N, C)
    corr = softmax(mm_t(query, key) * scale)                         # (B, N)
    agg = mm(corr, value)                                            # (B, C)
    # fc_x_update(cat([proto_x, agg])) as a split matmul (no in-kernel concat)
    px = mm(proto_x, wxu[:C, :]) + mm(agg, wxu[C:, :]) + bxu         # (B, C)

    # --- stage 2: support self-attention, batched over B ---------------------------
    ps = proto_spt[None, :, :] + px[:, None, :]                      # (B, N, C)
    ps2d = ps.reshape(B * N, C)
    q2 = mm(ps2d, wsq).reshape(B, N, C)
    k2 = mm(ps2d, wsk).reshape(B, N, C)
    v2 = mm(ps2d, wsv).reshape(B, N, C)
    corr2 = softmax(jnp.einsum('bnc,bmc->bnm', q2, k2,
                               preferred_element_type=jnp.float32) * scale)   # (B,N,N)
    ps2 = jnp.einsum('bnm,bmc->bnc', corr2, v2,
                     preferred_element_type=jnp.float32)             # (B, N, C)

    # --- stage 3: query <- updated support, batched over B -------------------------
    q3 = mm(px, wq)                                                  # (B, C)
    ps2_2d = ps2.reshape(B * N, C)
    k3 = mm(ps2_2d, wk).reshape(B, N, C)
    v3 = mm(ps2_2d, wv).reshape(B, N, C)
    corr3 = softmax(jnp.sum(q3[:, None, :] * k3, axis=-1) * scale)   # (B, N)
    agg3 = jnp.sum(corr3[:, :, None] * v3, axis=1)                   # (B, C)

    # --- FiLM: gamma * x + beta, single broadcasted store ---------------------------
    film = mm(px, wup[:C, :]) + mm(agg3, wup[C:, :]) + bup           # (B, 2C)
    gamma = film[:, :C]
    beta = film[:, C:]
    out_ref[...] = gamma[:, None, :] * x + beta[:, None, :]


def attention(x_nhwc, proto_spt, params, hidden):
    B, H, W, C = x_nhwc.shape
    x_flat = x_nhwc.reshape(B, H * W, C)
    kernel = functools.partial(_attention_kernel, hidden=hidden)
    out = pl.pallas_call(
        kernel,
        out_shape=jax.ShapeDtypeStruct((B, H * W, C), jnp.float32),
        in_specs=[pl.BlockSpec(memory_space=pltpu.MemorySpace.VMEM)] * 12,
        out_specs=pl.BlockSpec(memory_space=pltpu.MemorySpace.VMEM),
    )(x_flat, proto_spt,
      params['wq_t'], params['wk_t'], params['wv_t'],
      params['wsq_t'], params['wsk_t'], params['wsv_t'],
      params['wxu_t'], params['bxu'], params['wup_t'], params['bup'])
    return out.reshape(B, H, W, C)


def aggregate_features(feat_nhwc, out_channels, k_spt):
    """MetaConvSupport.aggregate_features: global avg-pool + mean over k_spt shots."""
    m = jnp.mean(feat_nhwc, axis=(1, 2))                              # (Bs, C)
    return m.reshape(out_channels, k_spt, m.shape[-1]).mean(axis=1)   # (N, C)


# --------------------------------------------------------------------------------------
# Parameters (deterministic, in-script) and the MetaConvSupport wrapper
# --------------------------------------------------------------------------------------
def init_params(key, in_channels, hidden, out_channels, in_size):
    ks = jax.random.split(key, 20)
    p = {}

    def conv_prep(k, cin, cout):
        kw, kb = jax.random.split(k)
        fan_in = cin * 9
        w = jax.random.normal(kw, (cout, cin, 3, 3), jnp.float32) * (2.0 / fan_in) ** 0.5
        lim = 1.0 / fan_in ** 0.5
        b = jax.random.uniform(kb, (cout,), jnp.float32, -lim, lim)
        # torch (Cout, Cin, 3, 3) -> (ky, kx, ci, co) -> (9*Cin, Cout) bf16 MXU operand
        wm = jnp.transpose(w, (2, 3, 1, 0)).reshape(9 * cin, cout).astype(MATMUL_DTYPE)
        return wm, b.reshape(1, cout)

    p['conv1_wm'], p['conv1_b'] = conv_prep(ks[0], in_channels, hidden)
    p['conv2_wm'], p['conv2_b'] = conv_prep(ks[1], hidden, hidden)
    p['conv3_wm'], p['conv3_b'] = conv_prep(ks[2], hidden, hidden)
    p['conv4_wm'], p['conv4_b'] = conv_prep(ks[3], hidden, hidden)
    for i in (1, 2, 3, 4):                    # BatchNorm2d default affine init
        p[f'bn{i}_g'] = jnp.ones((1, hidden), jnp.float32)
        p[f'bn{i}_b'] = jnp.zeros((1, hidden), jnp.float32)

    def lin_t(k, fin, fout):                  # Linear weight stored pre-transposed (in, out)
        lim = 1.0 / fin ** 0.5
        return jax.random.uniform(k, (fin, fout), jnp.float32, -lim, lim)

    p['wq_t'] = lin_t(ks[4], hidden, hidden)
    p['wk_t'] = lin_t(ks[5], hidden, hidden)
    p['wv_t'] = lin_t(ks[6], hidden, hidden)
    p['wsq_t'] = lin_t(ks[7], hidden, hidden)
    p['wsk_t'] = lin_t(ks[8], hidden, hidden)
    p['wsv_t'] = lin_t(ks[9], hidden, hidden)
    p['wxu_t'] = lin_t(ks[10], 2 * hidden, hidden)
    lim2 = 1.0 / (2 * hidden) ** 0.5
    p['bxu'] = jax.random.uniform(ks[11], (1, hidden), jnp.float32, -lim2, lim2)
    p['wup_t'] = lin_t(ks[12], 2 * hidden, 2 * hidden)
    p['bup'] = jax.random.uniform(ks[13], (1, 2 * hidden), jnp.float32, -lim2, lim2)
    # classifier head / temperature exist in the torch module but are unused by forward()
    p['fc_w_t'] = lin_t(ks[14], (in_size // 16) ** 2 * hidden, out_channels)
    p['fc_b'] = jnp.zeros((out_channels,), jnp.float32)
    p['temp'] = jnp.float32(10.0)
    return p


class MetaConvSupportPallas:
    def __init__(self, params, out_channels=5, hidden=32, k_spt=1):
        self.p = params
        self.out_channels = out_channels
        self.hidden = hidden
        self.k_spt = k_spt
        self.cached = {}          # aggregated support prototypes (p3, p4)

    def forward(self, x_nchw, is_support=False):
        p = self.p
        B = x_nchw.shape[0]
        x = jnp.transpose(x_nchw, (0, 2, 3, 1)).astype(jnp.float32)   # NCHW -> NHWC

        x = conv_block(x, p['conv1_wm'], p['conv1_b'], p['bn1_g'], p['bn1_b'])
        x = conv_block(x, p['conv2_wm'], p['conv2_b'], p['bn2_g'], p['bn2_b'])
        x = conv_block(x, p['conv3_wm'], p['conv3_b'], p['bn3_g'], p['bn3_b'])
        if is_support:
            self.cached['p3'] = aggregate_features(x, self.out_channels, self.k_spt)
        x = attention(x, self.cached['p3'], p, self.hidden)
        x = conv_block(x, p['conv4_wm'], p['conv4_b'], p['bn4_g'], p['bn4_b'])
        if is_support:
            self.cached['p4'] = aggregate_features(x, self.out_channels, self.k_spt)
        x = attention(x, self.cached['p4'], p, self.hidden)

        # torch flattens NCHW; transpose back before flattening so ordering matches
        x = jnp.transpose(x, (0, 3, 1, 2)).reshape(B, -1)
        return x

    def predict(self, emb):              # self.fc head (not used by forward)
        return jnp.dot(emb, self.p['fc_w_t']) + self.p['fc_b']


if __name__ == "__main__":
    in_size = 16          # small spatial size; in_size/16 = 1 => embedding dim = hidden
    in_channels = 3
    out_channels = 5
    hidden = 32
    k_spt = 1

    key = jax.random.PRNGKey(0)
    kp, kx, kq = jax.random.split(key, 3)
    params = init_params(kp, in_channels, hidden, out_channels, in_size)
    model = MetaConvSupportPallas(params, out_channels, hidden, k_spt)

    # support set must have out_channels * k_spt examples (aggregate_features reshape)
    x_support = jax.random.normal(kx, (out_channels * k_spt, in_channels, in_size, in_size),
                                  jnp.float32)
    x_query = jax.random.normal(kq, (4, in_channels, in_size, in_size), jnp.float32)

    emb_spt = model.forward(x_support, is_support=True)     # caches support prototypes
    emb_qry = model.forward(x_query, is_support=False)      # uses cached prototypes
    jax.block_until_ready(emb_spt)
    jax.block_until_ready(emb_qry)

    assert emb_spt.shape == (out_channels * k_spt, (in_size // 16) ** 2 * hidden)
    assert emb_qry.shape == (4, (in_size // 16) ** 2 * hidden)
    print("KERNEL_OK")
</pallas_src>

<mosaic_0001>
module attributes {stable_mosaic.version = 11 : i64} {
  func.func @_conv_bn_relu_pool_kernel(%arg0: i32, %arg1: i32, %arg2: memref<1x9x9x3xbf16, #tpu.memory_space<vmem>>, %arg3: memref<1x9x9x3xbf16, #tpu.memory_space<vmem>>, %arg4: memref<1x9x9x3xbf16, #tpu.memory_space<vmem>>, %arg5: memref<1x9x9x3xbf16, #tpu.memory_space<vmem>>, %arg6: memref<27x32xbf16, #tpu.memory_space<vmem>>, %arg7: memref<1x32xf32, #tpu.memory_space<vmem>>, %arg8: memref<1x32xf32, #tpu.memory_space<vmem>>, %arg9: memref<1x32xf32, #tpu.memory_space<vmem>>, %arg10: memref<1x64x32xf32, #tpu.memory_space<vmem>>, %arg11: memref<2x32xf32, #tpu.memory_space<vmem>>) attributes {dimension_semantics = [#tpu.dimension_semantics<arbitrary>, #tpu.dimension_semantics<arbitrary>], iteration_bounds = array<i64: 2, 5>, scalar_prefetch = 0 : i64, scratch_operands = 1 : i64, tpu.core_type = #tpu.core_type<tc>, window_params = [{transform_indices = @transform_0, window_bounds = array<i64: 1, 9, 9, 3>}, {transform_indices = @transform_1, window_bounds = array<i64: 1, 9, 9, 3>}, {transform_indices = @transform_2, window_bounds = array<i64: 1, 9, 9, 3>}, {transform_indices = @transform_3, window_bounds = array<i64: 1, 9, 9, 3>}, {pipeline_mode = #tpu.pipeline_mode<synchronous>, transform_indices = @transform_4, window_bounds = array<i64: 27, 32>}, {pipeline_mode = #tpu.pipeline_mode<synchronous>, transform_indices = @transform_5, window_bounds = array<i64: 1, 32>}, {pipeline_mode = #tpu.pipeline_mode<synchronous>, transform_indices = @transform_6, window_bounds = array<i64: 1, 32>}, {pipeline_mode = #tpu.pipeline_mode<synchronous>, transform_indices = @transform_7, window_bounds = array<i64: 1, 32>}, {transform_indices = @transform_8, window_bounds = array<i64: 1, 64, 32>}]} {
    %c0 = arith.constant 0 : index
    %c0_0 = arith.constant 0 : index
    %c0_1 = arith.constant 0 : index
    %c0_2 = arith.constant 0 : index
    %0 = vector.load %arg2[%c0, %c0_0, %c0_1, %c0_2] : memref<1x9x9x3xbf16, #tpu.memory_space<vmem>>, vector<1x9x9x3xbf16>
    %1 = vector.shape_cast %0 : vector<1x9x9x3xbf16> to vector<9x9x3xbf16>
    %c0_3 = arith.constant 0 : index
    %c0_4 = arith.constant 0 : index
    %c0_5 = arith.constant 0 : index
    %c0_6 = arith.constant 0 : index
    %2 = vector.load %arg3[%c0_3, %c0_4, %c0_5, %c0_6] : memref<1x9x9x3xbf16, #tpu.memory_space<vmem>>, vector<1x9x9x3xbf16>
    %3 = vector.shape_cast %2 : vector<1x9x9x3xbf16> to vector<9x9x3xbf16>
    %c0_7 = arith.constant 0 : index
    %c0_8 = arith.constant 0 : index
    %c0_9 = arith.constant 0 : index
    %c0_10 = arith.constant 0 : index
    %4 = vector.load %arg4[%c0_7, %c0_8, %c0_9, %c0_10] : memref<1x9x9x3xbf16, #tpu.memory_space<vmem>>, vector<1x9x9x3xbf16>
    %5 = vector.shape_cast %4 : vector<1x9x9x3xbf16> to vector<9x9x3xbf16>
    %c0_11 = arith.constant 0 : index
    %c0_12 = arith.constant 0 : index
    %c0_13 = arith.constant 0 : index
    %c0_14 = arith.constant 0 : index
    %6 = vector.load %arg5[%c0_11, %c0_12, %c0_13, %c0_14] : memref<1x9x9x3xbf16, #tpu.memory_space<vmem>>, vector<1x9x9x3xbf16>
    %7 = vector.shape_cast %6 : vector<1x9x9x3xbf16> to vector<9x9x3xbf16>
    %8 = vector.extract_strided_slice %1 {offsets = [0, 0, 0], sizes = [8, 8, 3], strides = [1, 1, 1]} : vector<9x9x3xbf16> to vector<8x8x3xbf16>
    %9 = vector.extract_strided_slice %3 {offsets = [0, 0, 0], sizes = [8, 8, 3], strides = [1, 1, 1]} : vector<9x9x3xbf16> to vector<8x8x3xbf16>
    %10 = vector.extract_strided_slice %1 {offsets = [0, 1, 0], sizes = [8, 8, 3], strides = [1, 1, 1]} : vector<9x9x3xbf16> to vector<8x8x3xbf16>
    %11 = vector.extract_strided_slice %5 {offsets = [0, 0, 0], sizes = [8, 8, 3], strides = [1, 1, 1]} : vector<9x9x3xbf16> to vector<8x8x3xbf16>
    %12 = vector.extract_strided_slice %7 {offsets = [0, 0, 0], sizes = [8, 8, 3], strides = [1, 1, 1]} : vector<9x9x3xbf16> to vector<8x8x3xbf16>
    %13 = vector.extract_strided_slice %5 {offsets = [0, 1, 0], sizes = [8, 8, 3], strides = [1, 1, 1]} : vector<9x9x3xbf16> to vector<8x8x3xbf16>
    %14 = vector.extract_strided_slice %1 {offsets = [1, 0, 0], sizes = [8, 8, 3], strides = [1, 1, 1]} : vector<9x9x3xbf16> to vector<8x8x3xbf16>
    %15 = vector.extract_strided_slice %3 {offsets = [1, 0, 0], sizes = [8, 8, 3], strides = [1, 1, 1]} : vector<9x9x3xbf16> to vector<8x8x3xbf16>
    %16 = vector.extract_strided_slice %1 {offsets = [1, 1, 0], sizes = [8, 8, 3], strides = [1, 1, 1]} : vector<9x9x3xbf16> to vector<8x8x3xbf16>
    %17 = tpu.concatenate %8, %9, %10, %11, %12, %13, %14, %15, %16 in 2 : vector<8x8x3xbf16>, vector<8x8x3xbf16>, vector<8x8x3xbf16>, vector<8x8x3xbf16>, vector<8x8x3xbf16>, vector<8x8x3xbf16>, vector<8x8x3xbf16>, vector<8x8x3xbf16>, vector<8x8x3xbf16> -> vector<8x8x27xbf16>
    %18 = vector.shape_cast %17 : vector<8x8x27xbf16> to vector<64x27xbf16>
    %19 = vector.extract_strided_slice %3 {offsets = [0, 0, 0], sizes = [8, 8, 3], strides = [1, 1, 1]} : vector<9x9x3xbf16> to vector<8x8x3xbf16>
    %20 = vector.extract_strided_slice %1 {offsets = [0, 1, 0], sizes = [8, 8, 3], strides = [1, 1, 1]} : vector<9x9x3xbf16> to vector<8x8x3xbf16>
    %21 = vector.extract_strided_slice %3 {offsets = [0, 1, 0], sizes = [8, 8, 3], strides = [1, 1, 1]} : vector<9x9x3xbf16> to vector<8x8x3xbf16>
    %22 = vector.extract_strided_slice %7 {offsets = [0, 0, 0], sizes = [8, 8, 3], strides = [1, 1, 1]} : vector<9x9x3xbf16> to vector<8x8x3xbf16>
    %23 = vector.extract_strided_slice %5 {offsets = [0, 1, 0], sizes = [8, 8, 3], strides = [1, 1, 1]} : vector<9x9x3xbf16> to vector<8x8x3xbf16>
    %24 = vector.extract_strided_slice %7 {offsets = [0, 1, 0], sizes = [8, 8, 3], strides = [1, 1, 1]} : vector<9x9x3xbf16> to vector<8x8x3xbf16>
    %25 = vector.extract_strided_slice %3 {offsets = [1, 0, 0], sizes = [8, 8, 3], strides = [1, 1, 1]} : vector<9x9x3xbf16> to vector<8x8x3xbf16>
    %26 = vector.extract_strided_slice %1 {offsets = [1, 1, 0], sizes = [8, 8, 3], strides = [1, 1, 1]} : vector<9x9x3xbf16> to vector<8x8x3xbf16>
    %27 = vector.extract_strided_slice %3 {offsets = [1, 1, 0], sizes = [8, 8, 3], strides = [1, 1, 1]} : vector<9x9x3xbf16> to vector<8x8x3xbf16>
    %28 = tpu.concatenate %19, %20, %21, %22, %23, %24, %25, %26, %27 in 2 : vector<8x8x3xbf16>, vector<8x8x3xbf16>, vector<8x8x3xbf16>, vector<8x8x3xbf16>, vector<8x8x3xbf16>, vector<8x8x3xbf16>, vector<8x8x3xbf16>, vector<8x8x3xbf16>, vector<8x8x3xbf16> -> vector<8x8x27xbf16>
    %29 = vector.shape_cast %28 : vector<8x8x27xbf16> to vector<64x27xbf16>
    %30 = vector.extract_strided_slice %5 {offsets = [0, 0, 0], sizes = [8, 8, 3], strides = [1, 1, 1]} : vector<9x9x3xbf16> to vector<8x8x3xbf16>
    %31 = vector.extract_strided_slice %7 {offsets = [0, 0, 0], sizes = [8, 8, 3], strides = [1, 1, 1]} : vector<9x9x3xbf16> to vector<8x8x3xbf16>
    %32 = vector.extract_strided_slice %5 {offsets = [0, 1, 0], sizes = [8, 8, 3], strides = [1, 1, 1]} : vector<9x9x3xbf16> to vector<8x8x3xbf16>
    %33 = vector.extract_strided_slice %1 {offsets = [1, 0, 0], sizes = [8, 8, 3], strides = [1, 1, 1]} : vector<9x9x3xbf16> to vector<8x8x3xbf16>
    %34 = vector.extract_strided_slice %3 {offsets = [1, 0, 0], sizes = [8, 8, 3], strides = [1, 1, 1]} : vector<9x9x3xbf16> to vector<8x8x3xbf16>
    %35 = vector.extract_strided_slice %1 {offsets = [1, 1, 0], sizes = [8, 8, 3], strides = [1, 1, 1]} : vector<9x9x3xbf16> to vector<8x8x3xbf16>
    %36 = vector.extract_strided_slice %5 {offsets = [1, 0, 0], sizes = [8, 8, 3], strides = [1, 1, 1]} : vector<9x9x3xbf16> to vector<8x8x3xbf16>
    %37 = vector.extract_strided_slice %7 {offsets = [1, 0, 0], sizes = [8, 8, 3], strides = [1, 1, 1]} : vector<9x9x3xbf16> to vector<8x8x3xbf16>
    %38 = vector.extract_strided_slice %5 {offsets = [1, 1, 0], sizes = [8, 8, 3], strides = [1, 1, 1]} : vector<9x9x3xbf16> to vector<8x8x3xbf16>
    %39 = tpu.concatenate %30, %31, %32, %33, %34, %35, %36, %37, %38 in 2 : vector<8x8x3xbf16>, vector<8x8x3xbf16>, vector<8x8x3xbf16>, vector<8x8x3xbf16>, vector<8x8x3xbf16>, vector<8x8x3xbf16>, vector<8x8x3xbf16>, vector<8x8x3xbf16>, vector<8x8x3xbf16> -> vector<8x8x27xbf16>
    %40 = vector.shape_cast %39 : vector<8x8x27xbf16> to vector<64x27xbf16>
    %41 = vector.extract_strided_slice %7 {offsets = [0, 0, 0], sizes = [8, 8, 3], strides = [1, 1, 1]} : vector<9x9x3xbf16> to vector<8x8x3xbf16>
    %42 = vector.extract_strided_slice %5 {offsets = [0, 1, 0], sizes = [8, 8, 3], strides = [1, 1, 1]} : vector<9x9x3xbf16> to vector<8x8x3xbf16>
    %43 = vector.extract_strided_slice %7 {offsets = [0, 1, 0], sizes = [8, 8, 3], strides = [1, 1, 1]} : vector<9x9x3xbf16> to vector<8x8x3xbf16>
    %44 = vector.extract_strided_slice %3 {offsets = [1, 0, 0], sizes = [8, 8, 3], strides = [1, 1, 1]} : vector<9x9x3xbf16> to vector<8x8x3xbf16>
    %45 = vector.extract_strided_slice %1 {offsets = [1, 1, 0], sizes = [8, 8, 3], strides = [1, 1, 1]} : vector<9x9x3xbf16> to vector<8x8x3xbf16>
    %46 = vector.extract_strided_slice %3 {offsets = [1, 1, 0], sizes = [8, 8, 3], strides = [1, 1, 1]} : vector<9x9x3xbf16> to vector<8x8x3xbf16>
    %47 = vector.extract_strided_slice %7 {offsets = [1, 0, 0], sizes = [8, 8, 3], strides = [1, 1, 1]} : vector<9x9x3xbf16> to vector<8x8x3xbf16>
    %48 = vector.extract_strided_slice %5 {offsets = [1, 1, 0], sizes = [8, 8, 3], strides = [1, 1, 1]} : vector<9x9x3xbf16> to vector<8x8x3xbf16>
    %49 = vector.extract_strided_slice %7 {offsets = [1, 1, 0], sizes = [8, 8, 3], strides = [1, 1, 1]} : vector<9x9x3xbf16> to vector<8x8x3xbf16>
    %50 = tpu.concatenate %41, %42, %43, %44, %45, %46, %47, %48, %49 in 2 : vector<8x8x3xbf16>, vector<8x8x3xbf16>, vector<8x8x3xbf16>, vector<8x8x3xbf16>, vector<8x8x3xbf16>, vector<8x8x3xbf16>, vector<8x8x3xbf16>, vector<8x8x3xbf16>, vector<8x8x3xbf16> -> vector<8x8x27xbf16>
    %51 = vector.shape_cast %50 : vector<8x8x27xbf16> to vector<64x27xbf16>
    %52 = tpu.concatenate %18, %29, %40, %51 in 0 : vector<64x27xbf16>, vector<64x27xbf16>, vector<64x27xbf16>, vector<64x27xbf16> -> vector<256x27xbf16>
    %c0_15 = arith.constant 0 : index
    %c0_16 = arith.constant 0 : index
    %53 = vector.load %arg6[%c0_15, %c0_16] : memref<27x32xbf16, #tpu.memory_space<vmem>>, vector<27x32xbf16>
    %cst = arith.constant dense<0.000000e+00> : vector<256x32xf32>
    %54 = tpu.matmul %52, %53, %cst {dimension_numbers = #tpu.dot_dimension_numbers<[1], [0], [0], [1], [0, 0, 1, 1], [], []>} : vector<256x27xbf16>, vector<27x32xbf16>, vector<256x32xf32> -> vector<256x32xf32>
    %c0_17 = arith.constant 0 : index
    %c0_18 = arith.constant 0 : index
    %55 = vector.load %arg7[%c0_17, %c0_18] : memref<1x32xf32, #tpu.memory_space<vmem>>, vector<1x32xf32>
    %56 = vector.broadcast %55 : vector<1x32xf32> to vector<256x32xf32>
    %57 = arith.addf %54, %56 : vector<256x32xf32>
    %c0_i32 = arith.constant 0 : i32
    %58 = arith.cmpi eq, %arg0, %c0_i32 : i32
    %c0_i32_19 = arith.constant 0 : i32
    %59 = arith.cmpi eq, %arg1, %c0_i32_19 : i32
    %60 = arith.andi %58, %59 : i1
    %61 = arith.extui %60 : i1 to i32
    %c0_i32_20 = arith.constant 0 : i32
    %62 = arith.cmpi ne, %61, %c0_i32_20 : i32
    scf.if %62 {
      %cst_24 = arith.constant 0.000000e+00 : f32
      %69 = vector.broadcast %cst_24 : f32 to vector<2x32xf32>
      %c0_25 = arith.constant 0 : index
      %c0_26 = arith.constant 0 : index
      %70 = vector.load %arg11[%c0_25, %c0_26] : memref<2x32xf32, #tpu.memory_space<vmem>>, vector<2x32xf32>
      tpu.vector_store %arg11[%c0_25, %c0_26], %69 {strides = array<i32>} : memref<2x32xf32, #tpu.memory_space<vmem>>, vector<2x32xf32>,
    } else {
    }
    %c0_i32_21 = arith.constant 0 : i32
    %63 = arith.cmpi eq, %arg0, %c0_i32_21 : i32
    %64 = arith.extui %63 : i1 to i32
    %c0_i32_22 = arith.constant 0 : i32
    %65 = arith.cmpi ne, %64, %c0_i32_22 : i32
    scf.if %65 {
      %c0_24 = arith.constant 0 : index
      %c0_25 = arith.constant 0 : index
      %69 = vector.load %arg11[%c0_24, %c0_25] : memref<2x32xf32, #tpu.memory_space<vmem>>, vector<1x32xf32>
      %cst_26 = arith.constant dense<0.000000e+00> : vector<32xf32>
      %70 = vector.multi_reduction <add>, %57, %cst_26 [0] : vector<256x32xf32> to vector<32xf32>
      %71 = vector.shape_cast %70 : vector<32xf32> to vector<1x32xf32>
      %72 = arith.addf %69, %71 : vector<1x32xf32>
      %c0_27 = arith.constant 0 : index
      %c0_28 = arith.constant 0 : index
      %73 = vector.load %arg11[%c0_27, %c0_28] : memref<2x32xf32, #tpu.memory_space<vmem>>, vector<1x32xf32>
      tpu.vector_store %arg11[%c0_27, %c0_28], %72 {strides = array<i32>} : memref<2x32xf32, #tpu.memory_space<vmem>>, vector<1x32xf32>,
      %c1 = arith.constant 1 : index
      %c0_29 = arith.constant 0 : index
      %74 = vector.load %arg11[%c1, %c0_29] : memref<2x32xf32, #tpu.memory_space<vmem>>, vector<1x32xf32>
      %75 = arith.mulf %57, %57 : vector<256x32xf32>
      %cst_30 = arith.constant dense<0.000000e+00> : vector<32xf32>
      %76 = vector.multi_reduction <add>, %75, %cst_30 [0] : vector<256x32xf32> to vector<32xf32>
      %77 = vector.shape_cast %76 : vector<32xf32> to vector<1x32xf32>
      %78 = arith.addf %74, %77 : vector<1x32xf32>
      %c1_31 = arith.constant 1 : index
      %c0_32 = arith.constant 0 : index
      %79 = vector.load %arg11[%c1_31, %c0_32] : memref<2x32xf32, #tpu.memory_space<vmem>>, vector<1x32xf32>
      tpu.vector_store %arg11[%c1_31, %c0_32], %78 {strides = array<i32>} : memref<2x32xf32, #tpu.memory_space<vmem>>, vector<1x32xf32>,
    } else {
    }
    %c1_i32 = arith.constant 1 : i32
    %66 = arith.cmpi eq, %arg0, %c1_i32 : i32
    %67 = arith.extui %66 : i1 to i32
    %c0_i32_23 = arith.constant 0 : i32
    %68 = arith.cmpi ne, %67, %c0_i32_23 : i32
    scf.if %68 {
      %c0_24 = arith.constant 0 : index
      %c0_25 = arith.constant 0 : index
      %69 = vector.load %arg11[%c0_24, %c0_25] : memref<2x32xf32, #tpu.memory_space<vmem>>, vector<1x32xf32>
      %cst_26 = arith.constant 7.812500e-04 : f32
      %70 = vector.broadcast %cst_26 : f32 to vector<1x32xf32>
      %71 = arith.mulf %69, %70 : vector<1x32xf32>
      %c1 = arith.constant 1 : index
      %c0_27 = arith.constant 0 : index
      %72 = vector.load %arg11[%c1, %c0_27] : memref<2x32xf32, #tpu.memory_space<vmem>>, vector<1x32xf32>
      %cst_28 = arith.constant 7.812500e-04 : f32
      %73 = vector.broadcast %cst_28 : f32 to vector<1x32xf32>
      %74 = arith.mulf %72, %73 : vector<1x32xf32>
      %75 = arith.mulf %71, %71 : vector<1x32xf32>
      %76 = arith.subf %74, %75 : vector<1x32xf32>
      %cst_29 = arith.constant 0.000000e+00 : f32
      %77 = vector.broadcast %cst_29 : f32 to vector<1x32xf32>
      %78 = arith.maximumf %76, %77 : vector<1x32xf32>
      %c0_30 = arith.constant 0 : index
      %c0_31 = arith.constant 0 : index
      %79 = vector.load %arg8[%c0_30, %c0_31] : memref<1x32xf32, #tpu.memory_space<vmem>>, vector<1x32xf32>
      %cst_32 = arith.constant 9.99999974E-6 : f32
      %80 = vector.broadcast %cst_32 : f32 to vector<1x32xf32>
      %81 = arith.addf %78, %80 : vector<1x32xf32>
      %82 = math.rsqrt %81 : vector<1x32xf32>
      %83 = arith.mulf %79, %82 : vector<1x32xf32>
      %c0_33 = arith.constant 0 : index
      %c0_34 = arith.constant 0 : index
      %84 = vector.load %arg9[%c0_33, %c0_34] : memref<1x32xf32, #tpu.memory_space<vmem>>, vector<1x32xf32>
      %85 = arith.mulf %71, %83 : vector<1x32xf32>
      %86 = arith.subf %84, %85 : vector<1x32xf32>
      %87 = vector.broadcast %83 : vector<1x32xf32> to vector<256x32xf32>
      %88 = arith.mulf %57, %87 : vector<256x32xf32>
      %89 = vector.broadcast %86 : vector<1x32xf32> to vector<256x32xf32>
      %90 = arith.addf %88, %89 : vector<256x32xf32>
      %cst_35 = arith.constant 0.000000e+00 : f32
      %91 = vector.broadcast %cst_35 : f32 to vector<256x32xf32>
      %92 = arith.maximumf %90, %91 : vector<256x32xf32>
      %93 = vector.extract_strided_slice %92 {offsets = [0, 0], sizes = [64, 32], strides = [1, 1]} : vector<256x32xf32> to vector<64x32xf32>
      %94 = vector.extract_strided_slice %92 {offsets = [64, 0], sizes = [64, 32], strides = [1, 1]} : vector<256x32xf32> to vector<64x32xf32>
      %95 = arith.maximumf %93, %94 : vector<64x32xf32>
      %96 = vector.extract_strided_slice %92 {offsets = [128, 0], sizes = [64, 32], strides = [1, 1]} : vector<256x32xf32> to vector<64x32xf32>
      %97 = vector.extract_strided_slice %92 {offsets = [192, 0], sizes = [64, 32], strides = [1, 1]} : vector<256x32xf32> to vector<64x32xf32>
      %98 = arith.maximumf %96, %97 : vector<64x32xf32>
      %99 = arith.maximumf %95, %98 : vector<64x32xf32>
      %c0_36 = arith.constant 0 : index
      %c0_37 = arith.constant 0 : index
      %c0_38 = arith.constant 0 : index
      %100 = vector.load %arg10[%c0_36, %c0_37, %c0_38] : memref<1x64x32xf32, #tpu.memory_space<vmem>>, vector<1x64x32xf32>
      %101 = vector.shape_cast %100 : vector<1x64x32xf32> to vector<64x32xf32>
      %102 = vector.shape_cast %99 : vector<64x32xf32> to vector<1x64x32xf32>
      tpu.vector_store %arg10[%c0_36, %c0_37, %c0_38], %102 {strides = array<i32>} : memref<1x64x32xf32, #tpu.memory_space<vmem>>, vector<1x64x32xf32>,
    } else {
    }
    return
  }
  func.func @transform_0(%arg0: i32, %arg1: i32) -> (i32, i32, i32, i32) {
    %c0_i32 = arith.constant 0 : i32
    %c0_i32_0 = arith.constant 0 : i32
    %c0_i32_1 = arith.constant 0 : i32
    %c0_i32_2 = arith.constant 0 : i32
    return %arg1, %c0_i32, %c0_i32_0, %c0_i32_1 : i32, i32, i32, i32
  }
  func.func @transform_1(%arg0: i32, %arg1: i32) -> (i32, i32, i32, i32) {
    %c0_i32 = arith.constant 0 : i32
    %c0_i32_0 = arith.constant 0 : i32
    %c0_i32_1 = arith.constant 0 : i32
    %c0_i32_2 = arith.constant 0 : i32
    return %arg1, %c0_i32, %c0_i32_0, %c0_i32_1 : i32, i32, i32, i32
  }
  func.func @transform_2(%arg0: i32, %arg1: i32) -> (i32, i32, i32, i32) {
    %c0_i32 = arith.constant 0 : i32
    %c0_i32_0 = arith.constant 0 : i32
    %c0_i32_1 = arith.constant 0 : i32
    %c0_i32_2 = arith.constant 0 : i32
    return %arg1, %c0_i32, %c0_i32_0, %c0_i32_1 : i32, i32, i32, i32
  }
  func.func @transform_3(%arg0: i32, %arg1: i32) -> (i32, i32, i32, i32) {
    %c0_i32 = arith.constant 0 : i32
    %c0_i32_0 = arith.constant 0 : i32
    %c0_i32_1 = arith.constant 0 : i32
    %c0_i32_2 = arith.constant 0 : i32
    return %arg1, %c0_i32, %c0_i32_0, %c0_i32_1 : i32, i32, i32, i32
  }
  func.func @transform_4(%arg0: i32, %arg1: i32) -> (i32, i32) {
    %c0_i32 = arith.constant 0 : i32
    %c0_i32_0 = arith.constant 0 : i32
    %c0_i32_1 = arith.constant 0 : i32
    return %c0_i32, %c0_i32_0 : i32, i32
  }
  func.func @transform_5(%arg0: i32, %arg1: i32) -> (i32, i32) {
    %c0_i32 = arith.constant 0 : i32
    %c0_i32_0 = arith.constant 0 : i32
    %c0_i32_1 = arith.constant 0 : i32
    return %c0_i32, %c0_i32_0 : i32, i32
  }
  func.func @transform_6(%arg0: i32, %arg1: i32) -> (i32, i32) {
    %c0_i32 = arith.constant 0 : i32
    %c0_i32_0 = arith.constant 0 : i32
    %c0_i32_1 = arith.constant 0 : i32
    return %c0_i32, %c0_i32_0 : i32, i32
  }
  func.func @transform_7(%arg0: i32, %arg1: i32) -> (i32, i32) {
    %c0_i32 = arith.constant 0 : i32
    %c0_i32_0 = arith.constant 0 : i32
    %c0_i32_1 = arith.constant 0 : i32
    return %c0_i32, %c0_i32_0 : i32, i32
  }
  func.func @transform_8(%arg0: i32, %arg1: i32) -> (i32, i32, i32) {
    %0 = arith.muli %arg1, %arg0 : i32
    %c0_i32 = arith.constant 0 : i32
    %c0_i32_0 = arith.constant 0 : i32
    %c0_i32_1 = arith.constant 0 : i32
    return %0, %c0_i32, %c0_i32_0 : i32, i32, i32
  }
}

</mosaic_0001>

<bundles_post_ra>
// kernel: tpu_custom_call.1
= control target key start
LH: loop header
LB: loop body
LE: loop exit
PB: predicated region body
PF: predicated region fallthrough
CT: control target
= control target key end

     0   :  { %s3185_s27 = smov 0   ;;  %s3187_s28 = smov 0   ;;  %s5261_s0 = inlined_call_operand.vmem [shape: bf16[5,9,9,3], index: 0, kind: input, shape index: {}]   ;;  %s5262_s1 = inlined_call_operand.vmem [shape: bf16[5,9,9,3], index: 1, kind: input, shape index: {}]   ;;  %s5263_s2 = inlined_call_operand.vmem [shape: bf16[5,9,9,3], index: 2, kind: input, shape index: {}]   ;;  %s5264_s3 = inlined_call_operand.vmem [shape: bf16[5,9,9,3], index: 3, kind: input, shape index: {}]   ;;  %s5265_s4 = inlined_call_operand.vmem [shape: bf16[27,32], index: 4, kind: input, shape index: {}]   ;;  %s5266_s5 = inlined_call_operand.vmem [shape: f32[1,32], index: 5, kind: input, shape index: {}]   ;;  %s5267_s6 = inlined_call_operand.vmem [shape: f32[1,32], index: 6, kind: input, shape index: {}]   ;;  %s5268_s7 = inlined_call_operand.vmem [shape: f32[1,32], index: 7, kind: input, shape index: {}]   ;;  %s5269_s8 = inlined_call_operand.vmem [shape: f32[5,64,32], index: 8, kind: output, shape index: {}]  }
   0x1   :  { %s3189_s29 = smov 0   ;;  %s3191_s30 = smov 0  }
   0x2   :  { %s3193_s9 = smov 0  }
   0x3 LB: > { %s27_s10 = sadd.s32 1, %s3120_s29  ;;  %s30_s11 = sadd.s32 1, %s3124_s30  ;;  %s3128_s9 = sphi %s3193_s9, %s18_s9   ;;  %s3124_s30 = sphi %s3191_s30, %s5598_s30   ;;  %s3120_s29 = sphi %s3189_s29, %s5597_s29   ;;  %s3116_s28 = sphi %s3187_s28, %s5596_s28   ;;  %s3112_s27 = sphi %s3185_s27, %s5595_s27  }
   0x4   : > { %p28_p0 = scmp.ge.s32.totalorder %s27_s10, 5  ;;  %p2764_p1 = scmp.ge.s32.totalorder %s3128_s9, 1 }
   0x5   : > { %p306_p2 = scmp.lt.s32.totalorder %s3128_s9, 11 }
   0x6   : > { %s5600_s10 = smov (%p28_p0, %s27_s10), 0  ;;  %s5602_s11 = smov (!%p28_p0, %s30_s11), %s3124_s30 }
   0x7   : > { %p307_p3 = pnand %p2764_p1, %p306_p2  ;;  %p32_p4 = scmp.ge.s32.totalorder %s5602_s11, 2 }
   0x9   : > { %s5604_s11 = smov (%p32_p4, %s5602_s11), 0  ;;  %310 = sbr.rel (%p307_p3) target bundleno = 1024 (0x400), region = 52 }
  0x10   : > { %p356_p5 = scmp.lt.s32.totalorder %s3112_s27, 4  ;;  %s3130_s20 = smov 3   ;;  %vm2138_vm0 = vcmask 1044480   ;;  %vm2139_vm1 = vcmask 1045504   ;;  %vm855_vm2 = vcmask 23552   ;;  %vm880_vm3 = vcmask 48128  }
  0x11   : > { %s3131_s21 = smov 6   ;;  %s3132_s25 = smov 9   ;;  %vm897_vm4 = vcmask 72704   ;;  %vm914_vm5 = vcmask 97280   ;;  %vm931_vm6 = vcmask 121856   ;;  %vm948_vm7 = vcmask 146432  }
  0x12   : > { %s357_s12 = scalar_select %p356_p5, %s3112_s27, 4  ;;  %vm965_vm8 = vcmask 171008   ;;  %vm982_vm9 = vcmask 195584   ;;  %vm2089_vm10 = vcmask 220160  }
  0x13   : > { %s5289_s15 = smov 15   ;;  %s3135_s17 = smov 18  }
  0x14   : > { %s3221_s13 = smul.u32 72, %s357_s12  ;;  %s3136_s18 = smov 21  }
  0x15   : > { %s376_s22 = smul.u32 %s3112_s27, %s3116_s28  ;;  %p2306_p7 = scmp.eq.s32.totalorder %s3116_s28, 0 }
  0x16   : > { %s3227_s16 = scalar_lea.vmem %s5262_s1, %s3221_s13  ;;  %s3239_s19 = scalar_lea.vmem %s5261_s0, %s3221_s13 }
  0x17   : > { %v3230_v0 = vld [vmem:[%s3227_s16 + $0x10] sm:$0xf]  ;;  %v3233_v1 = vld [vmem:[%s3227_s16] sm:$0xf]  ;;  %v3248_v4 = vld [vmem:[%s3227_s16 + $0x18] sm:$0xf]  ;;  %s3368_s24 = scalar_lea.vmem %s5263_s2, %s3221_s13  ;;  %s3418_s14 = scalar_lea.vmem %s5264_s3, %s3221_s13 }
  0x18   : > { %v3243_v2 = vcombine.low %v3230_v0, %v3230_v0  ;;  %v2771_v3 = vcombine.low %v3233_v1, %v3233_v1  ;;  %v3251_v5 = vld [vmem:[%s3227_s16 + $0x8] sm:$0xf]  ;;  %v3257_v7 = vld [vmem:[%s3227_s16 + $0x20] sm:$0xf]  ;;  %v3264_v8 = vcombine.low %v3248_v4, %v3248_v4  ;;  %v387_v11 = vld [vmem:[%s3239_s19 + $0xc] sm:$0x1] }
  0x19   : > { %v3254_v6 = vld [vmem:[%s3227_s16 + $0x28] sm:$0xf]  ;;  %v3268_v9 = vcombine.low %v3251_v5, %v3251_v5  ;;  %v3276_v13 = vld [vmem:[%s3239_s19] sm:$0xf]  ;;  %v385_v14 = vld [vmem:[%s3239_s19 + $0x4] sm:$0x1]  ;;  %v3302_v24 = vcombine.low %v3257_v7, %v3257_v7 }
  0x1a   : > { %5364 = vst [vmem:[#allocation3_spill] sm:$0xff] %v3243_v2  ;;  %484 = vrot.lane.b32.xlu1 %v3243_v2, %s3130_s20  ;;  %480 = vrot.lane.b32.xlu0 %v2771_v3, %s3130_s20  ;;  %5365 = vst [vmem:[#allocation4_spill] sm:$0xff] %v3264_v8  ;;  %v3271_v10 = vld [vmem:[%s3239_s19 + $0x8] sm:$0xf]  ;;  %v3280_v15 = vld [vmem:[%s3239_s19 + $0x18] sm:$0xf]  ;;  %v2779_v16 = vcombine.low %v3276_v13, %v385_v14  ;;  %v3298_v23 = vcombine.low %v3254_v6, %v3254_v6 }
  0x1b   : > { %5366 = vst [vmem:[#allocation5_spill] sm:$0xff] %v3268_v9  ;;  %v2780_v12 = vcombine.low %v3271_v10, %v387_v11  ;;  %5367 = vst [vmem:[#allocation6_spill] sm:$0xff] %v3276_v13  ;;  %v391_v17 = vld [vmem:[%s3239_s19 + $0x1c] sm:$0x1]  ;;  %v3285_v18 = vld [vmem:[%s3239_s19 + $0x10] sm:$0xf] }
  0x1c   : > { %v389_v19 = vld [vmem:[%s3239_s19 + $0x14] sm:$0x1]  ;;  %v3289_v20 = vld [vmem:[%s3227_s16 + $0x38] sm:$0xf]  ;;  %v2782_v22 = vcombine.low %v3280_v15, %v391_v17  ;;  %5368 = vst [vmem:[#allocation7_spill] sm:$0xff] %v3298_v23  ;;  %5369 = vst [vmem:[#allocation8_spill] sm:$0xff] %v3302_v24 }
  0x1d   : > { %v546_v21 = vshll.u32 %v2780_v12, 16  ;;  %v539_v25 = vshll.u32 %v2779_v16, 16  ;;  %v2781_v26 = vcombine.low %v3285_v18, %v389_v19  ;;  %v3306_v27 = vld [vmem:[%s3239_s19 + $0x28] sm:$0xf]  ;;  %v395_v28 = vld [vmem:[%s3239_s19 + $0x2c] sm:$0x1]  ;;  %v3318_v32 = vcombine.low %v3289_v20, %v3289_v20 }
  0x1e   : > { %486 = vrot.lane.b32.xlu1 %v3264_v8, %s3130_s20  ;;  %482 = vrot.lane.b32.xlu0 %v3268_v9, %s3130_s20  ;;  %v3310_v29 = vld [vmem:[%s3227_s16 + $0x30] sm:$0xf]  ;;  %v3313_v30 = vld [vmem:[%s3239_s19 + $0x20] sm:$0xf]  ;;  %v544_v33 = vshrl.u32 %v2780_v12, 16  ;;  %v537_v35 = vshrl.u32 %v2779_v16, 16  ;;  %v2784_v37 = vcombine.low %v3306_v27, %v395_v28 }
  0x1f   : > { %v393_v31 = vld [vmem:[%s3239_s19 + $0x24] sm:$0x1]  ;;  %5370 = vst [vmem:[#allocation9_spill] sm:$0xff] %v3318_v32  ;;  %v548_v34 = vrot.slane %v546_v21, 1  ;;  %v560_v36 = vshll.u32 %v2782_v22, 16  ;;  %v3327_v38 = vcombine.low %v3310_v29, %v3310_v29  ;;  %v541_v39 = vrot.slane %v539_v25, 1 }
  0x20   : > { %v553_v40 = vshll.u32 %v2781_v26, 16  ;;  %v2783_v41 = vcombine.low %v3313_v30, %v393_v31  ;;  %v3331_v42 = vld [vmem:[%s3239_s19 + $0x38] sm:$0xf]  ;;  %v399_v43 = vld [vmem:[%s3239_s19 + $0x3c] sm:$0x1]  ;;  %v558_v46 = vshrl.u32 %v2782_v22, 16 }
  0x21   : > { %5371 = vst [vmem:[#allocation10_spill] sm:$0xff] %v3327_v38  ;;  %v3335_v44 = vld [vmem:[%s3239_s19 + $0x30] sm:$0xf]  ;;  %v397_v45 = vld [vmem:[%s3239_s19 + $0x34] sm:$0x1]  ;;  %v551_v47 = vshrl.u32 %v2781_v26, 16  ;;  %v3338_v48 = vor.u32 %v548_v34, %v544_v33  ;;  %v2786_v51 = vcombine.low %v3331_v42, %v399_v43  ;;  %v3345_v52 = vor.u32 %v541_v39, %v537_v35 }
  0x22   : > { %490 = vrot.lane.b32.xlu1 %v3298_v23, %s3130_s20  ;;  %488 = vrot.lane.b32.xlu0 %v3302_v24, %s3130_s20  ;;  %v562_v49 = vrot.slane %v560_v36, 1  ;;  %v574_v50 = vshll.u32 %v2784_v37, 16  ;;  %v555_v53 = vrot.slane %v553_v40, 1  ;;  %v567_v54 = vshll.u32 %v2783_v41, 16  ;;  %v422_v22 = vld [vmem:[%s3368_s24 + $0x8] sm:$0xf] }
  0x23   : > { %5372 = vst [vmem:[#allocation11_spill] sm:$0xff] %v3338_v48  ;;  %v2785_v55 = vcombine.low %v3335_v44, %v397_v45  ;;  %v572_v57 = vshrl.u32 %v2784_v37, 16  ;;  %v565_v59 = vshrl.u32 %v2783_v41, 16  ;;  %v588_v62 = vshll.u32 %v2786_v51, 16  ;;  %v420_v25 = vld [vmem:[%s3368_s24] sm:$0xf] }
  0x24   : > { %v3348_v56 = vor.u32 %v562_v49, %v558_v46  ;;  %v576_v58 = vrot.slane %v574_v50, 1  ;;  %v3354_v60 = vor.u32 %v555_v53, %v551_v47  ;;  %v569_v61 = vrot.slane %v567_v54, 1  ;;  %v419_v26 = vld [vmem:[%s3227_s16 + $0x44] sm:$0x1]  ;;  %v3382_v28 = vld [vmem:[%s3227_s16 + $0x40] sm:$0xf] }
  0x25   : > { %v581_v63 = vshll.u32 %v2785_v55, 16  ;;  %v586_v11 = vshrl.u32 %v2786_v51, 16  ;;  %v590_v14 = vrot.slane %v588_v62, 1  ;;  %v579_v16 = vshrl.u32 %v2785_v55, 16  ;;  %v426_v35 = vld [vmem:[%s3368_s24 + $0x18] sm:$0xf] }
  0x26   : > { %494 = vrot.lane.b32.xlu1 %v3318_v32, %s3130_s20  ;;  %492 = vrot.lane.b32.xlu0 %v3327_v38, %s3130_s20  ;;  %5373 = vst [vmem:[#allocation12_spill] sm:$0xff] %v3348_v56  ;;  %5374 = vst [vmem:[#allocation13_spill] sm:$0xff] %v3354_v60  ;;  %v3356_v3 = vor.u32 %v576_v58, %v572_v57  ;;  %v3362_v12 = vor.u32 %v569_v61, %v565_v59  ;;  %v424_v36 = vld [vmem:[%s3368_s24 + $0x10] sm:$0xf]  ;;  %v430_v40 = vld [vmem:[%s3368_s24 + $0x28] sm:$0xf] }
  0x27   : > { %v583_v17 = vrot.slane %v581_v63, 1  ;;  %v3374_v19 = vor.u32 %v590_v14, %v586_v11  ;;  %v3388_v31 = vcombine.low %v422_v22, %v422_v22  ;;  %v2787_v33 = vcombine.low %v420_v25, %v420_v25  ;;  %v428_v41 = vld [vmem:[%s3368_s24 + $0x20] sm:$0xf]  ;;  %v434_v46 = vld [vmem:[%s3368_s24 + $0x38] sm:$0xf]  ;;  %s3133_s13 = smov 12  }
  0x28   : > { %5375 = vst [vmem:[#allocation14_spill] sm:$0xff] %v3356_v3  ;;  %5376 = vst [vmem:[#allocation15_spill] sm:$0xff] %v3362_v12  ;;  %v3391_v34 = vcombine.low %v3382_v28, %v419_v26  ;;  %v3398_v37 = vcombine.low %v426_v35, %v426_v35  ;;  %v3400_v39 = vcombine.low %v424_v36, %v424_v36  ;;  %v432_v47 = vld [vmem:[%s3368_s24 + $0x30] sm:$0xf]  ;;  %v3429_v51 = vld [vmem:[%s3418_s14 + $0x8] sm:$0xf] }
  0x29   : > { %5377 = vst [vmem:[#allocation16_spill] sm:$0xff] %v3374_v19  ;;  %v3376_v21 = vor.u32 %v583_v17, %v579_v16  ;;  %5379 = vst [vmem:[#allocation18_spill] sm:$0xff] %v3388_v31  ;;  %v3408_v43 = vcombine.low %v430_v40, %v430_v40  ;;  %v3410_v45 = vcombine.low %v428_v41, %v428_v41  ;;  %v3432_v53 = vld [vmem:[%s3418_s14] sm:$0xf]  ;;  %v423_v54 = vld [vmem:[%s3368_s24 + $0xc] sm:$0x1] }
  0x2a   : > { %594 = vrot.lane.b32.xlu1 %v3338_v48, %s3131_s21  ;;  %592 = vrot.lane.b32.xlu0 %v3345_v52, %s3131_s21  ;;  %5380 = vst [vmem:[#allocation19_spill] sm:$0xff] %v3391_v34  ;;  %5381 = vst [vmem:[#allocation20_spill] sm:$0xff] %v3398_v37  ;;  %v3424_v49 = vcombine.low %v434_v46, %v434_v46  ;;  %v3426_v50 = vcombine.low %v432_v47, %v432_v47  ;;  %v421_v58 = vld [vmem:[%s3368_s24 + $0x4] sm:$0x1]  ;;  %v3449_v59 = vld [vmem:[%s3418_s14 + $0x18] sm:$0xf] }
  0x2b   : > { %5378 = vst [vmem:[#allocation17_spill] sm:$0xff] %v3376_v21  ;;  %5382 = vst [vmem:[#allocation21_spill] sm:$0xff] %v3400_v39  ;;  %v3441_v55 = vcombine.low %v3429_v51, %v3429_v51  ;;  %v3445_v57 = vcombine.low %v3432_v53, %v3432_v53  ;;  %v3452_v61 = vld [vmem:[%s3418_s14 + $0x10] sm:$0xf]  ;;  %v2804_v62 = vcombine.low %v422_v22, %v423_v54  ;;  %v427_v11 = vld [vmem:[%s3368_s24 + $0x1c] sm:$0x1] }
  0x2c   : > { %5383 = vst [vmem:[#allocation22_spill] sm:$0xff] %v3408_v43  ;;  %5384 = vst [vmem:[#allocation23_spill] sm:$0xff] %v3410_v45  ;;  %v2803_v63 = vcombine.low %v420_v25, %v421_v58  ;;  %v425_v14 = vld [vmem:[%s3368_s24 + $0x14] sm:$0x1]  ;;  %v3462_v16 = vcombine.low %v3449_v59, %v3449_v59  ;;  %v3466_v17 = vcombine.low %v3452_v61, %v3452_v61  ;;  %v3469_v22 = vld [vmem:[%s3418_s14 + $0x28] sm:$0xf] }
  0x2d   : > { %5385 = vst [vmem:[#allocation24_spill] sm:$0xff] %v3424_v49  ;;  %5386 = vst [vmem:[#allocation25_spill] sm:$0xff] %v3426_v50  ;;  %v3472_v25 = vld [vmem:[%s3418_s14 + $0x20] sm:$0xf]  ;;  %v722_v26 = vshll.u32 %v2804_v62, 16  ;;  %v2805_v54 = vcombine.low %v424_v36, %v425_v14  ;;  %p377_p6 = scmp.lt.s32.totalorder %s376_s22, 4 }
  0x2e   : > { %598 = vrot.lane.b32.xlu1 %v3348_v56, %s3131_s21  ;;  %596 = vrot.lane.b32.xlu0 %v3354_v60, %s3131_s21  ;;  %5387 = vst [vmem:[#allocation26_spill] sm:$0xff] %v3429_v51  ;;  %5388 = vst [vmem:[#allocation27_spill] sm:$0xff] %v3432_v53  ;;  %v431_v58 = vld [vmem:[%s3368_s24 + $0x2c] sm:$0x1]  ;;  %v429_v34 = vld [vmem:[%s3368_s24 + $0x24] sm:$0x1] }
  0x2f   : > { %5389 = vst [vmem:[#allocation28_spill] sm:$0xff] %v3449_v59  ;;  %5390 = vst [vmem:[#allocation29_spill] sm:$0xff] %v3452_v61  ;;  %v450_v36 = vld [vmem:[%s3418_s14 + $0x30] sm:$0xf]  ;;  %v724_v14 = vrot.slane %v722_v26, 1  ;;  %v727_v26 = vshrl.u32 %v2805_v54, 16 }
  0x30   : > { %5391 = vst [vmem:[#allocation30_spill] sm:$0xff] %v3466_v17  ;;  %5392 = vst [vmem:[#allocation31_spill] sm:$0xff] %v3469_v22  ;;  %v435_v59 = vld [vmem:[%s3368_s24 + $0x3c] sm:$0x1]  ;;  %v433_v53 = vld [vmem:[%s3368_s24 + $0x34] sm:$0x1] }
  0x31   : > { %5393 = vst [vmem:[#allocation32_spill] sm:$0xff] %v3472_v25  ;;  %s5606_s22 = smov (!%p377_p6, %s376_s22), 4  ;;  %p2307_p8 = scmp.eq.s32.totalorder %s3112_s27, 0 }
  0x32   : > { %602 = vrot.lane.b32.xlu1 %v3356_v3, %s3131_s21  ;;  %600 = vrot.lane.b32.xlu0 %v3362_v12, %s3131_s21  ;;  %s2881_s23 = sshll.u32 %s5606_s22, 6  ;;  %s3138_s22 = smov 24  }
  0x33   : > { %s3602_s12 = scalar_lea.vmem %s5269_s8, %s2881_s23  ;;  %p4906_p9 = pnand %p2307_p8, %p2306_p7 }
  0x34   : > { %vm2312_vm11 = vcmask (!%p4906_p9), 254976  }
  0x36   : > { %606 = vrot.lane.b32.xlu1 %v3374_v19, %s3131_s21  ;;  %604 = vrot.lane.b32.xlu0 %v3376_v21, %s3131_s21 }
  0x3a   : > { %634 = vrot.lane.b32.xlu1 %v3388_v31, %s3132_s25  ;;  %632 = vrot.lane.b32.xlu0 %v2787_v33, %s3132_s25  ;;  %v2806_v33 = vcombine.low %v426_v35, %v427_v11  ;;  %v452_v35 = vld [vmem:[%s3418_s14 + $0x38] sm:$0xf]  ;;  %v720_v11 = vshrl.u32 %v2804_v62, 16  ;;  %v2808_v31 = vcombine.low %v430_v40, %v431_v58 }
  0x3b   : > { %v3494_v13 = vcombine.low %v452_v35, %v452_v35 }
  0x3c   : > { %v734_v62 = vshrl.u32 %v2806_v33, 16  ;;  %v3500_v51 = vor.u32 %v724_v14, %v720_v11  ;;  %v3550_v14 = vcombine.low %v3313_v30, %v3313_v30 }
  0x3d   : > { %5396 = vst [vmem:[#allocation35_spill] sm:$0xff] %v3494_v13 }
  0x3e   : > { %638 = vrot.lane.b32.xlu1 %v3398_v37, %s3132_s25  ;;  %636 = vrot.lane.b32.xlu0 %v3400_v39, %s3132_s25  ;;  %v736_v37 = vshll.u32 %v2806_v33, 16  ;;  %v2807_v39 = vcombine.low %v428_v41, %v429_v34  ;;  %v750_v41 = vshll.u32 %v2808_v31, 16 }
  0x40   : > { %v738_v40 = vrot.slane %v736_v37, 1  ;;  %v743_v58 = vshll.u32 %v2807_v39, 16  ;;  %v752_v35 = vrot.slane %v750_v41, 1  ;;  %v741_v37 = vshrl.u32 %v2807_v39, 16 }
  0x42   : > { %642 = vrot.lane.b32.xlu1 %v3408_v43, %s3132_s25  ;;  %640 = vrot.lane.b32.xlu0 %v3410_v45, %s3132_s25  ;;  %v3486_v43 = vcombine.low %v3472_v25, %v3472_v25  ;;  %v729_v45 = vshll.u32 %v2805_v54, 16  ;;  %v3496_v25 = vcombine.low %v450_v36, %v450_v36  ;;  %v748_v54 = vshrl.u32 %v2808_v31, 16 }
  0x44   : > { %5395 = vst [vmem:[#allocation34_spill] sm:$0xff] %v3486_v43  ;;  %5397 = vst [vmem:[#allocation36_spill] sm:$0xff] %v3496_v25  ;;  %v731_v34 = vrot.slane %v729_v45, 1  ;;  %v745_v45 = vrot.slane %v743_v58, 1  ;;  %v3577_v58 = vcombine.low %v3331_v42, %v3331_v42 }
  0x46   : > { %646 = vrot.lane.b32.xlu1 %v3424_v49, %s3132_s25  ;;  %644 = vrot.lane.b32.xlu0 %v3426_v50, %s3132_s25  ;;  %v3482_v49 = vcombine.low %v3469_v22, %v3469_v22  ;;  %v715_v50 = vshll.u32 %v2803_v63, 16  ;;  %v713_v22 = vshrl.u32 %v2803_v63, 16  ;;  %v3510_v33 = vor.u32 %v731_v34, %v727_v26  ;;  %v400_v34 = vld [vmem:[%s3239_s19 + $0x40] sm:$0xf]  ;;  %5401 = vst [vmem:[#allocation40_spill] sm:$0xff] %v3577_v58 }
  0x47   : > { %v3562_v26 = vcombine.low %v3335_v44, %v3335_v44  ;;  %v3573_v41 = vcombine.low %v400_v34, %v400_v34 }
  0x48   : > { %5394 = vst [vmem:[#allocation33_spill] sm:$0xff] %v3482_v49  ;;  %v717_v61 = vrot.slane %v715_v50, 1  ;;  %v3508_v50 = vor.u32 %v738_v40, %v734_v62  ;;  %v3554_v62 = vcombine.low %v3280_v15, %v3280_v15  ;;  %v3566_v40 = vcombine.low %v3306_v27, %v3306_v27 }
  0x49   : > { %5398 = vst [vmem:[#allocation37_spill] sm:$0xff] %v3562_v26  ;;  %5400 = vst [vmem:[#allocation39_spill] sm:$0xff] %v3573_v41 }
  0x4a   : > { %674 = vrot.lane.b32.xlu1 %v3441_v55, %s3133_s13  ;;  %672 = vrot.lane.b32.xlu0 %v3445_v57, %s3133_s13  ;;  %v3506_v63 = vor.u32 %v717_v61, %v713_v22  ;;  %5399 = vst [vmem:[#allocation38_spill] sm:$0xff] %v3566_v40 }
  0x4e   : > { %678 = vrot.lane.b32.xlu1 %v3462_v16, %s3133_s13  ;;  %676 = vrot.lane.b32.xlu0 %v3466_v17, %s3133_s13  ;;  %v2809_v17 = vcombine.low %v432_v47, %v433_v53  ;;  %v3518_v53 = vor.u32 %v745_v45, %v741_v37  ;;  %v3137_v37 = vmov 65535  }
  0x4f   : > { %v2140_v45 = vsel %vm2138_vm0, 4294967295, %v3137_v37 }
  0x50   : > { %v757_v11 = vshll.u32 %v2809_v17, 16  ;;  %v755_v61 = vshrl.u32 %v2809_v17, 16  ;;  %v3542_v17 = vcombine.low %v3271_v10, %v3271_v10 }
  0x52   : > { %682 = vrot.lane.b32.xlu1 %v3482_v49, %s3133_s13  ;;  %680 = vrot.lane.b32.xlu0 %v3486_v43, %s3133_s13  ;;  %v2810_v49 = vcombine.low %v434_v46, %v435_v59  ;;  %v3516_v46 = vor.u32 %v752_v35, %v748_v54  ;;  %v759_v31 = vrot.slane %v757_v11, 1  ;;  %v3056_v54 = vld [vmem:[%s5265_s4] sm:$0xff]   ;;  %v3057_v35 = vld [vmem:[%s5265_s4 + $0x8] sm:$0x3f]  }
  0x53   : > { %2900 = vmatprep.subr.bf16.mxu0 %v3056_v54  ;;  %2936 = vmatprep.subr.bf16.mxu1 %v3056_v54 }
  0x54   : > { %v764_v36 = vshll.u32 %v2810_v49, 16  ;;  %v762_v47 = vshrl.u32 %v2810_v49, 16  ;;  %v3526_v22 = vor.u32 %v759_v31, %v755_v61  ;;  %v3538_v49 = vcombine.low %v3285_v18, %v3285_v18  ;;  %2901 = vmatpush3.bf16.msra.mxu0 %v3056_v54  ;;  %2938 = vmatpush3.bf16.msra.mxu1 %v3056_v54 }
  0x56   : > { %686 = vrot.lane.b32.xlu1 %v3494_v13, %s3133_s13  ;;  %684 = vrot.lane.b32.xlu0 %v3496_v25, %s3133_s13  ;;  %v766_v59 = vrot.slane %v764_v36, 1  ;;  %v2141_v36 = vsel %vm2139_vm1, %v2140_v45, 0 }
  0x57   : > { %v2143_v11 = vand.u32 %v3057_v35, %v2141_v36 }
  0x58   : > { %v3524_v39 = vor.u32 %v766_v59, %v762_v47  ;;  %v3610_v47 = vcombine.low %v3382_v28, %v3382_v28  ;;  %v401_v59 = vld [vmem:[%s3239_s19 + $0x44] sm:$0x1]  ;;  %s5440_s19 = smov 15  }
  0x59   : > { %2902 = vmatprep.subr.bf16.mxu0 %v2143_v11  ;;  %2937 = vmatprep.subr.bf16.mxu1 %v2143_v11  ;;  %v2820_v61 = vcombine.low %v400_v34, %v401_v59 }
  0x5a   : > { %770 = vrot.lane.b32.xlu1 %v3500_v51, %s5289_s15  ;;  %768 = vrot.lane.b32.xlu0 %v3506_v63, %s5289_s15  ;;  %5402 = vst [vmem:[#allocation41_spill] sm:$0xff] %v3610_v47 }
  0x5b   : > { %2903 = vmatpush3.bf16.msra.mxu0 %v2143_v11  ;;  %2939 = vmatpush3.bf16.msra.mxu1 %v2143_v11  ;;  %v835_v31 = vshll.u32 %v2820_v61, 16  ;;  %v833_v34 = vshrl.u32 %v2820_v61, 16  ;;  %v403_v61 = vld [vmem:[%s3227_s16 + $0x4] sm:$0x1] }
  0x5d   : > { %v837_v35 = vrot.slane %v835_v31, 1  ;;  %v405_v31 = vld [vmem:[%s3227_s16 + $0xc] sm:$0x1] }
  0x5e   : > { %774 = vrot.lane.b32.xlu1 %v3508_v50, %s5289_s15  ;;  %772 = vrot.lane.b32.xlu0 %v3510_v33, %s5289_s15 }
  0x5f   : > { %v3637_v36 = vor.u32 %v837_v35, %v833_v34  ;;  %v2822_v35 = vcombine.low %v3251_v5, %v405_v31  ;;  %v411_v31 = vld [vmem:[%s3227_s16 + $0x24] sm:$0x1] }
  0x61   : > { %5403 = vst [vmem:[#allocation42_spill] sm:$0xff] %v3637_v36 }
  0x62   : > { %778 = vrot.lane.b32.xlu1 %v3516_v46, %s5289_s15  ;;  %776 = vrot.lane.b32.xlu0 %v3518_v53, %s5289_s15 }
  0x66   : > { %782 = vrot.lane.b32.xlu1 %v3524_v39, %s5289_s15  ;;  %780 = vrot.lane.b32.xlu0 %v3526_v22, %s5289_s15 }
  0x6a   : > { %796 = vrot.lane.b32.xlu1 %v3538_v49, %s3135_s17  ;;  %794 = vrot.lane.b32.xlu0 %v3542_v17, %s3135_s17 }
  0x6e   : > { %800 = vrot.lane.b32.xlu1 %v3550_v14, %s3135_s17  ;;  %798 = vrot.lane.b32.xlu0 %v3554_v62, %s3135_s17 }
  0x72   : > { %804 = vrot.lane.b32.xlu1 %v3562_v26, %s3135_s17  ;;  %802 = vrot.lane.b32.xlu0 %v3566_v40, %s3135_s17 }
  0x76   : > { %808 = vrot.lane.b32.xlu1 %v3573_v41, %s3135_s17  ;;  %806 = vrot.lane.b32.xlu0 %v3577_v58, %s3135_s17 }
  0x7a   : > { %815 = vrot.lane.b32.xlu1 %v3243_v2, %s3136_s18  ;;  %813 = vrot.lane.b32.xlu0 %v3268_v9, %s3136_s18  ;;  %v415_v9 = vld [vmem:[%s3227_s16 + $0x34] sm:$0x1] }
  0x7e   : > { %819 = vrot.lane.b32.xlu1 %v3302_v24, %s3136_s18  ;;  %817 = vrot.lane.b32.xlu0 %v3264_v8, %s3136_s18  ;;  %v1047_v24 = vshrl.u32 %v2822_v35, 16 }
  0x82   : > { %823 = vrot.lane.b32.xlu1 %v3327_v38, %s3136_s18  ;;  %821 = vrot.lane.b32.xlu0 %v3298_v23, %s3136_s18  ;;  %v407_v23 = vld [vmem:[%s3227_s16 + $0x14] sm:$0x1] }
  0x83   : > { %v2823_v5 = vcombine.low %v3230_v0, %v407_v23  ;;  %v2825_v23 = vcombine.low %v3257_v7, %v411_v31 }
  0x85   : > { %v1056_v0 = vshll.u32 %v2823_v5, 16  ;;  %v1070_v31 = vshll.u32 %v2825_v23, 16 }
  0x86   : > { %827 = vrot.lane.b32.xlu1 %v3610_v47, %s3136_s18  ;;  %825 = vrot.lane.b32.xlu0 %v3318_v32, %s3136_s18  ;;  %v2821_v32 = vcombine.low %v3233_v1, %v403_v61  ;;  %v1049_v61 = vshll.u32 %v2822_v35, 16 }
  0x87   : > { %v1058_v7 = vrot.slane %v1056_v0, 1 }
  0x88   : > { %v1042_v1 = vshll.u32 %v2821_v32, 16 }
  0x8a   : > { %841 = vrot.lane.b32.xlu1 %v3354_v60, %s3138_s22  ;;  %839 = vrot.lane.b32.xlu0 %v3338_v48, %s3138_s22  ;;  %v1044_v8 = vrot.slane %v1042_v1, 1 }
  0x8c   : > { %v3621_v54 = vpop.permute.xlu1 %484  ;;  %v3623_v28 = vpop.permute.xlu0 %480 }
  0x8e   : > { %845 = vrot.lane.b32.xlu1 %v3362_v12, %s3138_s22  ;;  %843 = vrot.lane.b32.xlu0 %v3348_v56, %s3138_s22 }
  0x90   : > { %v3629_v37 = vpop.permute.xlu1 %486  ;;  %v3631_v45 = vpop.permute.xlu0 %482 }
  0x92   : > { %849 = vrot.lane.b32.xlu1 %v3376_v21, %s3138_s22  ;;  %847 = vrot.lane.b32.xlu0 %v3356_v3, %s3138_s22 }
  0x94   : > { %v3639_v11 = vpop.permute.xlu1 %490  ;;  %v3641_v59 = vpop.permute.xlu0 %488 }
  0x96   : > { %853 = vrot.lane.b32.xlu1 %v3637_v36, %s3138_s22  ;;  %851 = vrot.lane.b32.xlu0 %v3374_v19, %s3138_s22  ;;  %v409_v36 = vld [vmem:[%s3227_s16 + $0x1c] sm:$0x1] }
  0x97   : > { %v2824_v41 = vcombine.low %v3248_v4, %v409_v36  ;;  %v1051_v4 = vrot.slane %v1049_v61, 1 }
  0x98   : > { %v3650_v47 = vpop.permute.xlu1 %494  ;;  %v3652_v34 = vpop.permute.xlu0 %492 }
  0x99   : > { %v1063_v36 = vshll.u32 %v2824_v41, 16  ;;  %v1061_v1 = vshrl.u32 %v2824_v41, 16  ;;  %v3689_v61 = vor.u32 %v1051_v4, %v1047_v24 }
  0x9a   : > { %1001 = vrot.lane.b32.xlu1 %v3338_v48, %s3130_s20  ;;  %999 = vrot.lane.b32.xlu0 %v3345_v52, %s3130_s20  ;;  %v413_v52 = vld [vmem:[%s3227_s16 + $0x2c] sm:$0x1]  ;;  %v1040_v48 = vshrl.u32 %v2821_v32, 16 }
  0x9b   : > { %5407 = vst [vmem:[#allocation46_spill] sm:$0xff] %v3689_v61 }
  0x9c   : > { %v3661_v38 = vpop.permute.xlu1 %594  ;;  %v3663_v58 = vpop.permute.xlu0 %592  ;;  %v1045_v35 = vor.u32 %v1044_v8, %v1040_v48 }
  0x9e   : > { %1005 = vrot.lane.b32.xlu1 %v3348_v56, %s3130_s20  ;;  %1003 = vrot.lane.b32.xlu0 %v3354_v60, %s3130_s20  ;;  %v2826_v56 = vcombine.low %v3254_v6, %v413_v52  ;;  %v417_v60 = vld [vmem:[%s3227_s16 + $0x3c] sm:$0x1]  ;;  %v1065_v6 = vrot.slane %v1063_v36, 1  ;;  %v1054_v52 = vshrl.u32 %v2823_v5, 16  ;;  %v1068_v5 = vshrl.u32 %v2825_v23, 16 }
  0x9f   : > { %v1072_v36 = vrot.slane %v1070_v31, 1 }
  0xa0   : > { %v3673_v40 = vpop.permute.xlu1 %598  ;;  %v3675_v26 = vpop.permute.xlu0 %596  ;;  %v3701_v24 = vor.u32 %v1065_v6, %v1061_v1  ;;  %v1075_v48 = vshrl.u32 %v2826_v56, 16  ;;  %v3706_v4 = vor.u32 %v1058_v7, %v1054_v52 }
  0xa1   : > { %5404 = vst [vmem:[#allocation43_spill] sm:$0xff] %v3675_v26  ;;  %v1077_v26 = vshll.u32 %v2826_v56, 16  ;;  %v3718_v56 = vor.u32 %v1072_v36, %v1068_v5 }
  0xa2   : > { %1009 = vrot.lane.b32.xlu1 %v3356_v3, %s3130_s20  ;;  %1007 = vrot.lane.b32.xlu0 %v3362_v12, %s3130_s20  ;;  %v2828_v3 = vcombine.low %v3289_v20, %v417_v60  ;;  %v2827_v12 = vcombine.low %v3310_v29, %v415_v9  ;;  %5410 = vst [vmem:[#allocation49_spill] sm:$0xff] %v3701_v24  ;;  %5411 = vst [vmem:[#allocation50_spill] sm:$0xff] %v3706_v4 }
  0xa3   : > { %v1079_v41 = vrot.slane %v1077_v26, 1  ;;  %5413 = vst [vmem:[#allocation52_spill] sm:$0xff] %v3718_v56 }
  0xa4   : > { %v3685_v2 = vpop.permute.xlu1 %602  ;;  %v3687_v32 = vpop.permute.xlu0 %600  ;;  %v1091_v20 = vshll.u32 %v2828_v3, 16  ;;  %v1084_v60 = vshll.u32 %v2827_v12, 16  ;;  %v1089_v1 = vshrl.u32 %v2828_v3, 16  ;;  %v1082_v23 = vshrl.u32 %v2827_v12, 16 }
  0xa5   : > { %5405 = vst [vmem:[#allocation44_spill] sm:$0xff] %v3685_v2  ;;  %5406 = vst [vmem:[#allocation45_spill] sm:$0xff] %v3687_v32  ;;  %v3712_v0 = vor.u32 %v1079_v41, %v1075_v48 }
  0xa6   : > { %1013 = vrot.lane.b32.xlu1 %v3374_v19, %s3130_s20  ;;  %1011 = vrot.lane.b32.xlu0 %v3376_v21, %s3130_s20  ;;  %v1093_v26 = vrot.slane %v1091_v20, 1  ;;  %v5420_v20 = vld [vmem:[#allocation30_spill] sm:$0xff]  ;;  %v445_v21 = vld [vmem:[%s3418_s14 + $0x1c] sm:$0x1] }
  0xa7   : > { %5412 = vst [vmem:[#allocation51_spill] sm:$0xff] %v3712_v0 }
  0xa8   : > { %v3697_v32 = vpop.permute.xlu1 %606  ;;  %v3699_v8 = vpop.permute.xlu0 %604  ;;  %v3728_v3 = vor.u32 %v1093_v26, %v1089_v1  ;;  %v5423_v26 = vld [vmem:[#allocation33_spill] sm:$0xff] }
  0xa9   : > { %5408 = vst [vmem:[#allocation47_spill] sm:$0xff] %v3697_v32  ;;  %5409 = vst [vmem:[#allocation48_spill] sm:$0xff] %v3699_v8 }
  0xaa   : > { %1097 = vrot.lane.b32.xlu1 %v3689_v61, %s3131_s21  ;;  %1095 = vrot.lane.b32.xlu0 %v1045_v35, %s3131_s21  ;;  %v1086_v35 = vrot.slane %v1084_v60, 1  ;;  %5414 = vst [vmem:[#allocation53_spill] sm:$0xff] %v3728_v3 }
  0xac   : > { %v3708_v9 = vpop.permute.xlu1 %634  ;;  %v3710_v29 = vpop.permute.xlu0 %632  ;;  %v3730_v7 = vor.u32 %v1086_v35, %v1082_v23 }
  0xae   : > { %1101 = vrot.lane.b32.xlu1 %v3701_v24, %s3131_s21  ;;  %1099 = vrot.lane.b32.xlu0 %v3706_v4, %s3131_s21  ;;  %5415 = vst [vmem:[#allocation54_spill] sm:$0xff] %v3730_v7  ;;  %v5429_v4 = vld [vmem:[#allocation27_spill] sm:$0xff] }
  0xb0   : > { %v3720_v6 = vpop.permute.xlu1 %638  ;;  %v3722_v52 = vpop.permute.xlu0 %636 }
  0xb2   : > { %1105 = vrot.lane.b32.xlu1 %v3712_v0, %s3131_s21  ;;  %1103 = vrot.lane.b32.xlu0 %v3718_v56, %s3131_s21  ;;  %v439_v0 = vld [vmem:[%s3418_s14 + $0x4] sm:$0x1]  ;;  %v5428_v56 = vld [vmem:[#allocation26_spill] sm:$0xff] }
  0xb3   : > { %v2829_v19 = vcombine.low %v5429_v4, %v439_v0  ;;  %v447_v4 = vld [vmem:[%s3418_s14 + $0x24] sm:$0x1] }
  0xb4   : > { %v3732_v31 = vpop.permute.xlu1 %642  ;;  %v3734_v48 = vpop.permute.xlu0 %640 }
  0xb5   : > { %5416 = vst [vmem:[#allocation55_spill] sm:$0xff] %v3732_v31  ;;  %5417 = vst [vmem:[#allocation56_spill] sm:$0xff] %v3734_v48  ;;  %v5435_v31 = vld [vmem:[#allocation32_spill] sm:$0xff] }
  0xb6   : > { %1109 = vrot.lane.b32.xlu1 %v3728_v3, %s3131_s21  ;;  %1107 = vrot.lane.b32.xlu0 %v3730_v7, %s3131_s21  ;;  %v441_v3 = vld [vmem:[%s3418_s14 + $0xc] sm:$0x1]  ;;  %v2833_v2 = vcombine.low %v5435_v31, %v447_v4 }
  0xb7   : > { %v2830_v61 = vcombine.low %v5428_v56, %v441_v3  ;;  %v1170_v56 = vshll.u32 %v2829_v19, 16  ;;  %v449_v3 = vld [vmem:[%s3418_s14 + $0x2c] sm:$0x1] }
  0xb8   : > { %v3740_v12 = vpop.permute.xlu1 %646  ;;  %v3742_v41 = vpop.permute.xlu0 %644  ;;  %v1198_v31 = vshll.u32 %v2833_v2, 16 }
  0xb9   : > { %5418 = vst [vmem:[#allocation57_spill] sm:$0xff] %v3740_v12  ;;  %5419 = vst [vmem:[#allocation58_spill] sm:$0xff] %v3742_v41  ;;  %v5431_v41 = vld [vmem:[#allocation29_spill] sm:$0xff]  ;;  %v1175_v32 = vshrl.u32 %v2830_v61, 16 }
  0xba   : > { %1113 = vrot.lane.b32.xlu1 %v3441_v55, %s3132_s25  ;;  %1111 = vrot.lane.b32.xlu0 %v3445_v57, %s3132_s25 }
  0xbc   : > { %v3748_v5 = vpop.permute.xlu1 %674  ;;  %v3750_v36 = vpop.permute.xlu0 %672 }
  0xbe   : > { %1117 = vrot.lane.b32.xlu1 %v3462_v16, %s3132_s25  ;;  %1115 = vrot.lane.b32.xlu0 %v5420_v20, %s3132_s25 }
  0xc0   : > { %v3756_v60 = vpop.permute.xlu1 %678  ;;  %v3758_v1 = vpop.permute.xlu0 %676 }
  0xc1   : > { %5421 = vst [vmem:[#allocation30_spill] sm:$0xff] %v3756_v60  ;;  %5422 = vst [vmem:[#allocation59_spill] sm:$0xff] %v3758_v1 }
  0xc2   : > { %1121 = vrot.lane.b32.xlu1 %v5423_v26, %s3132_s25  ;;  %1119 = vrot.lane.b32.xlu0 %v3486_v43, %s3132_s25  ;;  %v1177_v43 = vshll.u32 %v2830_v61, 16 }
  0xc4   : > { %v3764_v23 = vpop.permute.xlu1 %682  ;;  %v3766_v35 = vpop.permute.xlu0 %680 }
  0xc5   : > { %5424 = vst [vmem:[#allocation60_spill] sm:$0xff] %v3764_v23  ;;  %5425 = vst [vmem:[#allocation61_spill] sm:$0xff] %v3766_v35  ;;  %v1179_v35 = vrot.slane %v1177_v43, 1 }
  0xc6   : > { %1125 = vrot.lane.b32.xlu1 %v3494_v13, %s3132_s25  ;;  %1123 = vrot.lane.b32.xlu0 %v3496_v25, %s3132_s25  ;;  %v443_v25 = vld [vmem:[%s3418_s14 + $0x14] sm:$0x1] }
  0xc7   : > { %v2831_v12 = vcombine.low %v5431_v41, %v443_v25  ;;  %v1172_v25 = vrot.slane %v1170_v56, 1 }
  0xc8   : > { %v3774_v7 = vpop.permute.xlu1 %686  ;;  %v3776_v24 = vpop.permute.xlu0 %684 }
  0xc9   : > { %5426 = vst [vmem:[#allocation62_spill] sm:$0xff] %v3774_v7  ;;  %5427 = vst [vmem:[#allocation63_spill] sm:$0xff] %v3776_v24  ;;  %v5430_v7 = vld [vmem:[#allocation28_spill] sm:$0xff]  ;;  %v1184_v48 = vshll.u32 %v2831_v12, 16 }
  0xca   : > { %1129 = vrot.lane.b32.xlu1 %v3500_v51, %s3133_s13  ;;  %1127 = vrot.lane.b32.xlu0 %v3506_v63, %s3133_s13  ;;  %v2832_v24 = vcombine.low %v5430_v7, %v445_v21  ;;  %v1168_v21 = vshrl.u32 %v2829_v19, 16  ;;  %v5434_v7 = vld [vmem:[#allocation31_spill] sm:$0xff]  ;;  %v3816_v19 = vor.u32 %v1179_v35, %v1175_v32  ;;  %v1200_v35 = vrot.slane %v1198_v31, 1 }
  0xcb   : > { %v2834_v41 = vcombine.low %v5434_v7, %v449_v3  ;;  %v1186_v60 = vrot.slane %v1184_v48, 1 }
  0xcc   : > { %v3786_v13 = vpop.permute.xlu1 %770  ;;  %v3788_v26 = vpop.permute.xlu0 %768  ;;  %v1191_v23 = vshll.u32 %v2832_v24, 16  ;;  %v1189_v61 = vshrl.u32 %v2832_v24, 16  ;;  %5436 = vst [vmem:[#allocation28_spill] sm:$0xff] %v3816_v19  ;;  %v3818_v56 = vor.u32 %v1172_v25, %v1168_v21 }
  0xcd   : > { %v1205_v3 = vshll.u32 %v2834_v41, 16  ;;  %v1203_v32 = vshrl.u32 %v2834_v41, 16 }
  0xce   : > { %1133 = vrot.lane.b32.xlu1 %v3508_v50, %s3133_s13  ;;  %1131 = vrot.lane.b32.xlu0 %v3510_v33, %s3133_s13  ;;  %v1193_v43 = vrot.slane %v1191_v23, 1  ;;  %5437 = vst [vmem:[#allocation29_spill] sm:$0xff] %v3818_v56  ;;  %v1196_v23 = vshrl.u32 %v2833_v2, 16 }
  0xcf   : > { %v1207_v48 = vrot.slane %v1205_v3, 1 }
  0xd0   : > { %v3798_v0 = vpop.permute.xlu1 %774  ;;  %v3800_v8 = vpop.permute.xlu0 %772  ;;  %v3824_v24 = vor.u32 %v1193_v43, %v1189_v61 }
  0xd1   : > { %5432 = vst [vmem:[#allocation26_spill] sm:$0xff] %v3798_v0  ;;  %5433 = vst [vmem:[#allocation27_spill] sm:$0xff] %v3800_v8  ;;  %v1182_v8 = vshrl.u32 %v2831_v12, 16 }
  0xd2   : > { %1137 = vrot.lane.b32.xlu1 %v3516_v46, %s3133_s13  ;;  %1135 = vrot.lane.b32.xlu0 %v3518_v53, %s3133_s13  ;;  %5438 = vst [vmem:[#allocation31_spill] sm:$0xff] %v3824_v24 }
  0xd3   : > { %v3826_v12 = vor.u32 %v1186_v60, %v1182_v8  ;;  %v3836_v8 = vor.u32 %v1207_v48, %v1203_v32  ;;  %v3838_v60 = vor.u32 %v1200_v35, %v1196_v23 }
  0xd4   : > { %v3808_v1 = vpop.permute.xlu1 %778  ;;  %v3810_v0 = vpop.permute.xlu0 %776 }
  0xd5   : > { %5439 = vst [vmem:[#allocation32_spill] sm:$0xff] %v3826_v12  ;;  %5441 = vst [vmem:[#allocation64_spill] sm:$0xff] %v3836_v8 }
  0xd6   : > { %1141 = vrot.lane.b32.xlu1 %v3524_v39, %s3133_s13  ;;  %1139 = vrot.lane.b32.xlu0 %v3526_v22, %s3133_s13  ;;  %5442 = vst [vmem:[#allocation65_spill] sm:$0xff] %v3838_v60 }
  0xd8   : > { %v3820_v4 = vpop.permute.xlu1 %782  ;;  %v3822_v7 = vpop.permute.xlu0 %780 }
  0xda   : > { %1225 = vrot.lane.b32.xlu1 %v3816_v19, %s5440_s19  ;;  %1223 = vrot.lane.b32.xlu0 %v3818_v56, %s5440_s19  ;;  %v864_v56 = vsel %vm855_vm2, %v3285_v18, %v3621_v54 }
  0xdc   : > { %v797_v21 = vpop.permute.xlu1 %796  ;;  %v795_v25 = vpop.permute.xlu0 %794 }
  0xde   : > { %1229 = vrot.lane.b32.xlu1 %v3824_v24, %s5440_s19  ;;  %1227 = vrot.lane.b32.xlu0 %v3826_v12, %s5440_s19  ;;  %v861_v24 = vsel %vm855_vm2, %v3271_v10, %v3631_v45  ;;  %v867_v10 = vsel %vm855_vm2, %v3280_v15, %v3629_v37  ;;  %v879_v15 = vsel %vm855_vm2, %v3331_v42, %v3650_v47  ;;  %v5444_v47 = vld [vmem:[#allocation43_spill] sm:$0xff] }
  0xdf   : > { %v884_v19 = vsel %vm880_vm3, %v861_v24, %v3661_v38  ;;  %v876_v45 = vsel %vm855_vm2, %v3335_v44, %v3652_v34  ;;  %v888_v42 = vsel %vm880_vm3, %v867_v10, %v3673_v40  ;;  %v5445_v40 = vld [vmem:[#allocation30_spill] sm:$0xff]  ;;  %v5452_v10 = vld [vmem:[#allocation45_spill] sm:$0xff] }
  0xe0   : > { %v3840_v61 = vpop.permute.xlu1 %800  ;;  %v3842_v43 = vpop.permute.xlu0 %798  ;;  %v905_v34 = vsel %vm897_vm4, %v888_v42, %v3720_v6  ;;  %v5447_v6 = vld [vmem:[#allocation26_spill] sm:$0xff] }
  0xe2   : > { %1233 = vrot.lane.b32.xlu1 %v3836_v8, %s5440_s19  ;;  %1231 = vrot.lane.b32.xlu0 %v3838_v60, %s5440_s19  ;;  %v5443_v60 = vld [vmem:[#allocation6_spill] sm:$0xff] }
  0xe3   : > { %v858_v12 = vsel %vm855_vm2, %v5443_v60, %v3623_v28  ;;  %v5450_v60 = vld [vmem:[#allocation5_spill] sm:$0xff] }
  0xe4   : > { %v3848_v2 = vpop.permute.xlu1 %804  ;;  %v3850_v41 = vpop.permute.xlu0 %802  ;;  %v882_v28 = vsel %vm880_vm3, %v858_v12, %v3663_v58  ;;  %v870_v58 = vsel %vm855_vm2, %v3313_v30, %v3641_v59  ;;  %v886_v59 = vsel %vm880_vm3, %v864_v56, %v5444_v47 }
  0xe5   : > { %v899_v18 = vsel %vm897_vm4, %v882_v28, %v3710_v29 }
  0xe6   : > { %1435 = vrot.lane.b32.xlu1 %v3441_v55, %s3130_s20  ;;  %1433 = vrot.lane.b32.xlu0 %v3445_v57, %s3130_s20  ;;  %v916_v37 = vsel %vm914_vm5, %v899_v18, %v3750_v36  ;;  %v922_v36 = vsel %vm914_vm5, %v905_v34, %v5445_v40 }
  0xe7   : > { %v933_v30 = vsel %vm931_vm6, %v916_v37, %v3788_v26  ;;  %v5446_v26 = vld [vmem:[#allocation59_spill] sm:$0xff]  ;;  %v939_v12 = vsel %vm931_vm6, %v922_v36, %v5447_v6  ;;  %v5460_v36 = vld [vmem:[#allocation48_spill] sm:$0xff] }
  0xe8   : > { %v3856_v3 = vpop.permute.xlu1 %808  ;;  %v3858_v31 = vpop.permute.xlu0 %806  ;;  %v956_v18 = vsel %vm948_vm7, %v939_v12, %v3840_v61  ;;  %v5453_v37 = vld [vmem:[#allocation55_spill] sm:$0xff]  ;;  %v5455_v61 = vld [vmem:[#allocation60_spill] sm:$0xff] }
  0xea   : > { %1439 = vrot.lane.b32.xlu1 %v3462_v16, %s3130_s20  ;;  %1437 = vrot.lane.b32.xlu0 %v5420_v20, %s3130_s20 }
  0xec   : > { %v816_v32 = vpop.permute.xlu1 %815  ;;  %v814_v48 = vpop.permute.xlu0 %813 }
  0xee   : > { %1451 = vrot.lane.b32.xlu1 %v3500_v51, %s3131_s21  ;;  %1449 = vrot.lane.b32.xlu0 %v3506_v63, %s3131_s21 }
  0xf0   : > { %v3868_v23 = vpop.permute.xlu1 %819  ;;  %v3870_v57 = vpop.permute.xlu0 %817 }
  0xf1   : > { %v973_v47 = vsel %vm965_vm8, %v956_v18, %v3868_v23  ;;  %v5466_v18 = vld [vmem:[#allocation11_spill] sm:$0xff] }
  0xf2   : > { %1455 = vrot.lane.b32.xlu1 %v3508_v50, %s3131_s21  ;;  %1453 = vrot.lane.b32.xlu0 %v3510_v33, %s3131_s21 }
  0xf4   : > { %v3876_v35 = vpop.permute.xlu1 %823  ;;  %v3878_v8 = vpop.permute.xlu0 %821 }
  0xf6   : > { %1467 = vrot.lane.b32.xlu1 %v3538_v49, %s3132_s25  ;;  %1465 = vrot.lane.b32.xlu0 %v3542_v17, %s3132_s25  ;;  %v873_v49 = vsel %vm855_vm2, %v3306_v27, %v3639_v11  ;;  %v901_v17 = vsel %vm897_vm4, %v884_v19, %v3708_v9 }
  0xf7   : > { %v918_v27 = vsel %vm914_vm5, %v901_v17, %v3748_v5  ;;  %v890_v17 = vsel %vm880_vm3, %v870_v58, %v5452_v10 }
  0xf8   : > { %v3907_v54 = vpop.permute.xlu1 %827  ;;  %v3909_v38 = vpop.permute.xlu0 %825  ;;  %v935_v11 = vsel %vm931_vm6, %v918_v27, %v3786_v13  ;;  %v950_v13 = vsel %vm948_vm7, %v933_v30, %v795_v25  ;;  %v5449_v25 = vld [vmem:[#allocation3_spill] sm:$0xff]  ;;  %v5454_v30 = vld [vmem:[#allocation56_spill] sm:$0xff] }
  0xf9   : > { %v952_v44 = vsel %vm948_vm7, %v935_v11, %v797_v21  ;;  %v907_v42 = vsel %vm897_vm4, %v890_v17, %v5454_v30  ;;  %v5465_v17 = vld [vmem:[#allocation13_spill] sm:$0xff] }
  0xfa   : > { %1471 = vrot.lane.b32.xlu1 %v3550_v14, %s3132_s25  ;;  %1469 = vrot.lane.b32.xlu0 %v3554_v62, %s3132_s25  ;;  %v903_v14 = vsel %vm897_vm4, %v886_v59, %v3722_v52  ;;  %v969_v9 = vsel %vm965_vm8, %v952_v44, %v816_v32  ;;  %v967_v62 = vsel %vm965_vm8, %v950_v13, %v814_v48  ;;  %v5448_v52 = vld [vmem:[#allocation27_spill] sm:$0xff]  ;;  %v5451_v48 = vld [vmem:[#allocation44_spill] sm:$0xff] }
  0xfb   : > { %v920_v19 = vsel %vm914_vm5, %v903_v14, %v5446_v26  ;;  %v892_v28 = vsel %vm880_vm3, %v873_v49, %v5451_v48  ;;  %v894_v26 = vsel %vm880_vm3, %v876_v45, %v5460_v36 }
  0xfc   : > { %v842_v29 = vpop.permute.xlu1 %841  ;;  %v840_v5 = vpop.permute.xlu0 %839  ;;  %v937_v21 = vsel %vm931_vm6, %v920_v19, %v5448_v52  ;;  %v909_v11 = vsel %vm897_vm4, %v892_v28, %v5453_v37 }
  0xfd   : > { %v986_v56 = vsel %vm982_vm9, %v969_v9, %v842_v29  ;;  %v984_v24 = vsel %vm982_vm9, %v967_v62, %v840_v5  ;;  %v954_v27 = vsel %vm948_vm7, %v937_v21, %v3842_v43  ;;  %v926_v44 = vsel %vm914_vm5, %v909_v11, %v5455_v61  ;;  %v5456_v43 = vld [vmem:[#allocation61_spill] sm:$0xff]  ;;  %v5457_v62 = vld [vmem:[#allocation8_spill] sm:$0xff]  ;;  %v5459_v5 = vld [vmem:[#allocation47_spill] sm:$0xff] }
  0xfe   : > { %1483 = vrot.lane.b32.xlu1 %v5449_v25, %s3133_s13  ;;  %1481 = vrot.lane.b32.xlu0 %v5450_v60, %s3133_s13  ;;  %v2842_v32 = vcombine.low %v984_v24, %v986_v56  ;;  %v971_v49 = vsel %vm965_vm8, %v954_v27, %v3870_v57  ;;  %v924_v13 = vsel %vm914_vm5, %v907_v42, %v5456_v43  ;;  %v5458_v29 = vld [vmem:[#allocation4_spill] sm:$0xff]  ;;  %v5462_v24 = vld [vmem:[#allocation58_spill] sm:$0xff]  ;;  %v5475_v43 = vld [vmem:[#allocation23_spill] sm:$0xff] }
  0xff   : > { %v943_v23 = vsel %vm931_vm6, %v926_v44, %v3808_v1  ;;  %v941_v57 = vsel %vm931_vm6, %v924_v13, %v3810_v0  ;;  %v896_v40 = vsel %vm880_vm3, %v879_v15, %v5459_v5  ;;  %v5461_v0 = vld [vmem:[#allocation57_spill] sm:$0xff]  ;;  %v911_v6 = vsel %vm897_vm4, %v894_v26, %v5462_v24  ;;  %v5476_v13 = vld [vmem:[#allocation20_spill] sm:$0xff] }
 0x100   : > { %v846_v59 = vpop.permute.xlu1 %845  ;;  %2904 = vmatprep.mubr.msk.bf16.mxu0 %vm2089_vm10, %v2842_v32  ;;  %v844_v58 = vpop.permute.xlu0 %843  ;;  %v960_v19 = vsel %vm948_vm7, %v943_v23, %v3848_v2  ;;  %v958_v1 = vsel %vm948_vm7, %v941_v57, %v3850_v41  ;;  %v913_v56 = vsel %vm897_vm4, %v896_v40, %v5461_v0  ;;  %v5463_v2 = vld [vmem:[#allocation62_spill] sm:$0xff]  ;;  %v5464_v41 = vld [vmem:[#allocation63_spill] sm:$0xff] }
 0x101   : > { %v990_v34 = vsel %vm982_vm9, %v973_v47, %v846_v59  ;;  %v988_v14 = vsel %vm982_vm9, %v971_v49, %v844_v58  ;;  %v977_v12 = vsel %vm965_vm8, %v960_v19, %v3876_v35  ;;  %v975_v15 = vsel %vm965_vm8, %v958_v1, %v3878_v8  ;;  %v5472_v58 = vld [vmem:[#allocation18_spill] sm:$0xff]  ;;  %v5486_v19 = vld [vmem:[#allocation33_spill] sm:$0xff] }
 0x102   : > { %v2843_v9 = vcombine.low %v988_v14, %v990_v34  ;;  %1487 = vrot.lane.b32.xlu1 %v5457_v62, %s3133_s13  ;;  %1485 = vrot.lane.b32.xlu0 %v5458_v29, %s3133_s13  ;;  %v930_v21 = vsel %vm914_vm5, %v913_v56, %v5463_v2  ;;  %v928_v32 = vsel %vm914_vm5, %v911_v6, %v5464_v41  ;;  %v5491_v6 = vld [vmem:[#allocation35_spill] sm:$0xff] }
 0x103   : > { %v947_v35 = vsel %vm931_vm6, %v930_v21, %v3820_v4  ;;  %v945_v8 = vsel %vm931_vm6, %v928_v32, %v3822_v7  ;;  %v5499_v32 = vld [vmem:[#allocation37_spill] sm:$0xff] }
 0x104   : > { %v850_v52 = vpop.permute.xlu1 %849  ;;  %2905 = vmatmul.mubr.msk.bf16.vlgmr.msra.gmra.mrb[0].mxu0 %vm2089_vm10, %v2843_v9  ;;  %v848_v45 = vpop.permute.xlu0 %847  ;;  %v964_v27 = vsel %vm948_vm7, %v947_v35, %v3856_v3  ;;  %v962_v37 = vsel %vm948_vm7, %v945_v8, %v3858_v31  ;;  %v5467_v3 = vld [vmem:[#allocation15_spill] sm:$0xff]  ;;  %v5468_v31 = vld [vmem:[#allocation12_spill] sm:$0xff]  ;;  %v5481_v9 = vld [vmem:[#allocation34_spill] sm:$0xff] }
 0x105   : > { %v994_v48 = vsel %vm982_vm9, %v977_v12, %v850_v52  ;;  %v992_v28 = vsel %vm982_vm9, %v975_v15, %v848_v45  ;;  %v981_v11 = vsel %vm965_vm8, %v964_v27, %v3907_v54  ;;  %v979_v4 = vsel %vm965_vm8, %v962_v37, %v3909_v38  ;;  %v5471_v38 = vld [vmem:[#allocation21_spill] sm:$0xff]  ;;  %v5492_v12 = vld [vmem:[#allocation36_spill] sm:$0xff]  ;;  %v5503_v8 = vld [vmem:[#allocation39_spill] sm:$0xff] }
 0x106   : > { %v2844_v10 = vcombine.low %v992_v28, %v994_v48  ;;  %1499 = vrot.lane.b32.xlu1 %v5465_v17, %s5440_s19  ;;  %1497 = vrot.lane.b32.xlu0 %v5466_v18, %s5440_s19  ;;  %v5500_v48 = vld [vmem:[#allocation38_spill] sm:$0xff] }
 0x108   : > { %v854_v7 = vpop.permute.xlu1 %853  ;;  %2908 = vmatprep.mubr.msk.bf16.mxu0 %vm2089_vm10, %v2844_v10  ;;  %v852_v30 = vpop.permute.xlu0 %851  ;;  %v5504_v10 = vld [vmem:[#allocation40_spill] sm:$0xff] }
 0x109   : > { %v998_v42 = vsel %vm982_vm9, %v981_v11, %v854_v7  ;;  %v996_v47 = vsel %vm982_vm9, %v979_v4, %v852_v30  ;;  %v5507_v11 = vld [vmem:[#allocation10_spill] sm:$0xff]  ;;  %v5508_v4 = vld [vmem:[#allocation7_spill] sm:$0xff] }
 0x10a   : > { %v2845_v49 = vcombine.low %v996_v47, %v998_v42  ;;  %1503 = vrot.lane.b32.xlu1 %v5467_v3, %s5440_s19  ;;  %1501 = vrot.lane.b32.xlu0 %v5468_v31, %s5440_s19  ;;  %v5511_v42 = vld [vmem:[#allocation41_spill] sm:$0xff] }
 0x10b   : > { %v5512_v47 = vld [vmem:[#allocation9_spill] sm:$0xff] }
 0x10c   : > { %v4035_v59 = vpop.permute.xlu1 %1001  ;;  %2909 = vmatmul.mubr.msk.bf16.gmra.mrb[4].mxu0 %vm2089_vm10, %v2845_v49  ;;  %v4038_v54 = vpop.permute.xlu0 %999 }
 0x10d   : > { %5469 = vst [vmem:[#allocation6_spill] sm:$0xff] %v4035_v59  ;;  %5470 = vst [vmem:[#allocation43_spill] sm:$0xff] %v4038_v54 }
 0x10e   : > { %1518 = vrot.lane.b32.xlu1 %v5471_v38, %s3135_s17  ;;  %1516 = vrot.lane.b32.xlu0 %v5472_v58, %s3135_s17  ;;  %v5515_v58 = vld [vmem:[#allocation17_spill] sm:$0xff] }
 0x110   : > { %v4044_v61 = vpop.permute.xlu1 %1005  ;;  %v4046_v44 = vpop.permute.xlu0 %1003 }
 0x111   : > { %5473 = vst [vmem:[#allocation30_spill] sm:$0xff] %v4044_v61  ;;  %5474 = vst [vmem:[#allocation59_spill] sm:$0xff] %v4046_v44 }
 0x112   : > { %1522 = vrot.lane.b32.xlu1 %v5475_v43, %s3135_s17  ;;  %1520 = vrot.lane.b32.xlu0 %v5476_v13, %s3135_s17  ;;  %v5516_v43 = vld [vmem:[#allocation14_spill] sm:$0xff] }
 0x114   : > { %v4052_v34 = vpop.permute.xlu1 %1009  ;;  %v4054_v14 = vpop.permute.xlu0 %1007 }
 0x115   : > { %5477 = vst [vmem:[#allocation26_spill] sm:$0xff] %v4052_v34  ;;  %5478 = vst [vmem:[#allocation27_spill] sm:$0xff] %v4054_v14 }
 0x116   : > { %1537 = vrot.lane.b32.xlu1 %v5420_v20, %s3136_s18  ;;  %1535 = vrot.lane.b32.xlu0 %v3441_v55, %s3136_s18 }
 0x118   : > { %v4060_v23 = vpop.permute.xlu1 %1013  ;;  %v4062_v57 = vpop.permute.xlu0 %1011 }
 0x119   : > { %5479 = vst [vmem:[#allocation3_spill] sm:$0xff] %v4060_v23  ;;  %5480 = vst [vmem:[#allocation5_spill] sm:$0xff] %v4062_v57  ;;  %v437_v57 = vld [vmem:[%s3368_s24 + $0x44] sm:$0x1] }
 0x11a   : > { %1541 = vrot.lane.b32.xlu1 %v5481_v9, %s3136_s18  ;;  %1539 = vrot.lane.b32.xlu0 %v3462_v16, %s3136_s18 }
 0x11c   : > { %v4068_v5 = vpop.permute.xlu1 %1097  ;;  %v4070_v40 = vpop.permute.xlu0 %1095 }
 0x11d   : > { %5482 = vst [vmem:[#allocation44_spill] sm:$0xff] %v4068_v5  ;;  %5483 = vst [vmem:[#allocation45_spill] sm:$0xff] %v4070_v40  ;;  %v5537_v40 = vld [vmem:[#allocation50_spill] sm:$0xff] }
 0x11e   : > { %1563 = vrot.lane.b32.xlu1 %v3510_v33, %s3138_s22  ;;  %1561 = vrot.lane.b32.xlu0 %v3500_v51, %s3138_s22  ;;  %v5538_v5 = vld [vmem:[#allocation46_spill] sm:$0xff] }
 0x120   : > { %v4076_v36 = vpop.permute.xlu1 %1101  ;;  %v4078_v26 = vpop.permute.xlu0 %1099 }
 0x121   : > { %5484 = vst [vmem:[#allocation55_spill] sm:$0xff] %v4076_v36  ;;  %5485 = vst [vmem:[#allocation56_spill] sm:$0xff] %v4078_v26  ;;  %v5536_v26 = vld [vmem:[#allocation32_spill] sm:$0xff] }
 0x122   : > { %1443 = vrot.lane.b32.xlu1 %v5486_v19, %s3130_s20  ;;  %1441 = vrot.lane.b32.xlu0 %v5481_v9, %s3130_s20 }
 0x124   : > { %v4084_v1 = vpop.permute.xlu1 %1105  ;;  %v4086_v0 = vpop.permute.xlu0 %1103 }
 0x125   : > { %5487 = vst [vmem:[#allocation60_spill] sm:$0xff] %v4084_v1  ;;  %5488 = vst [vmem:[#allocation61_spill] sm:$0xff] %v4086_v0 }
 0x126   : > { %1567 = vrot.lane.b32.xlu1 %v3518_v53, %s3138_s22  ;;  %1565 = vrot.lane.b32.xlu0 %v3508_v50, %s3138_s22 }
 0x128   : > { %v4092_v56 = vpop.permute.xlu1 %1109  ;;  %v4094_v24 = vpop.permute.xlu0 %1107 }
 0x129   : > { %5489 = vst [vmem:[#allocation8_spill] sm:$0xff] %v4092_v56  ;;  %5490 = vst [vmem:[#allocation4_spill] sm:$0xff] %v4094_v24  ;;  %v5523_v24 = vld [vmem:[#allocation25_spill] sm:$0xff]  ;;  %v5524_v56 = vld [vmem:[#allocation22_spill] sm:$0xff] }
 0x12a   : > { %1447 = vrot.lane.b32.xlu1 %v5491_v6, %s3130_s20  ;;  %1445 = vrot.lane.b32.xlu0 %v5492_v12, %s3130_s20 }
 0x12c   : > { %v4100_v15 = vpop.permute.xlu1 %1113  ;;  %v4102_v52 = vpop.permute.xlu0 %1111 }
 0x12d   : > { %5493 = vst [vmem:[#allocation47_spill] sm:$0xff] %v4100_v15  ;;  %5494 = vst [vmem:[#allocation48_spill] sm:$0xff] %v4102_v52 }
 0x12e   : > { %1459 = vrot.lane.b32.xlu1 %v3516_v46, %s3131_s21  ;;  %1457 = vrot.lane.b32.xlu0 %v3518_v53, %s3131_s21 }
 0x130   : > { %v4108_v45 = vpop.permute.xlu1 %1117  ;;  %v4110_v2 = vpop.permute.xlu0 %1115 }
 0x131   : > { %5495 = vst [vmem:[#allocation57_spill] sm:$0xff] %v4108_v45  ;;  %5496 = vst [vmem:[#allocation58_spill] sm:$0xff] %v4110_v2  ;;  %v5535_v45 = vld [vmem:[#allocation31_spill] sm:$0xff] }
 0x132   : > { %1463 = vrot.lane.b32.xlu1 %v3524_v39, %s3131_s21  ;;  %1461 = vrot.lane.b32.xlu0 %v3526_v22, %s3131_s21 }
 0x134   : > { %v4116_v21 = vpop.permute.xlu1 %1121  ;;  %v4118_v41 = vpop.permute.xlu0 %1119 }
 0x135   : > { %5497 = vst [vmem:[#allocation62_spill] sm:$0xff] %v4116_v21  ;;  %5498 = vst [vmem:[#allocation63_spill] sm:$0xff] %v4118_v41  ;;  %v4182_v41 = vld [vmem:[%s3418_s14 + $0x40] sm:$0xf] }
 0x136   : > { %1475 = vrot.lane.b32.xlu1 %v5499_v32, %s3132_s25  ;;  %1473 = vrot.lane.b32.xlu0 %v5500_v48, %s3132_s25  ;;  %v5519_v48 = vld [vmem:[#allocation42_spill] sm:$0xff]  ;;  %5528 = vst [vmem:[#allocation7_spill] sm:$0xff] %v4182_v41 }
 0x138   : > { %v4124_v28 = vpop.permute.xlu1 %1125  ;;  %v4126_v35 = vpop.permute.xlu0 %1123 }
 0x139   : > { %5501 = vst [vmem:[#allocation13_spill] sm:$0xff] %v4124_v28  ;;  %5502 = vst [vmem:[#allocation11_spill] sm:$0xff] %v4126_v35 }
 0x13a   : > { %1479 = vrot.lane.b32.xlu1 %v5503_v8, %s3132_s25  ;;  %1477 = vrot.lane.b32.xlu0 %v5504_v10, %s3132_s25  ;;  %v5520_v8 = vld [vmem:[#allocation16_spill] sm:$0xff] }
 0x13b   : > { %v436_v10 = vld [vmem:[%s3368_s24 + $0x40] sm:$0xf] }
 0x13c   : > { %v4132_v27 = vpop.permute.xlu1 %1129  ;;  %v4134_v37 = vpop.permute.xlu0 %1127 }
 0x13d   : > { %5505 = vst [vmem:[#allocation15_spill] sm:$0xff] %v4132_v27  ;;  %5506 = vst [vmem:[#allocation12_spill] sm:$0xff] %v4134_v37 }
 0x13e   : > { %1491 = vrot.lane.b32.xlu1 %v5507_v11, %s3133_s13  ;;  %1489 = vrot.lane.b32.xlu0 %v5508_v4, %s3133_s13 }
 0x140   : > { %v4140_v7 = vpop.permute.xlu1 %1133  ;;  %v4142_v30 = vpop.permute.xlu0 %1131 }
 0x141   : > { %5509 = vst [vmem:[#allocation21_spill] sm:$0xff] %v4140_v7  ;;  %5510 = vst [vmem:[#allocation18_spill] sm:$0xff] %v4142_v30  ;;  %v5533_v30 = vld [vmem:[#allocation28_spill] sm:$0xff]  ;;  %v5534_v7 = vld [vmem:[#allocation29_spill] sm:$0xff] }
 0x142   : > { %1495 = vrot.lane.b32.xlu1 %v5511_v42, %s3133_s13  ;;  %1493 = vrot.lane.b32.xlu0 %v5512_v47, %s3133_s13 }
 0x144   : > { %v4148_v49 = vpop.permute.xlu1 %1137  ;;  %v4150_v38 = vpop.permute.xlu0 %1135 }
 0x145   : > { %5513 = vst [vmem:[#allocation23_spill] sm:$0xff] %v4148_v49  ;;  %5514 = vst [vmem:[#allocation20_spill] sm:$0xff] %v4150_v38  ;;  %v2840_v38 = vcombine.low %v436_v10, %v437_v57  ;;  %v5527_v49 = vld [vmem:[#allocation24_spill] sm:$0xff]  ;;  %v4194_v57 = vcombine.low %v4182_v41, %v4182_v41 }
 0x146   : > { %1507 = vrot.lane.b32.xlu1 %v5515_v58, %s5440_s19  ;;  %1505 = vrot.lane.b32.xlu0 %v5516_v43, %s5440_s19 }
 0x147   : > { %5531 = vst [vmem:[#allocation17_spill] sm:$0xff] %v4194_v57 }
 0x148   : > { %v4156_v13 = vpop.permute.xlu1 %1141  ;;  %v4158_v32 = vpop.permute.xlu0 %1139 }
 0x149   : > { %5517 = vst [vmem:[#allocation34_spill] sm:$0xff] %v4156_v13  ;;  %5518 = vst [vmem:[#allocation37_spill] sm:$0xff] %v4158_v32  ;;  %v2838_v13 = vcombine.low %v436_v10, %v436_v10 }
 0x14a   : > { %1511 = vrot.lane.b32.xlu1 %v5519_v48, %s5440_s19  ;;  %1509 = vrot.lane.b32.xlu0 %v5520_v8, %s5440_s19 }
 0x14c   : > { %v4165_v35 = vpop.permute.xlu1 %1225  ;;  %v4167_v28 = vpop.permute.xlu0 %1223 }
 0x14d   : > { %5521 = vst [vmem:[#allocation38_spill] sm:$0xff] %v4165_v35  ;;  %5522 = vst [vmem:[#allocation39_spill] sm:$0xff] %v4167_v28 }
 0x14e   : > { %1526 = vrot.lane.b32.xlu1 %v5523_v24, %s3135_s17  ;;  %1524 = vrot.lane.b32.xlu0 %v5524_v56, %s3135_s17  ;;  %v1557_v56 = vshll.u32 %v2840_v38, 16 }
 0x150   : > { %v4174_v32 = vpop.permute.xlu1 %1229  ;;  %v4176_v23 = vpop.permute.xlu0 %1227 }
 0x151   : > { %5525 = vst [vmem:[#allocation40_spill] sm:$0xff] %v4174_v32  ;;  %5526 = vst [vmem:[#allocation10_spill] sm:$0xff] %v4176_v23 }
 0x152   : > { %1530 = vrot.lane.b32.xlu1 %v2838_v13, %s3135_s17  ;;  %1528 = vrot.lane.b32.xlu0 %v5527_v49, %s3135_s17  ;;  %v1555_v49 = vshrl.u32 %v2840_v38, 16 }
 0x154   : > { %v4184_v21 = vpop.permute.xlu1 %1233  ;;  %v4186_v24 = vpop.permute.xlu0 %1231 }
 0x155   : > { %5529 = vst [vmem:[#allocation41_spill] sm:$0xff] %v4184_v21  ;;  %5530 = vst [vmem:[#allocation9_spill] sm:$0xff] %v4186_v24  ;;  %v1559_v24 = vrot.slane %v1557_v56, 1 }
 0x156   : > { %1545 = vrot.lane.b32.xlu1 %v5492_v12, %s3136_s18  ;;  %1543 = vrot.lane.b32.xlu0 %v5486_v19, %s3136_s18 }
 0x157   : > { %v4208_v1 = vor.u32 %v1559_v24, %v1555_v49 }
 0x158   : > { %v1436_v13 = vpop.permute.xlu1 %1435  ;;  %v1434_v10 = vpop.permute.xlu0 %1433 }
 0x159   : > { %5532 = vst [vmem:[#allocation25_spill] sm:$0xff] %v4208_v1 }
 0x15a   : > { %1549 = vrot.lane.b32.xlu1 %v4194_v57, %s3136_s18  ;;  %1547 = vrot.lane.b32.xlu0 %v5491_v6, %s3136_s18  ;;  %v3065_v6 = vld [vmem:[%s3368_s24] sm:$0xf] }
 0x15b   : > { %v1579_v57 = vsel %vm855_vm2, %v3065_v6, %v1434_v10  ;;  %v3066_v10 = vld [vmem:[%s3368_s24 + $0x18] sm:$0xf] }
 0x15c   : > { %v4200_v21 = vpop.permute.xlu1 %1439  ;;  %v4202_v0 = vpop.permute.xlu0 %1437 }
 0x15e   : > { %1571 = vrot.lane.b32.xlu1 %v3526_v22, %s3138_s22  ;;  %1569 = vrot.lane.b32.xlu0 %v3516_v46, %s3138_s22 }
 0x160   : > { %v1452_v14 = vpop.permute.xlu1 %1451  ;;  %v1450_v34 = vpop.permute.xlu0 %1449 }
 0x161   : > { %v1602_v12 = vsel %vm880_vm3, %v1579_v57, %v1450_v34  ;;  %v5540_v34 = vld [vmem:[#allocation49_spill] sm:$0xff] }
 0x162   : > { %1575 = vrot.lane.b32.xlu1 %v4208_v1, %s3138_s22  ;;  %1573 = vrot.lane.b32.xlu0 %v3524_v39, %s3138_s22  ;;  %v3064_v1 = vld [vmem:[%s3368_s24 + $0x8] sm:$0xf] }
 0x163   : > { %v1582_v41 = vsel %vm855_vm2, %v3064_v1, %v1436_v13 }
 0x164   : > { %v4214_v38 = vpop.permute.xlu1 %1455  ;;  %v4216_v56 = vpop.permute.xlu0 %1453  ;;  %v1604_v19 = vsel %vm880_vm3, %v1582_v41, %v1452_v14  ;;  %v5539_v14 = vld [vmem:[#allocation52_spill] sm:$0xff] }
 0x166   : > { %1715 = vrot.lane.b32.xlu1 %v3500_v51, %s3130_s20  ;;  %1713 = vrot.lane.b32.xlu0 %v3506_v63, %s3130_s20 }
 0x168   : > { %v1468_v24 = vpop.permute.xlu1 %1467  ;;  %v1466_v49 = vpop.permute.xlu0 %1465 }
 0x169   : > { %v1620_v8 = vsel %vm897_vm4, %v1604_v19, %v1468_v24  ;;  %v1618_v48 = vsel %vm897_vm4, %v1602_v12, %v1466_v49  ;;  %v1588_v24 = vsel %vm855_vm2, %v3066_v10, %v4200_v21  ;;  %v3067_v49 = vld [vmem:[%s3368_s24 + $0x10] sm:$0xf] }
 0x16a   : > { %1719 = vrot.lane.b32.xlu1 %v3508_v50, %s3130_s20  ;;  %1717 = vrot.lane.b32.xlu0 %v3510_v33, %s3130_s20 }
 0x16c   : > { %v4226_v23 = vpop.permute.xlu1 %1471  ;;  %v4228_v32 = vpop.permute.xlu0 %1469 }
 0x16e   : > { %1731 = vrot.lane.b32.xlu1 %v5533_v30, %s3131_s21  ;;  %1729 = vrot.lane.b32.xlu0 %v5534_v7, %s3131_s21 }
 0x170   : > { %v1484_v2 = vpop.permute.xlu1 %1483  ;;  %v1482_v63 = vpop.permute.xlu0 %1481 }
 0x171   : > { %v1636_v13 = vsel %vm914_vm5, %v1620_v8, %v1484_v2  ;;  %v1634_v6 = vsel %vm914_vm5, %v1618_v48, %v1482_v63 }
 0x172   : > { %1735 = vrot.lane.b32.xlu1 %v5535_v45, %s3131_s21  ;;  %1733 = vrot.lane.b32.xlu0 %v5536_v26, %s3131_s21 }
 0x174   : > { %v4238_v36 = vpop.permute.xlu1 %1487  ;;  %v4240_v44 = vpop.permute.xlu0 %1485 }
 0x176   : > { %1747 = vrot.lane.b32.xlu1 %v5449_v25, %s3132_s25  ;;  %1745 = vrot.lane.b32.xlu0 %v5450_v60, %s3132_s25 }
 0x178   : > { %v1500_v61 = vpop.permute.xlu1 %1499  ;;  %v1498_v7 = vpop.permute.xlu0 %1497 }
 0x17a   : > { %1751 = vrot.lane.b32.xlu1 %v5457_v62, %s3132_s25  ;;  %1749 = vrot.lane.b32.xlu0 %v5458_v29, %s3132_s25 }
 0x17c   : > { %v1504_v28 = vpop.permute.xlu1 %1503  ;;  %v1502_v35 = vpop.permute.xlu0 %1501 }
 0x17e   : > { %1763 = vrot.lane.b32.xlu1 %v5465_v17, %s3133_s13  ;;  %1761 = vrot.lane.b32.xlu0 %v5466_v18, %s3133_s13 }
 0x180   : > { %v1519_v37 = vpop.permute.xlu1 %1518  ;;  %v1517_v27 = vpop.permute.xlu0 %1516 }
 0x182   : > { %1767 = vrot.lane.b32.xlu1 %v5467_v3, %s3133_s13  ;;  %1765 = vrot.lane.b32.xlu0 %v5468_v31, %s3133_s13 }
 0x184   : > { %v1523_v52 = vpop.permute.xlu1 %1522  ;;  %v1521_v15 = vpop.permute.xlu0 %1520 }
 0x186   : > { %1779 = vrot.lane.b32.xlu1 %v5537_v40, %s5440_s19  ;;  %1777 = vrot.lane.b32.xlu0 %v5538_v5, %s5440_s19 }
 0x188   : > { %v1538_v54 = vpop.permute.xlu1 %1537  ;;  %v1536_v59 = vpop.permute.xlu0 %1535 }
 0x18a   : > { %1241 = vrot.lane.b32.xlu1 %v5449_v25, %s3135_s17  ;;  %1239 = vrot.lane.b32.xlu0 %v5450_v60, %s3135_s17  ;;  %v1652_v25 = vsel %vm931_vm6, %v1636_v13, %v1500_v61  ;;  %v1650_v60 = vsel %vm931_vm6, %v1634_v6, %v1498_v7 }
 0x18b   : > { %v1668_v19 = vsel %vm948_vm7, %v1652_v25, %v1519_v37  ;;  %v1666_v12 = vsel %vm948_vm7, %v1650_v60, %v1517_v27  ;;  %v1585_v37 = vsel %vm855_vm2, %v3067_v49, %v4202_v0 }
 0x18c   : > { %v1542_v43 = vpop.permute.xlu1 %1541  ;;  %v1540_v1 = vpop.permute.xlu0 %1539  ;;  %v1684_v41 = vsel %vm965_vm8, %v1668_v19, %v1538_v54  ;;  %v1682_v2 = vsel %vm965_vm8, %v1666_v12, %v1536_v59  ;;  %v1608_v54 = vsel %vm880_vm3, %v1588_v24, %v4214_v38  ;;  %v1606_v27 = vsel %vm880_vm3, %v1585_v37, %v4216_v56  ;;  %v4391_v19 = vld [vmem:[%s3418_s14 + $0x30] sm:$0xf] }
 0x18d   : > { %v1624_v21 = vsel %vm897_vm4, %v1608_v54, %v4226_v23  ;;  %v1622_v63 = vsel %vm897_vm4, %v1606_v27, %v4228_v32 }
 0x18e   : > { %1783 = vrot.lane.b32.xlu1 %v5539_v14, %s5440_s19  ;;  %1781 = vrot.lane.b32.xlu0 %v5540_v34, %s5440_s19  ;;  %v1638_v38 = vsel %vm914_vm5, %v1622_v63, %v4240_v44  ;;  %v3070_v63 = vld [vmem:[%s3368_s24 + $0x28] sm:$0xf] }
 0x18f   : > { %v1654_v7 = vsel %vm931_vm6, %v1638_v38, %v1502_v35  ;;  %v3071_v38 = vld [vmem:[%s3368_s24 + $0x20] sm:$0xf] }
 0x190   : > { %v1564_v8 = vpop.permute.xlu1 %1563  ;;  %v1562_v48 = vpop.permute.xlu0 %1561  ;;  %v1670_v32 = vsel %vm948_vm7, %v1654_v7, %v1521_v15 }
 0x191   : > { %v1700_v61 = vsel %vm982_vm9, %v1684_v41, %v1564_v8  ;;  %v1698_v57 = vsel %vm982_vm9, %v1682_v2, %v1562_v48  ;;  %v5541_v41 = vld [vmem:[#allocation65_spill] sm:$0xff] }
 0x192   : > { %1795 = vrot.lane.b32.xlu1 %v5420_v20, %s3135_s17  ;;  %1793 = vrot.lane.b32.xlu0 %v3441_v55, %s3135_s17  ;;  %v2850_v59 = vcombine.low %v1698_v57, %v1700_v61  ;;  %v1640_v55 = vsel %vm914_vm5, %v1624_v21, %v4238_v36  ;;  %v1686_v36 = vsel %vm965_vm8, %v1670_v32, %v1540_v1 }
 0x193   : > { %v1656_v56 = vsel %vm931_vm6, %v1640_v55, %v1504_v28 }
 0x194   : > { %v4306_v0 = vpop.permute.xlu1 %1443  ;;  %2920 = vmatprep.mubr.msk.bf16.mxu1 %vm2089_vm10, %v2850_v59  ;;  %v4309_v20 = vpop.permute.xlu0 %1441  ;;  %v1672_v23 = vsel %vm948_vm7, %v1656_v56, %v1523_v52 }
 0x195   : > { %v1688_v13 = vsel %vm965_vm8, %v1672_v23, %v1542_v43  ;;  %v451_v43 = vld [vmem:[%s3418_s14 + $0x34] sm:$0x1]  ;;  %v1594_v55 = vsel %vm855_vm2, %v3070_v63, %v4306_v0  ;;  %v1591_v56 = vsel %vm855_vm2, %v3071_v38, %v4309_v20 }
 0x196   : > { %1245 = vrot.lane.b32.xlu1 %v5457_v62, %s3135_s17  ;;  %1243 = vrot.lane.b32.xlu0 %v5458_v29, %s3135_s17 }
 0x198   : > { %v1568_v6 = vpop.permute.xlu1 %1567  ;;  %v1566_v44 = vpop.permute.xlu0 %1565 }
 0x199   : > { %v1704_v28 = vsel %vm982_vm9, %v1688_v13, %v1568_v6  ;;  %v1702_v35 = vsel %vm982_vm9, %v1686_v36, %v1566_v44  ;;  %v3072_v6 = vld [vmem:[%s3368_s24 + $0x38] sm:$0xf] }
 0x19a   : > { %v2851_v25 = vcombine.low %v1702_v35, %v1704_v28  ;;  %1257 = vrot.lane.b32.xlu1 %v5465_v17, %s3136_s18  ;;  %1255 = vrot.lane.b32.xlu0 %v5466_v18, %s3136_s18  ;;  %v3073_v35 = vld [vmem:[%s3368_s24 + $0x30] sm:$0xf] }
 0x19c   : > { %v4331_v62 = vpop.permute.xlu1 %1447  ;;  %2921 = vmatmul.mubr.msk.bf16.vlgmr.msra.gmra.mrb[0].mxu1 %vm2089_vm10, %v2851_v25  ;;  %v4334_v29 = vpop.permute.xlu0 %1445 }
 0x19d   : > { %v1600_v20 = vsel %vm855_vm2, %v3072_v6, %v4331_v62  ;;  %v1597_v25 = vsel %vm855_vm2, %v3073_v35, %v4334_v29  ;;  %v5547_v6 = vld [vmem:[#allocation51_spill] sm:$0xff] }
 0x19e   : > { %1799 = vrot.lane.b32.xlu1 %v5481_v9, %s3135_s17  ;;  %1797 = vrot.lane.b32.xlu0 %v3462_v16, %s3135_s17 }
 0x1a0   : > { %v4340_v15 = vpop.permute.xlu1 %1459  ;;  %v4342_v52 = vpop.permute.xlu0 %1457 }
 0x1a1   : > { %v1612_v7 = vsel %vm880_vm3, %v1594_v55, %v4340_v15  ;;  %v1610_v23 = vsel %vm880_vm3, %v1591_v56, %v4342_v52  ;;  %v5544_v56 = vld [vmem:[#allocation42_spill] sm:$0xff] }
 0x1a2   : > { %1811 = vrot.lane.b32.xlu1 %v3510_v33, %s3136_s18  ;;  %1809 = vrot.lane.b32.xlu0 %v3500_v51, %s3136_s18 }
 0x1a4   : > { %v4348_v17 = vpop.permute.xlu1 %1463  ;;  %v4350_v18 = vpop.permute.xlu0 %1461 }
 0x1a5   : > { %v1616_v62 = vsel %vm880_vm3, %v1600_v20, %v4348_v17  ;;  %v5548_v20 = vld [vmem:[#allocation19_spill] sm:$0xff] }
 0x1a6   : > { %1261 = vrot.lane.b32.xlu1 %v5467_v3, %s3136_s18  ;;  %1259 = vrot.lane.b32.xlu0 %v5468_v31, %s3136_s18 }
 0x1a8   : > { %v1476_v16 = vpop.permute.xlu1 %1475  ;;  %v1474_v9 = vpop.permute.xlu0 %1473 }
 0x1a9   : > { %v1628_v32 = vsel %vm897_vm4, %v1612_v7, %v1476_v16  ;;  %v1626_v0 = vsel %vm897_vm4, %v1610_v23, %v1474_v9  ;;  %v1614_v16 = vsel %vm880_vm3, %v1597_v25, %v4350_v18  ;;  %v5545_v23 = vld [vmem:[#allocation16_spill] sm:$0xff] }
 0x1aa   : > { %1283 = vrot.lane.b32.xlu1 %v5537_v40, %s3138_s22  ;;  %1281 = vrot.lane.b32.xlu0 %v5538_v5, %s3138_s22 }
 0x1ac   : > { %v4360_v51 = vpop.permute.xlu1 %1479  ;;  %v4362_v33 = vpop.permute.xlu0 %1477 }
 0x1ae   : > { %1815 = vrot.lane.b32.xlu1 %v3518_v53, %s3136_s18  ;;  %1813 = vrot.lane.b32.xlu0 %v3508_v50, %s3136_s18  ;;  %v453_v50 = vld [vmem:[%s3418_s14 + $0x3c] sm:$0x1] }
 0x1b0   : > { %v1492_v3 = vpop.permute.xlu1 %1491  ;;  %v1490_v31 = vpop.permute.xlu0 %1489 }
 0x1b1   : > { %v1644_v44 = vsel %vm914_vm5, %v1628_v32, %v1492_v3  ;;  %v1642_v28 = vsel %vm914_vm5, %v1626_v0, %v1490_v31  ;;  %v1632_v3 = vsel %vm897_vm4, %v1616_v62, %v4360_v51  ;;  %v1630_v31 = vsel %vm897_vm4, %v1614_v16, %v4362_v33 }
 0x1b2   : > { %1837 = vrot.lane.b32.xlu1 %v5536_v26, %s3138_s22  ;;  %1835 = vrot.lane.b32.xlu0 %v5533_v30, %s3138_s22  ;;  %v4387_v26 = vld [vmem:[%s3418_s14 + $0x38] sm:$0xf] }
 0x1b3   : > { %v2836_v30 = vcombine.low %v4387_v26, %v453_v50 }
 0x1b4   : > { %v4372_v5 = vpop.permute.xlu1 %1495  ;;  %v4374_v40 = vpop.permute.xlu0 %1493 }
 0x1b5   : > { %v1219_v2 = vshll.u32 %v2836_v30, 16  ;;  %v1217_v61 = vshrl.u32 %v2836_v30, 16  ;;  %v1648_v17 = vsel %vm914_vm5, %v1632_v3, %v4372_v5  ;;  %v1646_v18 = vsel %vm914_vm5, %v1630_v31, %v4374_v40 }
 0x1b6   : > { %1287 = vrot.lane.b32.xlu1 %v5539_v14, %s3138_s22  ;;  %1285 = vrot.lane.b32.xlu0 %v5540_v34, %s3138_s22  ;;  %v2835_v14 = vcombine.low %v4391_v19, %v451_v43  ;;  %v1275_v3 = vshrl.u32 %v5548_v20, 16 }
 0x1b7   : > { %v1221_v57 = vrot.slane %v1219_v2, 1 }
 0x1b8   : > { %v1508_v1 = vpop.permute.xlu1 %1507  ;;  %v1506_v60 = vpop.permute.xlu0 %1505  ;;  %v1212_v8 = vshll.u32 %v2835_v14, 16  ;;  %v1210_v10 = vshrl.u32 %v2835_v14, 16 }
 0x1b9   : > { %v4406_v59 = vor.u32 %v1221_v57, %v1217_v61  ;;  %v1660_v15 = vsel %vm931_vm6, %v1644_v44, %v1508_v1  ;;  %v1658_v52 = vsel %vm931_vm6, %v1642_v28, %v1506_v60  ;;  %v4474_v61 = vld [vmem:[%s5266_s5] ss:$0 sm:$0xff]  ;;  %v1277_v44 = vshll.u32 %v5548_v20, 16  ;;  %v5554_v20 = vld [vmem:[#allocation7_spill] sm:$0xff] }
 0x1ba   : > { %1723 = vrot.lane.b32.xlu1 %v3516_v46, %s3130_s20  ;;  %1721 = vrot.lane.b32.xlu0 %v3518_v53, %s3130_s20  ;;  %v1214_v24 = vrot.slane %v1212_v8, 1 }
 0x1bb   : > { %v1279_v31 = vrot.slane %v1277_v44, 1 }
 0x1bc   : > { %v1512_v12 = vpop.permute.xlu1 %1511  ;;  %v1510_v34 = vpop.permute.xlu0 %1509  ;;  %v4408_v54 = vor.u32 %v1214_v24, %v1210_v10  ;;  %v5543_v10 = vld [vmem:[#allocation14_spill] sm:$0xff] }
 0x1bd   : > { %v1664_v51 = vsel %vm931_vm6, %v1648_v17, %v1512_v12  ;;  %v1662_v33 = vsel %vm931_vm6, %v1646_v18, %v1510_v34  ;;  %v3075_v17 = vld [vmem:[%s3418_s14 + $0x10] sm:$0xf] }
 0x1be   : > { %1841 = vrot.lane.b32.xlu1 %v5541_v41, %s3138_s22  ;;  %1839 = vrot.lane.b32.xlu0 %v5535_v45, %s3138_s22  ;;  %v5542_v45 = vld [vmem:[#allocation64_spill] sm:$0xff] }
 0x1c0   : > { %v1527_v48 = vpop.permute.xlu1 %1526  ;;  %v1525_v53 = vpop.permute.xlu0 %1524 }
 0x1c1   : > { %v1676_v9 = vsel %vm948_vm7, %v1660_v15, %v1527_v48  ;;  %v1674_v29 = vsel %vm948_vm7, %v1658_v52, %v1525_v53 }
 0x1c2   : > { %1727 = vrot.lane.b32.xlu1 %v3524_v39, %s3130_s20  ;;  %1725 = vrot.lane.b32.xlu0 %v3526_v22, %s3130_s20 }
 0x1c4   : > { %v1531_v49 = vpop.permute.xlu1 %1530  ;;  %v1529_v37 = vpop.permute.xlu0 %1528 }
 0x1c5   : > { %v1680_v5 = vsel %vm948_vm7, %v1664_v51, %v1531_v49  ;;  %v1678_v2 = vsel %vm948_vm7, %v1662_v33, %v1529_v37  ;;  %v1280_v33 = vor.u32 %v1279_v31, %v1275_v3 }
 0x1c6   : > { %1739 = vrot.lane.b32.xlu1 %v5542_v45, %s3131_s21  ;;  %1737 = vrot.lane.b32.xlu0 %v5541_v41, %s3131_s21 }
 0x1c8   : > { %v1546_v27 = vpop.permute.xlu1 %1545  ;;  %v1544_v21 = vpop.permute.xlu0 %1543 }
 0x1c9   : > { %v1692_v50 = vsel %vm965_vm8, %v1676_v9, %v1546_v27  ;;  %v1690_v43 = vsel %vm965_vm8, %v1674_v29, %v1544_v21 }
 0x1ca   : > { %1743 = vrot.lane.b32.xlu1 %v4406_v59, %s3131_s21  ;;  %1741 = vrot.lane.b32.xlu0 %v4408_v54, %s3131_s21 }
 0x1cc   : > { %v1550_v13 = vpop.permute.xlu1 %1549  ;;  %v1548_v36 = vpop.permute.xlu0 %1547 }
 0x1cd   : > { %v1696_v40 = vsel %vm965_vm8, %v1680_v5, %v1550_v13  ;;  %v1694_v8 = vsel %vm965_vm8, %v1678_v2, %v1548_v36  ;;  %v5546_v36 = vld [vmem:[#allocation54_spill] sm:$0xff]  ;;  %v5549_v2 = vld [vmem:[#allocation53_spill] sm:$0xff] }
 0x1ce   : > { %1755 = vrot.lane.b32.xlu1 %v5507_v11, %s3132_s25  ;;  %1753 = vrot.lane.b32.xlu0 %v5508_v4, %s3132_s25 }
 0x1d0   : > { %v1572_v1 = vpop.permute.xlu1 %1571  ;;  %v1570_v60 = vpop.permute.xlu0 %1569 }
 0x1d1   : > { %v1708_v30 = vsel %vm982_vm9, %v1692_v50, %v1572_v1  ;;  %v1706_v14 = vsel %vm982_vm9, %v1690_v43, %v1570_v60  ;;  %v3074_v43 = vld [vmem:[%s3418_s14 + $0x18] sm:$0xf] }
 0x1d2   : > { %v2852_v41 = vcombine.low %v1706_v14, %v1708_v30  ;;  %1759 = vrot.lane.b32.xlu1 %v5511_v42, %s3132_s25  ;;  %1757 = vrot.lane.b32.xlu0 %v5512_v47, %s3132_s25 }
 0x1d4   : > { %v1576_v48 = vpop.permute.xlu1 %1575  ;;  %2924 = vmatprep.mubr.msk.bf16.mxu1 %vm2089_vm10, %v2852_v41  ;;  %v1574_v12 = vpop.permute.xlu0 %1573 }
 0x1d5   : > { %v1712_v34 = vsel %vm982_vm9, %v1696_v40, %v1576_v48  ;;  %v1710_v53 = vsel %vm982_vm9, %v1694_v8, %v1574_v12  ;;  %v5550_v48 = vld [vmem:[#allocation36_spill] sm:$0xff] }
 0x1d6   : > { %v2853_v57 = vcombine.low %v1710_v53, %v1712_v34  ;;  %1771 = vrot.lane.b32.xlu1 %v5515_v58, %s3133_s13  ;;  %1769 = vrot.lane.b32.xlu0 %v5543_v10, %s3133_s13 }
 0x1d7   : > { %v2906_v24 = vpop.f32.mrb[0].mxu0 }
 0x1d8   : > { %v4481_v49 = vadd.f32 %v2906_v24, %v4474_v61  ;;  %v4483_v37 = vpop.permute.xlu1 %1715  ;;  %v2179_v27 = vpop.f32.mrb[1].mxu0  ;;  %2925 = vmatmul.mubr.msk.bf16.gmra.mrb[4].mxu1 %vm2089_vm10, %v2853_v57 }
 0x1d9   : > { %v4487_v21 = vadd.f32 %v4474_v61, %v2179_v27  ;;  %v4489_v63 = vpop.permute.xlu0 %1713  ;;  %v2907_v55 = vpop.f32.mrb[2].mxu0 }
 0x1da   : > { %v4492_v38 = vadd.f32 %v2907_v55, %v4474_v61  ;;  %1775 = vrot.lane.b32.xlu1 %v5544_v56, %s3133_s13  ;;  %v2182_v7 = vpop.f32.mrb[3].mxu0  ;;  %1773 = vrot.lane.b32.xlu0 %v5545_v23, %s3133_s13 }
 0x1db   : > { %v4499_v32 = vadd.f32 %v4474_v61, %v2182_v7  ;;  %v455_v7 = vld [vmem:[%s3418_s14 + $0x44] sm:$0x1] }
 0x1dc   : > { %v1720_v0 = vpop.permute.xlu1 %1719 }
 0x1dd   : > { %v1718_v13 = vpop.permute.xlu0 %1717  ;;  %v1862_v1 = vsel %vm855_vm2, %v3074_v43, %v1720_v0  ;;  %v3076_v43 = vld [vmem:[%s3227_s16 + $0x8] sm:$0xf] }
 0x1de   : > { %1787 = vrot.lane.b32.xlu1 %v5546_v36, %s5440_s19  ;;  %1785 = vrot.lane.b32.xlu0 %v5547_v6, %s5440_s19  ;;  %v1859_v18 = vsel %vm855_vm2, %v3075_v17, %v1718_v13 }
 0x1df   : > { %v2910_v28 = vpop.f32.mrb[4].mxu0 }
 0x1e0   : > { %v4507_v35 = vadd.f32 %v2910_v28, %v4474_v61  ;;  %v4509_v25 = vpop.permute.xlu1 %1731  ;;  %v2195_v15 = vpop.f32.mrb[5].mxu0 }
 0x1e1   : > { %v4512_v52 = vadd.f32 %v4474_v61, %v2195_v15  ;;  %v4514_v62 = vpop.permute.xlu0 %1729  ;;  %v2911_v16 = vpop.f32.mrb[6].mxu0 }
 0x1e2   : > { %v4517_v9 = vadd.f32 %v2911_v16, %v4474_v61  ;;  %1237 = vrot.lane.b32.xlu1 %v4406_v59, %s5440_s19  ;;  %v2198_v29 = vpop.f32.mrb[7].mxu0  ;;  %1235 = vrot.lane.b32.xlu0 %v4408_v54, %s5440_s19 }
 0x1e3   : > { %v4525_v50 = vadd.f32 %v4474_v61, %v2198_v29 }
 0x1e4   : > { %v1736_v60 = vpop.permute.xlu1 %1735 }
 0x1e5   : > { %v4532_v30 = vsel %vm880_vm3, %v1862_v1, %v1736_v60  ;;  %v1734_v14 = vpop.permute.xlu0 %1733  ;;  %v5556_v1 = vld [vmem:[#allocation6_spill] sm:$0xff]  ;;  %v5557_v60 = vld [vmem:[#allocation43_spill] sm:$0xff] }
 0x1e6   : > { %v4535_v51 = vsel %vm880_vm3, %v1859_v18, %v1734_v14  ;;  %1249 = vrot.lane.b32.xlu1 %v5507_v11, %s3135_s17  ;;  %1247 = vrot.lane.b32.xlu0 %v5508_v4, %s3135_s17  ;;  %v5551_v11 = vld [vmem:[#allocation33_spill] sm:$0xff]  ;;  %v5558_v18 = vld [vmem:[#allocation44_spill] sm:$0xff] }
 0x1e8   : > { %v4541_v41 = vpop.permute.xlu1 %1747 }
 0x1e9   : > { %v4543_v5 = vpop.permute.xlu0 %1745 }
 0x1ea   : > { %1791 = vrot.lane.b32.xlu1 %v1280_v33, %s5440_s19  ;;  %1789 = vrot.lane.b32.xlu0 %v5549_v2, %s5440_s19 }
 0x1ec   : > { %v4548_v40 = vpop.permute.xlu1 %1751 }
 0x1ed   : > { %v4550_v8 = vpop.permute.xlu0 %1749 }
 0x1ee   : > { %1803 = vrot.lane.b32.xlu1 %v5550_v48, %s3135_s17  ;;  %1801 = vrot.lane.b32.xlu0 %v5551_v11, %s3135_s17  ;;  %v5560_v48 = vld [vmem:[#allocation47_spill] sm:$0xff] }
 0x1f0   : > { %v4556_v4 = vpop.permute.xlu1 %1763 }
 0x1f1   : > { %v4558_v12 = vpop.permute.xlu0 %1761 }
 0x1f2   : > { %1253 = vrot.lane.b32.xlu1 %v5511_v42, %s3135_s17  ;;  %1251 = vrot.lane.b32.xlu0 %v5512_v47, %s3135_s17  ;;  %v5552_v42 = vld [vmem:[#allocation17_spill] sm:$0xff]  ;;  %v5553_v47 = vld [vmem:[#allocation35_spill] sm:$0xff] }
 0x1f4   : > { %v4564_v34 = vpop.permute.xlu1 %1767 }
 0x1f5   : > { %v4566_v53 = vpop.permute.xlu0 %1765 }
 0x1f6   : > { %1265 = vrot.lane.b32.xlu1 %v5515_v58, %s3136_s18  ;;  %1263 = vrot.lane.b32.xlu0 %v5543_v10, %s3136_s18 }
 0x1f8   : > { %v4572_v57 = vpop.permute.xlu1 %1779 }
 0x1f9   : > { %v4574_v24 = vpop.permute.xlu0 %1777 }
 0x1fa   : > { %1807 = vrot.lane.b32.xlu1 %v5552_v42, %s3135_s17  ;;  %1805 = vrot.lane.b32.xlu0 %v5553_v47, %s3135_s17  ;;  %v5561_v47 = vld [vmem:[#allocation48_spill] sm:$0xff] }
 0x1fc   : > { %v1242_v27 = vpop.permute.xlu1 %1241 }
 0x1fd   : > { %v1240_v55 = vpop.permute.xlu0 %1239 }
 0x1fe   : > { %1819 = vrot.lane.b32.xlu1 %v3526_v22, %s3136_s18  ;;  %1817 = vrot.lane.b32.xlu0 %v3516_v46, %s3136_s18  ;;  %v2841_v22 = vcombine.low %v5554_v20, %v455_v7  ;;  %v5562_v20 = vld [vmem:[#allocation15_spill] sm:$0xff] }
 0x200   : > { %v4584_v58 = vpop.permute.xlu1 %1783 }
 0x201   : > { %v4586_v10 = vpop.permute.xlu0 %1781 }
 0x202   : > { %1269 = vrot.lane.b32.xlu1 %v5544_v56, %s3136_s18  ;;  %1267 = vrot.lane.b32.xlu0 %v5545_v23, %s3136_s18  ;;  %v5555_v56 = vld [vmem:[#allocation25_spill] sm:$0xff]  ;;  %v1831_v23 = vshll.u32 %v2841_v22, 16 }
 0x204   : > { %v4593_v0 = vpop.permute.xlu1 %1795 }
 0x205   : > { %v4595_v13 = vpop.permute.xlu0 %1793 }
 0x206   : > { %1291 = vrot.lane.b32.xlu1 %v5546_v36, %s3138_s22  ;;  %1289 = vrot.lane.b32.xlu0 %v5547_v6, %s3138_s22  ;;  %v1829_v36 = vshrl.u32 %v2841_v22, 16  ;;  %v1833_v6 = vrot.slane %v1831_v23, 1 }
 0x208   : > { %v4602_v46 = vpop.permute.xlu1 %1245 }
 0x209   : > { %v4604_v44 = vpop.permute.xlu0 %1243 }
 0x20a   : > { %1823 = vrot.lane.b32.xlu1 %v5555_v56, %s3136_s18  ;;  %1821 = vrot.lane.b32.xlu0 %v3524_v39, %s3136_s18  ;;  %v1834_v39 = vor.u32 %v1833_v6, %v1829_v36  ;;  %v5563_v56 = vld [vmem:[#allocation12_spill] sm:$0xff]  ;;  %v5564_v36 = vld [vmem:[#allocation38_spill] sm:$0xff] }
 0x20c   : > { %v1258_v28 = vpop.permute.xlu1 %1257 }
 0x20d   : > { %v1256_v15 = vpop.permute.xlu0 %1255 }
 0x20e   : > { %1845 = vrot.lane.b32.xlu1 %v4408_v54, %s3138_s22  ;;  %1843 = vrot.lane.b32.xlu0 %v5542_v45, %s3138_s22  ;;  %v1302_v54 = vsel %vm855_vm2, %v3076_v43, %v5556_v1  ;;  %v3077_v45 = vld [vmem:[%s3227_s16] sm:$0xf] }
 0x20f   : > { %v1299_v17 = vsel %vm855_vm2, %v3077_v45, %v5557_v60  ;;  %v1324_v14 = vsel %vm880_vm3, %v1302_v54, %v5558_v18 }
 0x210   : > { %v4614_v16 = vpop.permute.xlu1 %1799  ;;  %v1340_v11 = vsel %vm897_vm4, %v1324_v14, %v5560_v48 }
 0x211   : > { %v4616_v29 = vpop.permute.xlu0 %1797 }
 0x212   : > { %1295 = vrot.lane.b32.xlu1 %v1280_v33, %s3138_s22  ;;  %1293 = vrot.lane.b32.xlu0 %v5549_v2, %s3138_s22  ;;  %v5559_v33 = vld [vmem:[#allocation45_spill] sm:$0xff] }
 0x213   : > { %v1322_v2 = vsel %vm880_vm3, %v1299_v17, %v5559_v33  ;;  %v3078_v33 = vld [vmem:[%s3418_s14 + $0x8] sm:$0xf] }
 0x214   : > { %v1812_v3 = vpop.permute.xlu1 %1811  ;;  %v1338_v7 = vsel %vm897_vm4, %v1322_v2, %v5561_v47  ;;  %v1856_v2 = vsel %vm855_vm2, %v3078_v33, %v4483_v37  ;;  %v5572_v33 = vld [vmem:[#allocation21_spill] sm:$0xff] }
 0x215   : > { %v1810_v31 = vpop.permute.xlu0 %1809  ;;  %v1354_v23 = vsel %vm914_vm5, %v1338_v7, %v5563_v56  ;;  %v5566_v56 = vld [vmem:[#allocation30_spill] sm:$0xff] }
 0x216   : > { %1849 = vrot.lane.b32.xlu1 %v1834_v39, %s3138_s22  ;;  %1847 = vrot.lane.b32.xlu0 %v4406_v59, %s3138_s22  ;;  %v1356_v59 = vsel %vm914_vm5, %v1340_v11, %v5562_v20  ;;  %v5565_v39 = vld [vmem:[#allocation39_spill] sm:$0xff]  ;;  %v3079_v11 = vld [vmem:[%s3418_s14] sm:$0xf] }
 0x217   : > { %v1372_v6 = vsel %vm931_vm6, %v1356_v59, %v5564_v36  ;;  %v1370_v43 = vsel %vm931_vm6, %v1354_v23, %v5565_v39  ;;  %v3080_v59 = vld [vmem:[%s3227_s16 + $0x18] sm:$0xf]  ;;  %v3081_v23 = vld [vmem:[%s3227_s16 + $0x10] sm:$0xf] }
 0x218   : > { %v1262_v42 = vpop.permute.xlu1 %1261  ;;  %v1388_v1 = vsel %vm948_vm7, %v1372_v6, %v1242_v27  ;;  %v1386_v54 = vsel %vm948_vm7, %v1370_v43, %v1240_v55  ;;  %v1853_v27 = vsel %vm855_vm2, %v3079_v11, %v4489_v63  ;;  %v1878_v55 = vsel %vm880_vm3, %v1856_v2, %v4509_v25  ;;  %v5567_v36 = vld [vmem:[#allocation59_spill] sm:$0xff]  ;;  %v5573_v11 = vld [vmem:[#allocation18_spill] sm:$0xff] }
 0x219   : > { %v1260_v22 = vpop.permute.xlu0 %1259  ;;  %v1404_v45 = vsel %vm965_vm8, %v1388_v1, %v1258_v28  ;;  %v1402_v17 = vsel %vm965_vm8, %v1386_v54, %v1256_v15  ;;  %v1876_v15 = vsel %vm880_vm3, %v1853_v27, %v4514_v62  ;;  %v1894_v47 = vsel %vm897_vm4, %v1878_v55, %v4541_v41  ;;  %v5568_v6 = vld [vmem:[#allocation55_spill] sm:$0xff]  ;;  %v5569_v1 = vld [vmem:[#allocation56_spill] sm:$0xff] }
 0x21a   : > { %v1892_v37 = vsel %vm897_vm4, %v1876_v15, %v4543_v5  ;;  %v1910_v20 = vsel %vm914_vm5, %v1894_v47, %v4556_v4  ;;  %v1308_v25 = vsel %vm855_vm2, %v3080_v59, %v5566_v56  ;;  %v1305_v5 = vsel %vm855_vm2, %v3081_v23, %v5567_v36  ;;  %v5574_v55 = vld [vmem:[#allocation40_spill] sm:$0xff] }
 0x21b   : > { %v1908_v62 = vsel %vm914_vm5, %v1892_v37, %v4558_v12  ;;  %v1926_v41 = vsel %vm931_vm6, %v1910_v20, %v4572_v57  ;;  %v1328_v4 = vsel %vm880_vm3, %v1308_v25, %v5568_v6  ;;  %v1326_v54 = vsel %vm880_vm3, %v1305_v5, %v5569_v1  ;;  %v5570_v12 = vld [vmem:[#allocation57_spill] sm:$0xff] }
 0x21c   : > { %v1284_v60 = vpop.permute.xlu1 %1283  ;;  %v1924_v39 = vsel %vm931_vm6, %v1908_v62, %v4574_v24  ;;  %v1942_v43 = vsel %vm948_vm7, %v1926_v41, %v4593_v0 }
 0x21d   : > { %v1420_v18 = vsel %vm982_vm9, %v1404_v45, %v1284_v60  ;;  %v1282_v14 = vpop.permute.xlu0 %1281  ;;  %v1344_v45 = vsel %vm897_vm4, %v1328_v4, %v5570_v12  ;;  %v1940_v57 = vsel %vm948_vm7, %v1924_v39, %v4595_v13  ;;  %v1958_v60 = vsel %vm965_vm8, %v1942_v43, %v1812_v3 }
 0x21e   : > { %v1418_v48 = vsel %vm982_vm9, %v1402_v17, %v1282_v14  ;;  %v1360_v24 = vsel %vm914_vm5, %v1344_v45, %v5572_v33  ;;  %v1956_v0 = vsel %vm965_vm8, %v1940_v57, %v1810_v31 }
 0x21f   : > { %v2846_v28 = vcombine.low %v1418_v48, %v1420_v18  ;;  %v5571_v18 = vld [vmem:[#allocation58_spill] sm:$0xff]  ;;  %v1376_v13 = vsel %vm931_vm6, %v1360_v24, %v5574_v55 }
 0x220   : > { %v1816_v7 = vpop.permute.xlu1 %1815  ;;  %v1342_v14 = vsel %vm897_vm4, %v1326_v54, %v5571_v18  ;;  %v1392_v47 = vsel %vm948_vm7, %v1376_v13, %v4602_v46  ;;  %v1898_v46 = vsel %vm897_vm4, %v4532_v30, %v4548_v40  ;;  %v3082_v54 = vld [vmem:[%s3418_s14 + $0x28] sm:$0xf] }
 0x221   : > { %2912 = vmatprep.mubr.msk.bf16.mxu0 %vm2089_vm10, %v2846_v28  ;;  %v1814_v63 = vpop.permute.xlu0 %1813  ;;  %v1358_v27 = vsel %vm914_vm5, %v1342_v14, %v5573_v11  ;;  %v5575_v28 = vld [vmem:[#allocation10_spill] sm:$0xff]  ;;  %v1408_v20 = vsel %vm965_vm8, %v1392_v47, %v1262_v42  ;;  %v1914_v42 = vsel %vm914_vm5, %v1898_v46, %v4564_v34 }
 0x222   : > { %v1374_v15 = vsel %vm931_vm6, %v1358_v27, %v5575_v28  ;;  %v1930_v6 = vsel %vm931_vm6, %v1914_v42, %v4584_v58 }
 0x223   : > { %v1390_v31 = vsel %vm948_vm7, %v1374_v15, %v4604_v44  ;;  %v1896_v44 = vsel %vm897_vm4, %v4535_v51, %v4550_v8  ;;  %v1946_v51 = vsel %vm948_vm7, %v1930_v6, %v4614_v16 }
 0x224   : > { %v1838_v17 = vpop.permute.xlu1 %1837  ;;  %v1406_v56 = vsel %vm965_vm8, %v1390_v31, %v1260_v22  ;;  %v1912_v5 = vsel %vm914_vm5, %v1896_v44, %v4566_v53  ;;  %v1962_v8 = vsel %vm965_vm8, %v1946_v51, %v1816_v7 }
 0x225   : > { %v1974_v2 = vsel %vm982_vm9, %v1958_v60, %v1838_v17  ;;  %v1836_v48 = vpop.permute.xlu0 %1835  ;;  %v1928_v30 = vsel %vm931_vm6, %v1912_v5, %v4586_v10 }
 0x226   : > { %v1972_v3 = vsel %vm982_vm9, %v1956_v0, %v1836_v48  ;;  %v1944_v40 = vsel %vm948_vm7, %v1928_v30, %v4616_v29  ;;  %v3083_v29 = vld [vmem:[%s3418_s14 + $0x20] sm:$0xf] }
 0x227   : > { %v2854_v37 = vcombine.low %v1972_v3, %v1974_v2  ;;  %v1960_v4 = vsel %vm965_vm8, %v1944_v40, %v1814_v63  ;;  %v3084_v40 = vld [vmem:[%s3227_s16 + $0x28] sm:$0xf] }
 0x228   : > { %v1288_v59 = vpop.permute.xlu1 %1287 }
 0x229   : > { %v1424_v25 = vsel %vm982_vm9, %v1408_v20, %v1288_v59  ;;  %2928 = vmatprep.mubr.msk.bf16.mxu1 %vm2089_vm10, %v2854_v37  ;;  %v1286_v62 = vpop.permute.xlu0 %1285 }
 0x22a   : > { %v1422_v41 = vsel %vm982_vm9, %v1406_v56, %v1286_v62 }
 0x22b   : > { %v2847_v23 = vcombine.low %v1422_v41, %v1424_v25 }
 0x22c   : > { %v1724_v36 = vpop.permute.xlu1 %1723 }
 0x22d   : > { %2913 = vmatmul.mubr.msk.bf16.gmra.mrb[8].mxu0 %vm2089_vm10, %v2847_v23  ;;  %v1722_v22 = vpop.permute.xlu0 %1721  ;;  %v1868_v16 = vsel %vm855_vm2, %v3082_v54, %v1724_v36 }
 0x22e   : > { %v1865_v7 = vsel %vm855_vm2, %v3083_v29, %v1722_v22  ;;  %v5580_v29 = vld [vmem:[#allocation62_spill] sm:$0xff] }
 0x230   : > { %v1842_v34 = vpop.permute.xlu1 %1841 }
 0x231   : > { %v1978_v53 = vsel %vm982_vm9, %v1962_v8, %v1842_v34  ;;  %v1840_v39 = vpop.permute.xlu0 %1839  ;;  %v5576_v8 = vld [vmem:[#allocation26_spill] sm:$0xff] }
 0x232   : > { %v1976_v58 = vsel %vm982_vm9, %v1960_v4, %v1840_v39  ;;  %v1314_v34 = vsel %vm855_vm2, %v3084_v40, %v5576_v8  ;;  %v3085_v39 = vld [vmem:[%s3227_s16 + $0x20] sm:$0xf] }
 0x233   : > { %v2855_v43 = vcombine.low %v1976_v58, %v1978_v53  ;;  %v5577_v58 = vld [vmem:[#allocation27_spill] sm:$0xff]  ;;  %v5584_v40 = vld [vmem:[#allocation41_spill] sm:$0xff] }
 0x234   : > { %v1728_v1 = vpop.permute.xlu1 %1727 }
 0x235   : > { %2929 = vmatmul.mubr.msk.bf16.gmra.mrb[8].mxu1 %vm2089_vm10, %v2855_v43  ;;  %v1726_v10 = vpop.permute.xlu0 %1725  ;;  %v1874_v60 = vsel %vm855_vm2, %v4387_v26, %v1728_v1  ;;  %v1311_v43 = vsel %vm855_vm2, %v3085_v39, %v5577_v58  ;;  %v5578_v1 = vld [vmem:[#allocation60_spill] sm:$0xff] }
 0x236   : > { %v1871_v18 = vsel %vm855_vm2, %v4391_v19, %v1726_v10  ;;  %v1332_v10 = vsel %vm880_vm3, %v1314_v34, %v5578_v1  ;;  %v5585_v34 = vld [vmem:[#allocation9_spill] sm:$0xff] }
 0x238   : > { %v1740_v12 = vpop.permute.xlu1 %1739 }
 0x239   : > { %v4743_v45 = vsel %vm880_vm3, %v1868_v16, %v1740_v12  ;;  %v1738_v63 = vpop.permute.xlu0 %1737  ;;  %v5579_v16 = vld [vmem:[#allocation61_spill] sm:$0xff] }
 0x23a   : > { %v4746_v57 = vsel %vm880_vm3, %v1865_v7, %v1738_v63  ;;  %v1330_v12 = vsel %vm880_vm3, %v1311_v43, %v5579_v16  ;;  %v1348_v7 = vsel %vm897_vm4, %v1332_v10, %v5580_v29 }
 0x23c   : > { %v1744_v17 = vpop.permute.xlu1 %1743 }
 0x23d   : > { %v4753_v14 = vsel %vm880_vm3, %v1874_v60, %v1744_v17  ;;  %v1742_v33 = vpop.permute.xlu0 %1741  ;;  %v5581_v60 = vld [vmem:[#allocation63_spill] sm:$0xff] }
 0x23e   : > { %v4756_v24 = vsel %vm880_vm3, %v1871_v18, %v1742_v33  ;;  %v1346_v17 = vsel %vm897_vm4, %v1330_v12, %v5581_v60  ;;  %v5582_v18 = vld [vmem:[#allocation23_spill] sm:$0xff] }
 0x23f   : > { %v1364_v33 = vsel %vm914_vm5, %v1348_v7, %v5582_v18  ;;  %v3086_v18 = vld [vmem:[%s3227_s16 + $0x38] sm:$0xf] }
 0x240   : > { %v1756_v0 = vpop.permute.xlu1 %1755  ;;  %v1380_v8 = vsel %vm931_vm6, %v1364_v33, %v5584_v40  ;;  %v3087_v40 = vld [vmem:[%s3227_s16 + $0x30] sm:$0xf] }
 0x241   : > { %v1754_v2 = vpop.permute.xlu0 %1753  ;;  %v1902_v60 = vsel %vm897_vm4, %v4743_v45, %v1756_v0  ;;  %v5588_v0 = vld [vmem:[#allocation8_spill] sm:$0xff] }
 0x244   : > { %v4758_v48 = vpop.permute.xlu1 %1759 }
 0x245   : > { %v4760_v11 = vpop.permute.xlu0 %1757 }
 0x248   : > { %v1772_v27 = vpop.permute.xlu1 %1771 }
 0x249   : > { %v1770_v55 = vpop.permute.xlu0 %1769 }
 0x24c   : > { %v4762_v26 = vpop.permute.xlu1 %1775 }
 0x24d   : > { %v4764_v13 = vpop.permute.xlu0 %1773 }
 0x250   : > { %v1788_v19 = vpop.permute.xlu1 %1787 }
 0x251   : > { %v1786_v3 = vpop.permute.xlu0 %1785 }
 0x254   : > { %v4766_v28 = vpop.permute.xlu1 %1237 }
 0x255   : > { %v4768_v15 = vpop.permute.xlu0 %1235 }
 0x258   : > { %v1250_v47 = vpop.permute.xlu1 %1249 }
 0x259   : > { %v1248_v37 = vpop.permute.xlu0 %1247  ;;  %v1396_v39 = vsel %vm948_vm7, %v1380_v8, %v1250_v47  ;;  %v1900_v47 = vsel %vm897_vm4, %v4746_v57, %v1754_v2  ;;  %v5587_v8 = vld [vmem:[#allocation5_spill] sm:$0xff] }
 0x25a   : > { %v1317_v45 = vsel %vm855_vm2, %v3087_v40, %v5587_v8 }
 0x25c   : > { %v4770_v31 = vpop.permute.xlu1 %1791 }
 0x25d   : > { %v4772_v20 = vpop.permute.xlu0 %1789 }
 0x260   : > { %v1804_v59 = vpop.permute.xlu1 %1803 }
 0x261   : > { %v1802_v56 = vpop.permute.xlu0 %1801 }
 0x264   : > { %v4774_v25 = vpop.permute.xlu1 %1253 }
 0x265   : > { %v4776_v62 = vpop.permute.xlu0 %1251 }
 0x268   : > { %v1266_v41 = vpop.permute.xlu1 %1265 }
 0x269   : > { %v1264_v23 = vpop.permute.xlu0 %1263  ;;  %v1412_v43 = vsel %vm965_vm8, %v1396_v39, %v1266_v41  ;;  %v5590_v39 = vld [vmem:[#allocation13_spill] sm:$0xff] }
 0x26c   : > { %v4778_v46 = vpop.permute.xlu1 %1807 }
 0x26d   : > { %v4780_v36 = vpop.permute.xlu0 %1805 }
 0x26f   : > { %v2922_v44 = vpop.f32.mrb[0].mxu1 }
 0x270   : > { %v4783_v42 = vadd.f32 %v2922_v44, %v4474_v61  ;;  %v1820_v22 = vpop.permute.xlu1 %1819  ;;  %v2243_v5 = vpop.f32.mrb[1].mxu1 }
 0x271   : > { %v4786_v6 = vadd.f32 %v4474_v61, %v2243_v5  ;;  %v1818_v30 = vpop.permute.xlu0 %1817  ;;  %v2923_v51 = vpop.f32.mrb[2].mxu1  ;;  %v5583_v5 = vld [vmem:[#allocation20_spill] sm:$0xff] }
 0x272   : > { %v4792_v4 = vadd.f32 %v2923_v51, %v4474_v61  ;;  %v2246_v53 = vpop.f32.mrb[3].mxu1  ;;  %v1362_v51 = vsel %vm914_vm5, %v1346_v17, %v5583_v5  ;;  %v1916_v5 = vsel %vm914_vm5, %v1900_v47, %v1770_v55 }
 0x273   : > { %v4800_v54 = vadd.f32 %v4474_v61, %v2246_v53  ;;  %v1378_v53 = vsel %vm931_vm6, %v1362_v51, %v5585_v34  ;;  %v1932_v2 = vsel %vm931_vm6, %v1916_v5, %v1786_v3  ;;  %v5589_v34 = vld [vmem:[#allocation4_spill] sm:$0xff] }
 0x274   : > { %v1270_v63 = vpop.permute.xlu1 %1269  ;;  %v1394_v58 = vsel %vm948_vm7, %v1378_v53, %v1248_v37  ;;  %v1918_v37 = vsel %vm914_vm5, %v1902_v60, %v1772_v27  ;;  %v1334_v53 = vsel %vm880_vm3, %v1317_v45, %v5589_v34  ;;  %v1948_v55 = vsel %vm948_vm7, %v1932_v2, %v1802_v56 }
 0x275   : > { %v1268_v44 = vpop.permute.xlu0 %1267  ;;  %v1410_v10 = vsel %vm965_vm8, %v1394_v58, %v1264_v23  ;;  %v5586_v23 = vld [vmem:[#allocation3_spill] sm:$0xff]  ;;  %v1934_v51 = vsel %vm931_vm6, %v1918_v37, %v1788_v19  ;;  %v1964_v3 = vsel %vm965_vm8, %v1948_v55, %v1818_v30  ;;  %v1906_v30 = vsel %vm897_vm4, %v4753_v14, %v4758_v48 }
 0x276   : > { %v1320_v33 = vsel %vm855_vm2, %v3086_v18, %v5586_v23  ;;  %v1950_v27 = vsel %vm948_vm7, %v1934_v51, %v1804_v59 }
 0x277   : > { %v1336_v57 = vsel %vm880_vm3, %v1320_v33, %v5588_v0  ;;  %v1966_v19 = vsel %vm965_vm8, %v1950_v27, %v1820_v22 }
 0x278   : > { %v1292_v1 = vpop.permute.xlu1 %1291  ;;  %v1352_v58 = vsel %vm897_vm4, %v1336_v57, %v5590_v39 }
 0x279   : > { %v1428_v16 = vsel %vm982_vm9, %v1412_v43, %v1292_v1  ;;  %v1290_v12 = vpop.permute.xlu0 %1289  ;;  %v5591_v1 = vld [vmem:[#allocation11_spill] sm:$0xff] }
 0x27a   : > { %v1426_v29 = vsel %vm982_vm9, %v1410_v10, %v1290_v12  ;;  %v1350_v10 = vsel %vm897_vm4, %v1334_v53, %v5591_v1 }
 0x27b   : > { %v2848_v7 = vcombine.low %v1426_v29, %v1428_v16  ;;  %v5592_v16 = vld [vmem:[#allocation34_spill] sm:$0xff] }
 0x27c   : > { %v1824_v17 = vpop.permute.xlu1 %1823  ;;  %v1368_v12 = vsel %vm914_vm5, %v1352_v58, %v5592_v16 }
 0x27d   : > { %2916 = vmatprep.mubr.msk.bf16.mxu0 %vm2089_vm10, %v2848_v7  ;;  %v1822_v41 = vpop.permute.xlu0 %1821  ;;  %v5593_v7 = vld [vmem:[#allocation37_spill] sm:$0xff]  ;;  %v1384_v56 = vsel %vm931_vm6, %v1368_v12, %v4766_v28  ;;  %v1904_v28 = vsel %vm897_vm4, %v4756_v24, %v4760_v11 }
 0x27e   : > { %v1366_v60 = vsel %vm914_vm5, %v1350_v10, %v5593_v7  ;;  %v1400_v37 = vsel %vm948_vm7, %v1384_v56, %v4774_v25  ;;  %v1920_v48 = vsel %vm914_vm5, %v1904_v28, %v4764_v13 }
 0x27f   : > { %v1382_v47 = vsel %vm931_vm6, %v1366_v60, %v4768_v15  ;;  %v1416_v33 = vsel %vm965_vm8, %v1400_v37, %v1270_v63  ;;  %v1922_v15 = vsel %vm914_vm5, %v1906_v30, %v4762_v26  ;;  %v1936_v24 = vsel %vm931_vm6, %v1920_v48, %v4772_v20 }
 0x280   : > { %v1846_v43 = vpop.permute.xlu1 %1845  ;;  %v1398_v23 = vsel %vm948_vm7, %v1382_v47, %v4776_v62  ;;  %v1938_v62 = vsel %vm931_vm6, %v1922_v15, %v4770_v31 }
 0x281   : > { %v1982_v59 = vsel %vm982_vm9, %v1966_v19, %v1846_v43  ;;  %v1844_v29 = vpop.permute.xlu0 %1843  ;;  %v1414_v25 = vsel %vm965_vm8, %v1398_v23, %v1268_v44  ;;  %v1954_v11 = vsel %vm948_vm7, %v1938_v62, %v4778_v46  ;;  %v1952_v44 = vsel %vm948_vm7, %v1936_v24, %v4780_v36 }
 0x282   : > { %v1980_v22 = vsel %vm982_vm9, %v1964_v3, %v1844_v29  ;;  %v1970_v40 = vsel %vm965_vm8, %v1954_v11, %v1824_v17  ;;  %v1968_v13 = vsel %vm965_vm8, %v1952_v44, %v1822_v41  ;;  %v3139_v24 = vmov (!%p4906_p9), 0.0  }
 0x283   : > { %v2856_v18 = vcombine.low %v1980_v22, %v1982_v59  ;;  %2313 = vst.msk [vmem:[#allocation2] sm:$0x3] (!%p4906_p9), %vm2312_vm11, %v3139_v24 }
 0x284   : > { %v1296_v5 = vpop.permute.xlu1 %1295 }
 0x285   : > { %v1432_v51 = vsel %vm982_vm9, %v1416_v33, %v1296_v5  ;;  %2932 = vmatprep.mubr.msk.bf16.mxu1 %vm2089_vm10, %v2856_v18  ;;  %v1294_v14 = vpop.permute.xlu0 %1293 }
 0x286   : > { %v1430_v63 = vsel %vm982_vm9, %v1414_v25, %v1294_v14 }
 0x287   : > { %v2849_v26 = vcombine.low %v1430_v63, %v1432_v51 }
 0x288   : > { %v1850_v8 = vpop.permute.xlu1 %1849 }
 0x289   : > { %v1986_v31 = vsel %vm982_vm9, %v1970_v40, %v1850_v8  ;;  %2917 = vmatmul.mubr.msk.bf16.gmra.mrb[12].mxu0 %vm2089_vm10, %v2849_v26  ;;  %v1848_v45 = vpop.permute.xlu0 %1847 }
 0x28a   : > { %v1984_v20 = vsel %vm982_vm9, %v1968_v13, %v1848_v45 }
 0x28b   : > { %v2857_v0 = vcombine.low %v1984_v20, %v1986_v31 }
 0x28d   : > { %2933 = vmatmul.mubr.msk.bf16.gmra.mrb[12].mxu1 %vm2089_vm10, %v2857_v0 }
 0x2ab   : > { %v2926_v46 = vpop.f32.mrb[4].mxu1 }
 0x2ac   : > { %v4893_v36 = vadd.f32 %v2926_v46, %v4474_v61  ;;  %v2259_v17 = vpop.f32.mrb[5].mxu1 }
 0x2ad   : > { %v4896_v57 = vadd.f32 %v4474_v61, %v2259_v17  ;;  %v2927_v41 = vpop.f32.mrb[6].mxu1 }
 0x2ae   : > { %v4899_v2 = vadd.f32 %v2927_v41, %v4474_v61  ;;  %v2262_v27 = vpop.f32.mrb[7].mxu1 }
 0x2af   : > { %v4902_v34 = vadd.f32 %v4474_v61, %v2262_v27 }
 0x300   : > { %v2914_v53 = vpop.f32.mrb[8].mxu0 }
 0x301   : > { %v4911_v39 = vadd.f32 %v2914_v53, %v4474_v61  ;;  %v2211_v58 = vpop.f32.mrb[9].mxu0 }
 0x302   : > { %v4914_v55 = vadd.f32 %v4474_v61, %v2211_v58  ;;  %v2915_v19 = vpop.f32.mrb[10].mxu0 }
 0x303   : > { %v4917_v43 = vadd.f32 %v2915_v19, %v4474_v61  ;;  %v2214_v1 = vpop.f32.mrb[11].mxu0 }
 0x304   : > { %v4920_v10 = vadd.f32 %v4474_v61, %v2214_v1 }
 0x308   : > { %v2930_v16 = vpop.f32.mrb[8].mxu1 }
 0x309   : > { %v4923_v12 = vadd.f32 %v2930_v16, %v4474_v61  ;;  %v2275_v3 = vpop.f32.mrb[9].mxu1 }
 0x30a   : > { %v4926_v59 = vadd.f32 %v4474_v61, %v2275_v3  ;;  %v2931_v29 = vpop.f32.mrb[10].mxu1 }
 0x30b   : > { %v4929_v7 = vadd.f32 %v2931_v29, %v4474_v61  ;;  %v2278_v60 = vpop.f32.mrb[11].mxu1 }
 0x30c   : > { %v4932_v56 = vadd.f32 %v4474_v61, %v2278_v60 }
 0x35c   : > { %v2918_v22 = vpop.f32.mrb[12].mxu0 }
 0x35d   : > { %v4935_v47 = vadd.f32 %v2918_v22, %v4474_v61  ;;  %v2227_v37 = vpop.f32.mrb[13].mxu0 }
 0x35e   : > { %v4938_v18 = vadd.f32 %v4474_v61, %v2227_v37  ;;  %v2919_v30 = vpop.f32.mrb[14].mxu0  ;;  %2311 = sbr.rel (%p4906_p9) target bundleno = 869 (0x365), region = 56 }
 0x35f   : > { %v4941_v23 = vadd.f32 %v2919_v30, %v4474_v61  ;;  %v2230_v33 = vpop.f32.mrb[15].mxu0 }
 0x360   : > { %v4944_v5 = vadd.f32 %v4474_v61, %v2230_v33  ;;  %v2934_v28 = vpop.f32.mrb[12].mxu1 }
 0x361   : > { %v4947_v15 = vadd.f32 %v2934_v28, %v4474_v61  ;;  %v2291_v25 = vpop.f32.mrb[13].mxu1 }
 0x362   : > { %v4950_v51 = vadd.f32 %v4474_v61, %v2291_v25  ;;  %v2935_v14 = vpop.f32.mrb[14].mxu1 }
 0x363   : > { %v4953_v48 = vadd.f32 %v2935_v14, %v4474_v61  ;;  %v2294_v62 = vpop.f32.mrb[15].mxu1 }
 0x364   : > { %v4956_v63 = vadd.f32 %v4474_v61, %v2294_v62 }
 0x365 PF: > { %p2877_p10 = scmp.ne.s32.totalorder %s3116_s28, 0 }
 0x366   : > { %vm2318_vm12 = vcmask (!%p2877_p10), 261120   ;;  %v2392_v58 = vmul.f32 (!%p2877_p10), %v4487_v21, %v4487_v21  ;;  %v2393_v1 = vmul.f32 (!%p2877_p10), %v4499_v32, %v4499_v32  ;;  %v2394_v16 = vmul.f32 (!%p2877_p10), %v4481_v49, %v4481_v49 }
 0x367   : > { %2316 = sbr.rel (%p2877_p10) target bundleno = 957 (0x3bd), region = 60  ;;  %v2319_v11 = vsel (!%p2877_p10), %vm2318_vm12, %v4487_v21, 0.0  ;;  %v2320_v26 = vsel (!%p2877_p10), %vm2318_vm12, %v4499_v32, 0.0  ;;  %v2322_v61 = vsel (!%p2877_p10), %vm2318_vm12, %v4481_v49, 0.0  ;;  %v2324_v40 = vsel (!%p2877_p10), %vm2318_vm12, %v4492_v38, 0.0 }
 0x368   : > { %v2321_v44 = vadd.f32 (!%p2877_p10), %v2320_v26, %v2319_v11  ;;  %v2326_v13 = vsel (!%p2877_p10), %vm2318_vm12, %v4512_v52, 0.0  ;;  %v2328_v45 = vsel (!%p2877_p10), %vm2318_vm12, %v4525_v50, 0.0  ;;  %v2330_v0 = vsel (!%p2877_p10), %vm2318_vm12, %v4507_v35, 0.0 }
 0x369   : > { %v2332_v17 = vsel (!%p2877_p10), %vm2318_vm12, %v4517_v9, 0.0  ;;  %v2334_v27 = vsel (!%p2877_p10), %vm2318_vm12, %v4914_v55, 0.0  ;;  %v2336_v19 = vsel (!%p2877_p10), %vm2318_vm12, %v4920_v10, 0.0  ;;  %v2338_v29 = vsel (!%p2877_p10), %vm2318_vm12, %v4911_v39, 0.0 }
 0x36a   : > { %v2323_v8 = vadd.f32 (!%p2877_p10), %v2322_v61, %v2321_v44  ;;  %v2395_v60 = vmul.f32 (!%p2877_p10), %v4492_v38, %v4492_v38  ;;  %v2424_v37 = vsel (!%p2877_p10), %vm2318_vm12, %v2392_v58, 0.0  ;;  %v2340_v30 = vsel (!%p2877_p10), %vm2318_vm12, %v4917_v43, 0.0 }
 0x36b   : > { %v2396_v33 = vmul.f32 (!%p2877_p10), %v4512_v52, %v4512_v52  ;;  %v2425_v28 = vsel (!%p2877_p10), %vm2318_vm12, %v2393_v1, 0.0  ;;  %v2427_v25 = vsel (!%p2877_p10), %vm2318_vm12, %v2394_v16, 0.0  ;;  %v2342_v24 = vsel (!%p2877_p10), %vm2318_vm12, %v4938_v18, 0.0 }
 0x36c   : > { %v2325_v31 = vadd.f32 (!%p2877_p10), %v2324_v40, %v2323_v8  ;;  %v2426_v62 = vadd.f32 (!%p2877_p10), %v2425_v28, %v2424_v37  ;;  %v2397_v11 = vmul.f32 (!%p2877_p10), %v4525_v50, %v4525_v50  ;;  %v2429_v26 = vsel (!%p2877_p10), %vm2318_vm12, %v2395_v60, 0.0 }
 0x36d   : > { %v2344_v40 = vsel (!%p2877_p10), %vm2318_vm12, %v4944_v5, 0.0  ;;  %v2398_v8 = vmul.f32 (!%p2877_p10), %v4507_v35, %v4507_v35  ;;  %v2350_v16 = vsel (!%p2877_p10), %vm2318_vm12, %v4786_v6, 0.0  ;;  %v2352_v37 = vsel (!%p2877_p10), %vm2318_vm12, %v4800_v54, 0.0 }
 0x36e   : > { %v2327_v20 = vadd.f32 %v2326_v13, %v2325_v31  ;;  %v2428_v44 = vadd.f32 %v2427_v25, %v2426_v62  ;;  %v2431_v13 = vsel %vm2318_vm12, %v2396_v33, 0.0  ;;  %v2403_v62 = vmul.f32 %v4917_v43, %v4917_v43 }
 0x36f   : > { %v2435_v58 = vsel %vm2318_vm12, %v2398_v8, 0.0  ;;  %vm2389_vm13 = vcmask 253952  }
 0x370   : > { %v2329_v46 = vadd.f32 %v2328_v45, %v2327_v20  ;;  %v2430_v45 = vadd.f32 %v2429_v26, %v2428_v44  ;;  %v2346_v20 = vsel %vm2318_vm12, %v4935_v47, 0.0  ;;  %v2404_v44 = vmul.f32 %v4938_v18, %v4938_v18 }
 0x372   : > { %v2331_v41 = vadd.f32 %v2330_v0, %v2329_v46  ;;  %v2399_v0 = vmul.f32 %v4517_v9, %v4517_v9  ;;  %v2433_v46 = vsel %vm2318_vm12, %v2397_v11, 0.0 }
 0x374   : > { %v2333_v53 = vadd.f32 %v2332_v17, %v2331_v41  ;;  %v2432_v41 = vadd.f32 %v2431_v13, %v2430_v45  ;;  %v2405_v45 = vmul.f32 %v4944_v5, %v4944_v5 }
 0x376   : > { %v2335_v3 = vadd.f32 %v2334_v27, %v2333_v53  ;;  %v2348_v27 = vsel %vm2318_vm12, %v4941_v23, 0.0  ;;  %v2400_v53 = vmul.f32 %v4914_v55, %v4914_v55  ;;  %v2434_v1 = vadd.f32 %v2433_v46, %v2432_v41 }
 0x377   : > { %v2406_v41 = vmul.f32 %v4935_v47, %v4935_v47 }
 0x378   : > { %v2337_v22 = vadd.f32 %v2336_v19, %v2335_v3  ;;  %v2401_v3 = vmul.f32 %v4920_v10, %v4920_v10  ;;  %v2439_v33 = vsel %vm2318_vm12, %v2400_v53, 0.0 }
 0x37a   : > { %v2339_v14 = vadd.f32 %v2338_v29, %v2337_v22  ;;  %v2437_v29 = vsel %vm2318_vm12, %v2399_v0, 0.0  ;;  %v2436_v22 = vadd.f32 %v2435_v58, %v2434_v1  ;;  %v2407_v1 = vmul.f32 %v4941_v23, %v4941_v23 }
 0x37c   : > { %v2341_v61 = vadd.f32 %v2340_v30, %v2339_v14  ;;  %v2402_v30 = vmul.f32 %v4911_v39, %v4911_v39  ;;  %v2438_v25 = vadd.f32 %v2437_v29, %v2436_v22  ;;  %v2354_v14 = vsel %vm2318_vm12, %v4783_v42, 0.0 }
 0x37d   : > { %v2408_v22 = vmul.f32 %v4786_v6, %v4786_v6 }
 0x37e   : > { %v2343_v31 = vadd.f32 %v2342_v24, %v2341_v61  ;;  %v2441_v24 = vsel %vm2318_vm12, %v2401_v3, 0.0  ;;  %v2440_v26 = vadd.f32 %v2439_v33, %v2438_v25  ;;  %v2356_v61 = vsel %vm2318_vm12, %v4792_v4, 0.0 }
 0x37f   : > { %v2409_v25 = vmul.f32 %v4800_v54, %v4800_v54 }
 0x380   : > { %v2345_v17 = vadd.f32 %v2344_v40, %v2343_v31  ;;  %v2443_v40 = vsel %vm2318_vm12, %v2402_v30, 0.0  ;;  %v2442_v13 = vadd.f32 %v2441_v24, %v2440_v26  ;;  %v2358_v31 = vsel %vm2318_vm12, %v4896_v57, 0.0 }
 0x381   : > { %v2410_v26 = vmul.f32 %v4783_v42, %v4783_v42 }
 0x382   : > { %v2347_v19 = vadd.f32 %v2346_v20, %v2345_v17  ;;  %v2445_v20 = vsel %vm2318_vm12, %v2403_v62, 0.0  ;;  %v2444_v46 = vadd.f32 %v2443_v40, %v2442_v13  ;;  %v2360_v17 = vsel %vm2318_vm12, %v4902_v34, 0.0 }
 0x383   : > { %v2411_v13 = vmul.f32 %v4792_v4, %v4792_v4 }
 0x384   : > { %v2349_v60 = vadd.f32 %v2348_v27, %v2347_v19  ;;  %v2447_v27 = vsel %vm2318_vm12, %v2404_v44, 0.0  ;;  %v2446_v58 = vadd.f32 %v2445_v20, %v2444_v46  ;;  %v2362_v19 = vsel %vm2318_vm12, %v4893_v36, 0.0 }
 0x385   : > { %v2412_v46 = vmul.f32 %v4896_v57, %v4896_v57 }
 0x386   : > { %v2351_v28 = vadd.f32 %v2350_v16, %v2349_v60  ;;  %v2449_v16 = vsel %vm2318_vm12, %v2405_v45, 0.0  ;;  %v2448_v29 = vadd.f32 %v2447_v27, %v2446_v58  ;;  %v2364_v60 = vsel %vm2318_vm12, %v4899_v2, 0.0 }
 0x387   : > { %v2413_v58 = vmul.f32 %v4902_v34, %v4902_v34 }
 0x388   : > { %v2353_v11 = vadd.f32 %v2352_v37, %v2351_v28  ;;  %v2451_v37 = vsel %vm2318_vm12, %v2406_v41, 0.0  ;;  %v2450_v33 = vadd.f32 %v2449_v16, %v2448_v29  ;;  %v2366_v28 = vsel %vm2318_vm12, %v4926_v59, 0.0 }
 0x389   : > { %v2414_v29 = vmul.f32 %v4893_v36, %v4893_v36 }
 0x38a   : > { %v2355_v8 = vadd.f32 %v2354_v14, %v2353_v11  ;;  %v2453_v14 = vsel %vm2318_vm12, %v2407_v1, 0.0  ;;  %v2452_v24 = vadd.f32 %v2451_v37, %v2450_v33  ;;  %v2368_v11 = vsel %vm2318_vm12, %v4932_v56, 0.0 }
 0x38b   : > { %v2415_v33 = vmul.f32 %v4899_v2, %v4899_v2 }
 0x38c   : > { %v2357_v0 = vadd.f32 %v2356_v61, %v2355_v8  ;;  %v2455_v61 = vsel %vm2318_vm12, %v2408_v22, 0.0  ;;  %v2454_v40 = vadd.f32 %v2453_v14, %v2452_v24  ;;  %v2370_v8 = vsel %vm2318_vm12, %v4923_v12, 0.0 }
 0x38d   : > { %v2416_v24 = vmul.f32 %v4926_v59, %v4926_v59 }
 0x38e   : > { %v2359_v53 = vadd.f32 %v2358_v31, %v2357_v0  ;;  %v2457_v31 = vsel %vm2318_vm12, %v2409_v25, 0.0  ;;  %v2456_v20 = vadd.f32 %v2455_v61, %v2454_v40  ;;  %v2372_v0 = vsel %vm2318_vm12, %v4929_v7, 0.0 }
 0x38f   : > { %v2469_v40 = vsel %vm2318_vm12, %v2415_v33, 0.0 }
 0x390   : > { %v2361_v3 = vadd.f32 %v2360_v17, %v2359_v53  ;;  %v2459_v17 = vsel %vm2318_vm12, %v2410_v26, 0.0  ;;  %v2458_v27 = vadd.f32 %v2457_v31, %v2456_v20  ;;  %v2374_v53 = vsel %vm2318_vm12, %v4950_v51, 0.0 }
 0x391   : > { %v2418_v31 = vmul.f32 %v4923_v12, %v4923_v12 }
 0x392   : > { %v2363_v30 = vadd.f32 %v2362_v19, %v2361_v3  ;;  %v2461_v19 = vsel %vm2318_vm12, %v2411_v13, 0.0  ;;  %v2460_v16 = vadd.f32 %v2459_v17, %v2458_v27  ;;  %v2376_v3 = vsel %vm2318_vm12, %v4956_v63, 0.0 }
 0x394   : > { %v2365_v62 = vadd.f32 %v2364_v60, %v2363_v30  ;;  %v2463_v60 = vsel %vm2318_vm12, %v2412_v46, 0.0  ;;  %v2462_v37 = vadd.f32 %v2461_v19, %v2460_v16  ;;  %v2378_v30 = vsel %vm2318_vm12, %v4947_v15, 0.0 }
 0x395   : > { %v2419_v46 = vmul.f32 %v4929_v7, %v4929_v7  ;;  %v2421_v16 = vmul.f32 %v4956_v63, %v4956_v63 }
 0x396   : > { %v2367_v44 = vadd.f32 %v2366_v28, %v2365_v62  ;;  %v2465_v28 = vsel %vm2318_vm12, %v2413_v58, 0.0  ;;  %v2464_v14 = vadd.f32 %v2463_v60, %v2462_v37  ;;  %v2380_v62 = vsel %vm2318_vm12, %v4953_v48, 0.0 }
 0x397   : > { %v2475_v58 = vsel %vm2318_vm12, %v2418_v31, 0.0 }
 0x398   : > { %v2369_v45 = vadd.f32 %v2368_v11, %v2367_v44  ;;  %v2467_v11 = vsel %vm2318_vm12, %v2414_v29, 0.0  ;;  %v2466_v61 = vadd.f32 %v2465_v28, %v2464_v14  ;;  %v2417_v44 = vmul.f32 %v4932_v56, %v4932_v56  ;;  %v2317_v28 = vld [vmem:[#allocation2] sm:$0x1] }
 0x399   : > { %v2481_v14 = vsel %vm2318_vm12, %v2421_v16, 0.0 }
 0x39a   : > { %v2371_v41 = vadd.f32 %v2370_v8, %v2369_v45  ;;  %v2468_v13 = vadd.f32 %v2467_v11, %v2466_v61  ;;  %v2471_v45 = vsel %vm2318_vm12, %v2416_v24, 0.0  ;;  %v2473_v17 = vsel %vm2318_vm12, %v2417_v44, 0.0 }
 0x39c   : > { %v2373_v1 = vadd.f32 %v2372_v0, %v2371_v41  ;;  %v2470_v0 = vadd.f32 %v2469_v40, %v2468_v13 }
 0x39e   : > { %v2375_v22 = vadd.f32 %v2374_v53, %v2373_v1  ;;  %v2472_v27 = vadd.f32 %v2471_v45, %v2470_v0  ;;  %v2420_v53 = vmul.f32 %v4950_v51, %v4950_v51 }
 0x3a0   : > { %v2377_v25 = vadd.f32 %v2376_v3, %v2375_v22  ;;  %v2474_v1 = vadd.f32 %v2473_v17, %v2472_v27  ;;  %v2477_v3 = vsel %vm2318_vm12, %v2419_v46, 0.0  ;;  %v2422_v22 = vmul.f32 %v4947_v15, %v4947_v15  ;;  %v2391_v46 = vld [vmem:[#allocation2 + $0x1] sm:$0x1] }
 0x3a1   : > { %v2479_v37 = vsel %vm2318_vm12, %v2420_v53, 0.0 }
 0x3a2   : > { %v2379_v26 = vadd.f32 %v2378_v30, %v2377_v25  ;;  %v2476_v60 = vadd.f32 %v2475_v58, %v2474_v1  ;;  %v2423_v25 = vmul.f32 %v4953_v48, %v4953_v48  ;;  %v2483_v11 = vsel %vm2318_vm12, %v2422_v22, 0.0 }
 0x3a4   : > { %v2381_v8 = vadd.f32 %v2380_v62, %v2379_v26  ;;  %v2478_v33 = vadd.f32 %v2477_v3, %v2476_v60  ;;  %v2485_v44 = vsel %vm2318_vm12, %v2423_v25, 0.0 }
 0x3a6   : > { %v2382_v20 = vrot.slane %v2381_v8, 4  ;;  %v2480_v24 = vadd.f32 %v2479_v37, %v2478_v33 }
 0x3a8   : > { %v2383_v41 = vadd.f32 %v2382_v20, %v2381_v8  ;;  %v2482_v61 = vadd.f32 %v2481_v14, %v2480_v24 }
 0x3aa   : > { %v2384_v19 = vrot.slane %v2383_v41, 2  ;;  %v2484_v40 = vadd.f32 %v2483_v11, %v2482_v61 }
 0x3ac   : > { %v2385_v29 = vadd.f32 %v2384_v19, %v2383_v41  ;;  %v2486_v8 = vadd.f32 %v2485_v44, %v2484_v40 }
 0x3ae   : > { %v2386_v30 = vrot.slane %v2385_v29, 1  ;;  %v2487_v13 = vrot.slane %v2486_v8, 4 }
 0x3b0   : > { %v2387_v62 = vadd.f32 %v2386_v30, %v2385_v29  ;;  %v2488_v31 = vadd.f32 %v2487_v13, %v2486_v8 }
 0x3b2   : > { %v2388_v26 = vadd.f32 %v2387_v62, %v2317_v28  ;;  %v2489_v45 = vrot.slane %v2488_v31, 2 }
 0x3b4   : > { %2390 = vst.msk [vmem:[#allocation2] sm:$0x1] %vm2389_vm13, %v2388_v26  ;;  %v2490_v20 = vadd.f32 %v2489_v45, %v2488_v31 }
 0x3b6   : > { %v2491_v0 = vrot.slane %v2490_v20, 1 }
 0x3b8   : > { %v2492_v17 = vadd.f32 %v2491_v0, %v2490_v20 }
 0x3ba   : > { %v2493_v41 = vadd.f32 %v2492_v17, %v2391_v46 }
 0x3bc   : > { %2494 = vst.msk [vmem:[#allocation2 + $0x1] sm:$0x1] %vm2389_vm13, %v2493_v41 }
 0x3bd PF: > { %p2878_p11 = scmp.ne.s32.totalorder %s3116_s28, 1 }
 0x3be   : > { %v2499_v27 = vld [vmem:[#allocation2] sm:$0x1] (!%p2878_p11)  ;;  %v2514_v60 = vlaneseq (!%p2878_p11)  ;;  %v2506_v37 = vld [vmem:[%s5267_s6] sm:$0x1] (!%p2878_p11)  ;;  %vm2645_vm14 = vcmask (!%p2878_p11), 261120  }
 0x3bf   : > { %2498 = sbr.rel (%p2878_p11) target bundleno = 1024 (0x400), region = 64  ;;  %v2500_v58 = vmul.f32 (!%p2878_p11), 0.00078125, %v2499_v27  ;;  %v2510_v25 = vld [vmem:[%s5268_s7] sm:$0x1] (!%p2878_p11) }
 0x3c0   : > { %v2515_v22 = vshrl.u32 (!%p2878_p11), %v2514_v60, 7 }
 0x3c1   : > { %v2503_v1 = vmul.f32 (!%p2878_p11), %v2500_v58, %v2500_v58 }
 0x3c2   : > { %v2516_v30 = vsub.s32 (!%p2878_p11), 0, %v2515_v22 }
 0x3c3   : > { %v2501_v53 = vld [vmem:[#allocation2 + $0x1] sm:$0x1] (!%p2878_p11) }
 0x3c4   : > { %v2502_v19 = vmul.f32 (!%p2878_p11), 0.00078125, %v2501_v53 }
 0x3c6   : > { %v2504_v16 = vsub.f32 %v2502_v19, %v2503_v1 }
 0x3c8   : > { %v2505_v3 = vmax.f32 %v2504_v16, 0.0 }
 0x3ca   : > { %v2507_v29 = vadd.f32 1e-05, %v2505_v3 }
 0x3cc   : > { %3088 = vrsqrt.f32 %v2507_v29 }
 0x3d6   : > { %v3089_v33 = vpop.eup %3088 }
 0x3d7   : > { %v2509_v28 = vmul.f32 %v3089_v33, %v2506_v37 }
 0x3d9   : > { %v2511_v14 = vmul.f32 %v2509_v28, %v2500_v58  ;;  %v5130_v62 = vrot.slane %v2509_v28, %v2516_v30 }
 0x3db   : > { %v2512_v24 = vsub.f32 %v2510_v25, %v2511_v14  ;;  %v2519_v11 = vmul.f32 %v5130_v62, %v4487_v21  ;;  %v2527_v26 = vmul.f32 %v5130_v62, %v4914_v55  ;;  %v2535_v61 = vmul.f32 %v5130_v62, %v4786_v6 }
 0x3dc   : > { %v2543_v44 = vmul.f32 %v5130_v62, %v4926_v59  ;;  %v2520_v40 = vmul.f32 %v5130_v62, %v4499_v32  ;;  %v2528_v8 = vmul.f32 %v5130_v62, %v4920_v10  ;;  %v2536_v13 = vmul.f32 %v5130_v62, %v4800_v54 }
 0x3dd   : > { %v5146_v21 = vrot.slane %v2512_v24, %v2516_v30  ;;  %v2544_v55 = vmul.f32 %v5130_v62, %v4932_v56  ;;  %v2521_v6 = vmul.f32 %v5130_v62, %v4481_v49  ;;  %v2529_v59 = vmul.f32 %v5130_v62, %v4911_v39 }
 0x3de   : > { %v2537_v32 = vmul.f32 %v5130_v62, %v4783_v42  ;;  %v2545_v10 = vmul.f32 %v5130_v62, %v4923_v12  ;;  %v2522_v54 = vmul.f32 %v5130_v62, %v4492_v38  ;;  %v2530_v31 = vmul.f32 %v5130_v62, %v4917_v43 }
 0x3df   : > { %v2557_v56 = vadd.f32 %v5146_v21, %v2519_v11  ;;  %v2565_v45 = vadd.f32 %v5146_v21, %v2527_v26  ;;  %v2573_v49 = vadd.f32 %v5146_v21, %v2535_v61  ;;  %v2581_v39 = vadd.f32 %v5146_v21, %v2543_v44 }
 0x3e0   : > { %v2558_v20 = vadd.f32 %v5146_v21, %v2520_v40  ;;  %v2566_v42 = vadd.f32 %v5146_v21, %v2528_v8  ;;  %v2574_v12 = vadd.f32 %v5146_v21, %v2536_v13  ;;  %v2582_v0 = vadd.f32 %v5146_v21, %v2544_v55 }
 0x3e1   : > { %v2589_v38 = vmax.f32 %v2557_v56, 0.0  ;;  %v2597_v46 = vmax.f32 %v2565_v45, 0.0  ;;  %v2605_v17 = vmax.f32 %v2573_v49, 0.0  ;;  %v2613_v43 = vmax.f32 %v2581_v39, 0.0 }
 0x3e2   : > { %v2590_v41 = vmax.f32 %v2558_v20, 0.0  ;;  %v2598_v27 = vmax.f32 %v2566_v42, 0.0  ;;  %v2606_v53 = vmax.f32 %v2574_v12, 0.0  ;;  %v2614_v58 = vmax.f32 %v2582_v0, 0.0 }
 0x3e3   : > { %v2621_v19 = vmax.f32 %v2589_v38, %v2597_v46  ;;  %v2629_v1 = vmax.f32 %v2605_v17, %v2613_v43  ;;  %v2559_v16 = vadd.f32 %v5146_v21, %v2521_v6  ;;  %v2567_v3 = vadd.f32 %v5146_v21, %v2529_v59 }
 0x3e4   : > { %v2622_v29 = vmax.f32 %v2590_v41, %v2598_v27  ;;  %v2630_v60 = vmax.f32 %v2606_v53, %v2614_v58  ;;  %v2575_v22 = vadd.f32 %v5146_v21, %v2537_v32  ;;  %v2583_v37 = vadd.f32 %v5146_v21, %v2545_v10 }
 0x3e5   : > { %v2637_v30 = vmax.f32 %v2621_v19, %v2629_v1  ;;  %v2591_v33 = vmax.f32 %v2559_v16, 0.0  ;;  %v2599_v28 = vmax.f32 %v2567_v3, 0.0  ;;  %v2538_v25 = vmul.f32 %v5130_v62, %v4792_v4 }
 0x3e6   : > { %v2638_v14 = vmax.f32 %v2622_v29, %v2630_v60  ;;  %v2607_v24 = vmax.f32 %v2575_v22, 0.0  ;;  %v2615_v11 = vmax.f32 %v2583_v37, 0.0  ;;  %v2546_v26 = vmul.f32 %v5130_v62, %v4929_v7 }
 0x3e7   : > { %2646 = vst.msk [vmem:[%s3602_s12] sm:$0xff] %vm2645_vm14, %v2637_v30  ;;  %v2623_v61 = vmax.f32 %v2591_v33, %v2599_v28  ;;  %v2560_v44 = vadd.f32 %v5146_v21, %v2522_v54  ;;  %v2568_v40 = vadd.f32 %v5146_v21, %v2530_v31  ;;  %v2576_v8 = vadd.f32 %v5146_v21, %v2538_v25 }
 0x3e8   : > { %2647 = vst.msk [vmem:[%s3602_s12 + $0x8] sm:$0xff] %vm2645_vm14, %v2638_v14  ;;  %v2631_v13 = vmax.f32 %v2607_v24, %v2615_v11  ;;  %v2584_v4 = vadd.f32 %v5146_v21, %v2546_v26  ;;  %v2523_v55 = vmul.f32 %v5130_v62, %v4512_v52  ;;  %v2531_v7 = vmul.f32 %v5130_v62, %v4938_v18 }
 0x3e9   : > { %v2592_v6 = vmax.f32 %v2560_v44, 0.0  ;;  %v2600_v59 = vmax.f32 %v2568_v40, 0.0  ;;  %v2608_v32 = vmax.f32 %v2576_v8, 0.0  ;;  %v2539_v10 = vmul.f32 %v5130_v62, %v4896_v57 }
 0x3ea   : > { %v2639_v54 = vmax.f32 %v2623_v61, %v2631_v13  ;;  %v2616_v31 = vmax.f32 %v2584_v4, 0.0  ;;  %v2547_v56 = vmul.f32 %v5130_v62, %v4950_v51  ;;  %v2561_v45 = vadd.f32 %v5146_v21, %v2523_v55 }
 0x3eb   : > { %v2624_v49 = vmax.f32 %v2592_v6, %v2600_v59  ;;  %v2569_v39 = vadd.f32 %v5146_v21, %v2531_v7  ;;  %v2577_v52 = vadd.f32 %v5146_v21, %v2539_v10  ;;  %v2524_v18 = vmul.f32 %v5130_v62, %v4525_v50 }
 0x3ec   : > { %2648 = vst.msk [vmem:[%s3602_s12 + $0x10] sm:$0xff] %vm2645_vm14, %v2639_v54  ;;  %v2632_v20 = vmax.f32 %v2608_v32, %v2616_v31  ;;  %v2585_v57 = vadd.f32 %v5146_v21, %v2547_v56  ;;  %v2593_v42 = vmax.f32 %v2561_v45, 0.0  ;;  %v2532_v51 = vmul.f32 %v5130_v62, %v4944_v5 }
 0x3ed   : > { %v2601_v12 = vmax.f32 %v2569_v39, 0.0  ;;  %v2609_v0 = vmax.f32 %v2577_v52, 0.0  ;;  %v2540_v38 = vmul.f32 %v5130_v62, %v4902_v34  ;;  %v2548_v46 = vmul.f32 %v5130_v62, %v4956_v63 }
 0x3ee   : > { %v2640_v17 = vmax.f32 %v2624_v49, %v2632_v20  ;;  %v2617_v50 = vmax.f32 %v2585_v57, 0.0  ;;  %v2562_v43 = vadd.f32 %v5146_v21, %v2524_v18  ;;  %v2570_v41 = vadd.f32 %v5146_v21, %v2532_v51 }
 0x3ef   : > { %v2625_v27 = vmax.f32 %v2593_v42, %v2601_v12  ;;  %v2578_v53 = vadd.f32 %v5146_v21, %v2540_v38  ;;  %v2586_v58 = vadd.f32 %v5146_v21, %v2548_v46  ;;  %v2525_v5 = vmul.f32 %v5130_v62, %v4507_v35 }
 0x3f0   : > { %2649 = vst.msk [vmem:[%s3602_s12 + $0x18] sm:$0xff] %vm2645_vm14, %v2640_v17  ;;  %v2633_v34 = vmax.f32 %v2609_v0, %v2617_v50  ;;  %v2594_v19 = vmax.f32 %v2562_v43, 0.0  ;;  %v2602_v63 = vmax.f32 %v2570_v41, 0.0  ;;  %v2533_v1 = vmul.f32 %v5130_v62, %v4935_v47 }
 0x3f1   : > { %v2610_v16 = vmax.f32 %v2578_v53, 0.0  ;;  %v2618_v3 = vmax.f32 %v2586_v58, 0.0  ;;  %v2541_v29 = vmul.f32 %v5130_v62, %v4893_v36  ;;  %v2549_v60 = vmul.f32 %v5130_v62, %v4947_v15 }
 0x3f2   : > { %v2641_v22 = vmax.f32 %v2625_v27, %v2633_v34  ;;  %v2626_v37 = vmax.f32 %v2594_v19, %v2602_v63  ;;  %v2563_v35 = vadd.f32 %v5146_v21, %v2525_v5  ;;  %v2571_v30 = vadd.f32 %v5146_v21, %v2533_v1 }
 0x3f3   : > { %v2634_v33 = vmax.f32 %v2610_v16, %v2618_v3  ;;  %v2579_v28 = vadd.f32 %v5146_v21, %v2541_v29  ;;  %v2587_v47 = vadd.f32 %v5146_v21, %v2549_v60  ;;  %v2526_v25 = vmul.f32 %v5130_v62, %v4517_v9 }
 0x3f4   : > { %2650 = vst.msk [vmem:[%s3602_s12 + $0x20] sm:$0xff] %vm2645_vm14, %v2641_v22  ;;  %v2595_v36 = vmax.f32 %v2563_v35, 0.0  ;;  %v2603_v14 = vmax.f32 %v2571_v30, 0.0  ;;  %v2534_v15 = vmul.f32 %v5130_v62, %v4941_v23  ;;  %v2542_v24 = vmul.f32 %v5130_v62, %v4899_v2 }
 0x3f5   : > { %v2642_v11 = vmax.f32 %v2626_v37, %v2634_v33  ;;  %v2611_v26 = vmax.f32 %v2579_v28, 0.0  ;;  %v2619_v61 = vmax.f32 %v2587_v47, 0.0  ;;  %v2550_v44 = vmul.f32 %v5130_v62, %v4953_v48 }
 0x3f6   : > { %v2627_v40 = vmax.f32 %v2595_v36, %v2603_v14  ;;  %v2564_v9 = vadd.f32 %v5146_v21, %v2526_v25  ;;  %v2572_v8 = vadd.f32 %v5146_v21, %v2534_v15  ;;  %v2580_v13 = vadd.f32 %v5146_v21, %v2542_v24 }
 0x3f7   : > { %2651 = vst.msk [vmem:[%s3602_s12 + $0x28] sm:$0xff] %vm2645_vm14, %v2642_v11  ;;  %v2635_v23 = vmax.f32 %v2611_v26, %v2619_v61  ;;  %v2588_v2 = vadd.f32 %v5146_v21, %v2550_v44 }
 0x3f8   : > { %v2596_v4 = vmax.f32 %v2564_v9, 0.0  ;;  %v2604_v55 = vmax.f32 %v2572_v8, 0.0  ;;  %v2612_v7 = vmax.f32 %v2580_v13, 0.0 }
 0x3f9   : > { %v2643_v6 = vmax.f32 %v2627_v40, %v2635_v23  ;;  %v2620_v59 = vmax.f32 %v2588_v2, 0.0 }
 0x3fa   : > { %v2628_v32 = vmax.f32 %v2596_v4, %v2604_v55 }
 0x3fb   : > { %2652 = vst.msk [vmem:[%s3602_s12 + $0x30] sm:$0xff] %vm2645_vm14, %v2643_v6  ;;  %v2636_v48 = vmax.f32 %v2612_v7, %v2620_v59 }
 0x3fd   : > { %v2644_v62 = vmax.f32 %v2628_v32, %v2636_v48 }
 0x3ff   : > { %2653 = vst.msk [vmem:[%s3602_s12 + $0x38] sm:$0xff] %vm2645_vm14, %v2644_v62 }
 0x400 PF: > { %s18_s9 = sadd.s32 1, %s3128_s9   ;;  %s5595_s27 = smov %s3120_s29 }
 0x401   : > { %p15_p12 = scmp.ge.s32.totalorder %s18_s9, 12   ;;  %s5596_s28 = smov %s3124_s30 }
 0x402   : > { %s5597_s29 = smov %s5600_s10  ;;  %s5598_s30 = smov %s5604_s11 }
 0x403   :  { %17 = sbr.rel (!%p15_p12) target bundleno = 3 (0x3), region = 103 }

</bundles_post_ra>
